<compile_context>
chip_gen: v5e
topology: v5e:2x2
jax: 0.10.0
libtpu: 0.0.40
codegen_flags: <defaults>
</compile_context>

<pallas_src>
import jax
import jax.numpy as jnp
from jax import lax
from jax.experimental import pallas as pl
from jax.experimental.pallas import tpu as pltpu


def custom_model_forward(x, params):
    """Forward pass of Custom_Model as a single fused Pallas TPU kernel."""
    w1, b1, w2, b2, w3, b3 = params            # PyTorch-shaped parameters
    B, Cin, H, W = x.shape
    Ho, Wo = H - 2, W - 2
    Cout = w2.shape[0]                          # 64
    nclass = w3.shape[0]                        # 2

    # Padded geometry so all in-kernel accesses are friendly to (8, 128) tiling.
    Wp = ((W + 7) // 8) * 8                     # 40  -> kh*Wp row offsets 8-aligned
    Cp = ((Cin + 127) // 128) * 128             # 256 -> 2 lane tiles per slice
    R = Ho * Wp                                 # 240 output rows per batch (mult of 8)
    HWp = H * Wp                                # 320 flattened input rows per batch
    Rows = ((HWp + 2 + 7) // 8) * 8             # 328: room for the max (kh,kw) offset

    # ---- fold conv1x1 into conv3x3 (exact: no nonlinearity between them) ----
    w2m = w2[:, :, 0, 0]                                   # (Cout, Cmid)
    w1_t = w1.transpose(2, 3, 1, 0)                        # (3, 3, Cin, Cmid)
    wf = jnp.einsum('hwkm,om->hwko', w1_t, w2m,
                    precision=lax.Precision.HIGHEST)       # (3, 3, Cin, Cout)
    wf = jnp.pad(wf, ((0, 0), (0, 0), (0, Cp - Cin), (0, 0)))
    wf9 = wf.reshape(9, Cp, Cout)                          # per-(kh,kw) fused weights
    bf = (b1 @ w2m.T + b2).reshape(1, Cout)                # fused conv bias

    # ---- input: NCHW -> padded row-major NHWC (no duplication) --------------
    xp = jnp.pad(x, ((0, 0), (0, Cp - Cin), (0, 0), (0, Wp - W)))   # (B,Cp,H,Wp)
    xr = xp.transpose(0, 2, 3, 1).reshape(B, HWp, Cp)               # (B,HWp,Cp)
    xr = jnp.pad(xr, ((0, 0), (0, Rows - HWp), (0, 0)))             # (B,Rows,Cp)

    # ---- re-order Linear weights to the kernel's (row, lane) layout; rows of
    #      the padded width (wo >= Wo) are zeroed so garbage rows drop out ----
    w3_4 = w3.reshape(nclass, Cout, Ho, Wo).transpose(0, 2, 3, 1)   # (n,Ho,Wo,Cout)
    w3_r = jnp.zeros((nclass, Ho, Wp, Cout), w3.dtype)
    w3_r = w3_r.at[:, :, :Wo, :].set(w3_4).reshape(nclass, R, Cout)
    b3_2 = b3.reshape(1, nclass)

    def kernel(x_ref, wf_ref, bf_ref, w3_ref, b3_ref, o_ref):
        # x_ref : (1, Rows, Cp)      wf_ref: (9, Cp, Cout)   bf_ref: (1, Cout)
        # w3_ref: (nclass, R, Cout)  b3_ref: (1, nclass)     o_ref : (1, 1, nclass)
        acc = jnp.zeros((R, Cout), jnp.float32)
        for kh in range(3):                       # 9 row-shifted matmuls (static offsets)
            for kw in range(3):
                off = kh * Wp + kw
                xs = x_ref[0, pl.ds(off, R), :]   # (R, Cp)
                acc = acc + jnp.dot(xs, wf_ref[kh * 3 + kw],
                                    preferred_element_type=jnp.float32)
        y = acc + bf_ref[...]                     # fused conv3x3+conv1x1 output

        # Final Linear as a VPU/XLU reduction (a (1,*)x(*,2) MXU matmul is pathological).
        lane = lax.broadcasted_iota(jnp.int32, (1, nclass), 1)
        logits = jnp.zeros((1, nclass), jnp.float32)
        for n in range(nclass):
            s = jnp.sum(y * w3_ref[n], axis=1, keepdims=True)   # (R, 1)
            s = jnp.sum(s, axis=0, keepdims=True)               # (1, 1)
            logits = jnp.where(lane == n, s, logits)
        o_ref[...] = (logits + b3_ref[...]).reshape(1, 1, nclass)

    out3 = pl.pallas_call(
        kernel,
        out_shape=jax.ShapeDtypeStruct((B, 1, nclass), jnp.float32),
        grid=(B,),
        in_specs=[
            pl.BlockSpec((1, Rows, Cp), lambda b: (b, 0, 0)),
            pl.BlockSpec((9, Cp, Cout), lambda b: (0, 0, 0)),
            pl.BlockSpec((1, Cout), lambda b: (0, 0)),
            pl.BlockSpec((nclass, R, Cout), lambda b: (0, 0, 0)),
            pl.BlockSpec((1, nclass), lambda b: (0, 0)),
        ],
        out_specs=pl.BlockSpec((1, 1, nclass), lambda b: (b, 0, 0)),
        compiler_params=pltpu.CompilerParams(
            dimension_semantics=("parallel",)),
    )(xr, wf9, bf, w3_r, b3_2)
    return out3.reshape(B, nclass)


def reference_forward(x, params):
    """Pure-JAX reference matching the PyTorch forward semantics."""
    w1, b1, w2, b2, w3, b3 = params
    y = lax.conv_general_dilated(x, w1, (1, 1), 'VALID',
                                 dimension_numbers=('NCHW', 'OIHW', 'NCHW'))
    y = y + b1[None, :, None, None]
    y = lax.conv_general_dilated(y, w2, (1, 1), 'VALID',
                                 dimension_numbers=('NCHW', 'OIHW', 'NCHW'))
    y = y + b2[None, :, None, None]
    y = y.reshape(x.shape[0], -1)
    return y @ w3.T + b3


if __name__ == "__main__":
    key = jax.random.PRNGKey(0)
    ks = jax.random.split(key, 7)

    # Shapes pinned by the module: Cin=224, Linear expects 64*222 features,
    # so (H-2)*(W-2) must equal 222 -> smallest consistent choice H=8, W=39.
    B, Cin, H, W = 2, 224, 8, 39
    num_classes = 2

    x = jax.random.normal(ks[0], (B, Cin, H, W), jnp.float32)
    w1 = jax.random.normal(ks[1], (112, Cin, 3, 3), jnp.float32) * 0.02
    b1 = jax.random.normal(ks[2], (112,), jnp.float32) * 0.02
    w2 = jax.random.normal(ks[3], (64, 112, 1, 1), jnp.float32) * 0.05
    b2 = jax.random.normal(ks[4], (64,), jnp.float32) * 0.05
    w3 = jax.random.normal(ks[5], (num_classes, 64 * 222), jnp.float32) * 0.01
    b3 = jax.random.normal(ks[6], (num_classes,), jnp.float32) * 0.01
    params = (w1, b1, w2, b2, w3, b3)

    fwd = jax.jit(custom_model_forward)
    out = jax.block_until_ready(fwd(x, params))
    ref = reference_forward(x, params)

    assert out.shape == (B, num_classes), out.shape
    assert jnp.allclose(out, ref, atol=2e-2, rtol=2e-2), (out, ref)
    print("KERNEL_OK")
</pallas_src>

<mosaic_0001>
module attributes {stable_mosaic.version = 11 : i64} {
  func.func @kernel(%arg0: i32, %arg1: memref<1x328x256xf32, #tpu.memory_space<vmem>>, %arg2: memref<9x256x64xf32, #tpu.memory_space<vmem>>, %arg3: memref<1x64xf32, #tpu.memory_space<vmem>>, %arg4: memref<2x240x64xf32, #tpu.memory_space<vmem>>, %arg5: memref<1x2xf32, #tpu.memory_space<vmem>>, %arg6: memref<1x1x2xf32, #tpu.memory_space<vmem>>) attributes {dimension_semantics = [#tpu.dimension_semantics<parallel>], iteration_bounds = array<i64: 2>, scalar_prefetch = 0 : i64, scratch_operands = 0 : i64, tpu.core_type = #tpu.core_type<tc>, window_params = [{transform_indices = @transform_0, window_bounds = array<i64: 1, 328, 256>}, {pipeline_mode = #tpu.pipeline_mode<synchronous>, transform_indices = @transform_1, window_bounds = array<i64: 9, 256, 64>}, {pipeline_mode = #tpu.pipeline_mode<synchronous>, transform_indices = @transform_2, window_bounds = array<i64: 1, 64>}, {pipeline_mode = #tpu.pipeline_mode<synchronous>, transform_indices = @transform_3, window_bounds = array<i64: 2, 240, 64>}, {pipeline_mode = #tpu.pipeline_mode<synchronous>, transform_indices = @transform_4, window_bounds = array<i64: 1, 2>}, {transform_indices = @transform_5, window_bounds = array<i64: 1, 1, 2>}]} {
    %cst = arith.constant 0.000000e+00 : f32
    %0 = vector.broadcast %cst : f32 to vector<240x64xf32>
    %c0 = arith.constant 0 : index
    %c0_0 = arith.constant 0 : index
    %c0_1 = arith.constant 0 : index
    %1 = vector.load %arg1[%c0, %c0_0, %c0_1] : memref<1x328x256xf32, #tpu.memory_space<vmem>>, vector<1x240x256xf32>
    %2 = vector.shape_cast %1 : vector<1x240x256xf32> to vector<240x256xf32>
    %c0_2 = arith.constant 0 : index
    %c0_3 = arith.constant 0 : index
    %c0_4 = arith.constant 0 : index
    %3 = vector.load %arg2[%c0_2, %c0_3, %c0_4] : memref<9x256x64xf32, #tpu.memory_space<vmem>>, vector<1x256x64xf32>
    %4 = vector.shape_cast %3 : vector<1x256x64xf32> to vector<256x64xf32>
    %cst_5 = arith.constant dense<0.000000e+00> : vector<240x64xf32>
    %5 = tpu.matmul %2, %4, %cst_5 {dimension_numbers = #tpu.dot_dimension_numbers<[1], [0], [0], [1], [0, 0, 1, 1], [], []>} : vector<240x256xf32>, vector<256x64xf32>, vector<240x64xf32> -> vector<240x64xf32>
    %6 = arith.addf %0, %5 : vector<240x64xf32>
    %c0_6 = arith.constant 0 : index
    %c1 = arith.constant 1 : index
    %c0_7 = arith.constant 0 : index
    %7 = vector.load %arg1[%c0_6, %c1, %c0_7] : memref<1x328x256xf32, #tpu.memory_space<vmem>>, vector<1x240x256xf32>
    %8 = vector.shape_cast %7 : vector<1x240x256xf32> to vector<240x256xf32>
    %c1_8 = arith.constant 1 : index
    %c0_9 = arith.constant 0 : index
    %c0_10 = arith.constant 0 : index
    %9 = vector.load %arg2[%c1_8, %c0_9, %c0_10] : memref<9x256x64xf32, #tpu.memory_space<vmem>>, vector<1x256x64xf32>
    %10 = vector.shape_cast %9 : vector<1x256x64xf32> to vector<256x64xf32>
    %cst_11 = arith.constant dense<0.000000e+00> : vector<240x64xf32>
    %11 = tpu.matmul %8, %10, %cst_11 {dimension_numbers = #tpu.dot_dimension_numbers<[1], [0], [0], [1], [0, 0, 1, 1], [], []>} : vector<240x256xf32>, vector<256x64xf32>, vector<240x64xf32> -> vector<240x64xf32>
    %12 = arith.addf %6, %11 : vector<240x64xf32>
    %c0_12 = arith.constant 0 : index
    %c2 = arith.constant 2 : index
    %c0_13 = arith.constant 0 : index
    %13 = vector.load %arg1[%c0_12, %c2, %c0_13] : memref<1x328x256xf32, #tpu.memory_space<vmem>>, vector<1x240x256xf32>
    %14 = vector.shape_cast %13 : vector<1x240x256xf32> to vector<240x256xf32>
    %c2_14 = arith.constant 2 : index
    %c0_15 = arith.constant 0 : index
    %c0_16 = arith.constant 0 : index
    %15 = vector.load %arg2[%c2_14, %c0_15, %c0_16] : memref<9x256x64xf32, #tpu.memory_space<vmem>>, vector<1x256x64xf32>
    %16 = vector.shape_cast %15 : vector<1x256x64xf32> to vector<256x64xf32>
    %cst_17 = arith.constant dense<0.000000e+00> : vector<240x64xf32>
    %17 = tpu.matmul %14, %16, %cst_17 {dimension_numbers = #tpu.dot_dimension_numbers<[1], [0], [0], [1], [0, 0, 1, 1], [], []>} : vector<240x256xf32>, vector<256x64xf32>, vector<240x64xf32> -> vector<240x64xf32>
    %18 = arith.addf %12, %17 : vector<240x64xf32>
    %c0_18 = arith.constant 0 : index
    %c40 = arith.constant 40 : index
    %c0_19 = arith.constant 0 : index
    %19 = vector.load %arg1[%c0_18, %c40, %c0_19] : memref<1x328x256xf32, #tpu.memory_space<vmem>>, vector<1x240x256xf32>
    %20 = vector.shape_cast %19 : vector<1x240x256xf32> to vector<240x256xf32>
    %c3 = arith.constant 3 : index
    %c0_20 = arith.constant 0 : index
    %c0_21 = arith.constant 0 : index
    %21 = vector.load %arg2[%c3, %c0_20, %c0_21] : memref<9x256x64xf32, #tpu.memory_space<vmem>>, vector<1x256x64xf32>
    %22 = vector.shape_cast %21 : vector<1x256x64xf32> to vector<256x64xf32>
    %cst_22 = arith.constant dense<0.000000e+00> : vector<240x64xf32>
    %23 = tpu.matmul %20, %22, %cst_22 {dimension_numbers = #tpu.dot_dimension_numbers<[1], [0], [0], [1], [0, 0, 1, 1], [], []>} : vector<240x256xf32>, vector<256x64xf32>, vector<240x64xf32> -> vector<240x64xf32>
    %24 = arith.addf %18, %23 : vector<240x64xf32>
    %c0_23 = arith.constant 0 : index
    %c41 = arith.constant 41 : index
    %c0_24 = arith.constant 0 : index
    %25 = vector.load %arg1[%c0_23, %c41, %c0_24] : memref<1x328x256xf32, #tpu.memory_space<vmem>>, vector<1x240x256xf32>
    %26 = vector.shape_cast %25 : vector<1x240x256xf32> to vector<240x256xf32>
    %c4 = arith.constant 4 : index
    %c0_25 = arith.constant 0 : index
    %c0_26 = arith.constant 0 : index
    %27 = vector.load %arg2[%c4, %c0_25, %c0_26] : memref<9x256x64xf32, #tpu.memory_space<vmem>>, vector<1x256x64xf32>
    %28 = vector.shape_cast %27 : vector<1x256x64xf32> to vector<256x64xf32>
    %cst_27 = arith.constant dense<0.000000e+00> : vector<240x64xf32>
    %29 = tpu.matmul %26, %28, %cst_27 {dimension_numbers = #tpu.dot_dimension_numbers<[1], [0], [0], [1], [0, 0, 1, 1], [], []>} : vector<240x256xf32>, vector<256x64xf32>, vector<240x64xf32> -> vector<240x64xf32>
    %30 = arith.addf %24, %29 : vector<240x64xf32>
    %c0_28 = arith.constant 0 : index
    %c42 = arith.constant 42 : index
    %c0_29 = arith.constant 0 : index
    %31 = vector.load %arg1[%c0_28, %c42, %c0_29] : memref<1x328x256xf32, #tpu.memory_space<vmem>>, vector<1x240x256xf32>
    %32 = vector.shape_cast %31 : vector<1x240x256xf32> to vector<240x256xf32>
    %c5 = arith.constant 5 : index
    %c0_30 = arith.constant 0 : index
    %c0_31 = arith.constant 0 : index
    %33 = vector.load %arg2[%c5, %c0_30, %c0_31] : memref<9x256x64xf32, #tpu.memory_space<vmem>>, vector<1x256x64xf32>
    %34 = vector.shape_cast %33 : vector<1x256x64xf32> to vector<256x64xf32>
    %cst_32 = arith.constant dense<0.000000e+00> : vector<240x64xf32>
    %35 = tpu.matmul %32, %34, %cst_32 {dimension_numbers = #tpu.dot_dimension_numbers<[1], [0], [0], [1], [0, 0, 1, 1], [], []>} : vector<240x256xf32>, vector<256x64xf32>, vector<240x64xf32> -> vector<240x64xf32>
    %36 = arith.addf %30, %35 : vector<240x64xf32>
    %c0_33 = arith.constant 0 : index
    %c80 = arith.constant 80 : index
    %c0_34 = arith.constant 0 : index
    %37 = vector.load %arg1[%c0_33, %c80, %c0_34] : memref<1x328x256xf32, #tpu.memory_space<vmem>>, vector<1x240x256xf32>
    %38 = vector.shape_cast %37 : vector<1x240x256xf32> to vector<240x256xf32>
    %c6 = arith.constant 6 : index
    %c0_35 = arith.constant 0 : index
    %c0_36 = arith.constant 0 : index
    %39 = vector.load %arg2[%c6, %c0_35, %c0_36] : memref<9x256x64xf32, #tpu.memory_space<vmem>>, vector<1x256x64xf32>
    %40 = vector.shape_cast %39 : vector<1x256x64xf32> to vector<256x64xf32>
    %cst_37 = arith.constant dense<0.000000e+00> : vector<240x64xf32>
    %41 = tpu.matmul %38, %40, %cst_37 {dimension_numbers = #tpu.dot_dimension_numbers<[1], [0], [0], [1], [0, 0, 1, 1], [], []>} : vector<240x256xf32>, vector<256x64xf32>, vector<240x64xf32> -> vector<240x64xf32>
    %42 = arith.addf %36, %41 : vector<240x64xf32>
    %c0_38 = arith.constant 0 : index
    %c81 = arith.constant 81 : index
    %c0_39 = arith.constant 0 : index
    %43 = vector.load %arg1[%c0_38, %c81, %c0_39] : memref<1x328x256xf32, #tpu.memory_space<vmem>>, vector<1x240x256xf32>
    %44 = vector.shape_cast %43 : vector<1x240x256xf32> to vector<240x256xf32>
    %c7 = arith.constant 7 : index
    %c0_40 = arith.constant 0 : index
    %c0_41 = arith.constant 0 : index
    %45 = vector.load %arg2[%c7, %c0_40, %c0_41] : memref<9x256x64xf32, #tpu.memory_space<vmem>>, vector<1x256x64xf32>
    %46 = vector.shape_cast %45 : vector<1x256x64xf32> to vector<256x64xf32>
    %cst_42 = arith.constant dense<0.000000e+00> : vector<240x64xf32>
    %47 = tpu.matmul %44, %46, %cst_42 {dimension_numbers = #tpu.dot_dimension_numbers<[1], [0], [0], [1], [0, 0, 1, 1], [], []>} : vector<240x256xf32>, vector<256x64xf32>, vector<240x64xf32> -> vector<240x64xf32>
    %48 = arith.addf %42, %47 : vector<240x64xf32>
    %c0_43 = arith.constant 0 : index
    %c82 = arith.constant 82 : index
    %c0_44 = arith.constant 0 : index
    %49 = vector.load %arg1[%c0_43, %c82, %c0_44] : memref<1x328x256xf32, #tpu.memory_space<vmem>>, vector<1x240x256xf32>
    %50 = vector.shape_cast %49 : vector<1x240x256xf32> to vector<240x256xf32>
    %c8 = arith.constant 8 : index
    %c0_45 = arith.constant 0 : index
    %c0_46 = arith.constant 0 : index
    %51 = vector.load %arg2[%c8, %c0_45, %c0_46] : memref<9x256x64xf32, #tpu.memory_space<vmem>>, vector<1x256x64xf32>
    %52 = vector.shape_cast %51 : vector<1x256x64xf32> to vector<256x64xf32>
    %cst_47 = arith.constant dense<0.000000e+00> : vector<240x64xf32>
    %53 = tpu.matmul %50, %52, %cst_47 {dimension_numbers = #tpu.dot_dimension_numbers<[1], [0], [0], [1], [0, 0, 1, 1], [], []>} : vector<240x256xf32>, vector<256x64xf32>, vector<240x64xf32> -> vector<240x64xf32>
    %54 = arith.addf %48, %53 : vector<240x64xf32>
    %c0_48 = arith.constant 0 : index
    %c0_49 = arith.constant 0 : index
    %55 = vector.load %arg3[%c0_48, %c0_49] : memref<1x64xf32, #tpu.memory_space<vmem>>, vector<1x64xf32>
    %56 = vector.broadcast %55 : vector<1x64xf32> to vector<240x64xf32>
    %57 = arith.addf %54, %56 : vector<240x64xf32>
    %58 = tpu.iota {dimensions = array<i32: 1>} : vector<1x2xi32>
    %cst_50 = arith.constant 0.000000e+00 : f32
    %59 = vector.broadcast %cst_50 : f32 to vector<1x2xf32>
    %c0_51 = arith.constant 0 : index
    %c0_52 = arith.constant 0 : index
    %c0_53 = arith.constant 0 : index
    %60 = vector.load %arg4[%c0_51, %c0_52, %c0_53] : memref<2x240x64xf32, #tpu.memory_space<vmem>>, vector<1x240x64xf32>
    %61 = vector.shape_cast %60 : vector<1x240x64xf32> to vector<240x64xf32>
    %62 = arith.mulf %57, %61 : vector<240x64xf32>
    %cst_54 = arith.constant dense<0.000000e+00> : vector<240xf32>
    %63 = vector.multi_reduction <add>, %62, %cst_54 [1] : vector<240x64xf32> to vector<240xf32>
    %64 = vector.shape_cast %63 : vector<240xf32> to vector<240x1xf32>
    %cst_55 = arith.constant dense<0.000000e+00> : vector<1xf32>
    %65 = vector.multi_reduction <add>, %64, %cst_55 [0] : vector<240x1xf32> to vector<1xf32>
    %66 = vector.shape_cast %65 : vector<1xf32> to vector<1x1xf32>
    %c0_i32 = arith.constant 0 : i32
    %67 = vector.broadcast %c0_i32 : i32 to vector<1x2xi32>
    %68 = arith.cmpi eq, %58, %67 : vector<1x2xi32>
    %69 = vector.shape_cast %66 : vector<1x1xf32> to vector<1x1xf32>
    %70 = vector.broadcast %69 : vector<1x1xf32> to vector<1x2xf32>
    %71 = arith.select %68, %70, %59 : vector<1x2xi1>, vector<1x2xf32>
    %c1_56 = arith.constant 1 : index
    %c0_57 = arith.constant 0 : index
    %c0_58 = arith.constant 0 : index
    %72 = vector.load %arg4[%c1_56, %c0_57, %c0_58] : memref<2x240x64xf32, #tpu.memory_space<vmem>>, vector<1x240x64xf32>
    %73 = vector.shape_cast %72 : vector<1x240x64xf32> to vector<240x64xf32>
    %74 = arith.mulf %57, %73 : vector<240x64xf32>
    %cst_59 = arith.constant dense<0.000000e+00> : vector<240xf32>
    %75 = vector.multi_reduction <add>, %74, %cst_59 [1] : vector<240x64xf32> to vector<240xf32>
    %76 = vector.shape_cast %75 : vector<240xf32> to vector<240x1xf32>
    %cst_60 = arith.constant dense<0.000000e+00> : vector<1xf32>
    %77 = vector.multi_reduction <add>, %76, %cst_60 [0] : vector<240x1xf32> to vector<1xf32>
    %78 = vector.shape_cast %77 : vector<1xf32> to vector<1x1xf32>
    %c1_i32 = arith.constant 1 : i32
    %79 = vector.broadcast %c1_i32 : i32 to vector<1x2xi32>
    %80 = arith.cmpi eq, %58, %79 : vector<1x2xi32>
    %81 = vector.shape_cast %78 : vector<1x1xf32> to vector<1x1xf32>
    %82 = vector.broadcast %81 : vector<1x1xf32> to vector<1x2xf32>
    %83 = arith.select %80, %82, %71 : vector<1x2xi1>, vector<1x2xf32>
    %c0_61 = arith.constant 0 : index
    %c0_62 = arith.constant 0 : index
    %84 = vector.load %arg5[%c0_61, %c0_62] : memref<1x2xf32, #tpu.memory_space<vmem>>, vector<1x2xf32>
    %85 = arith.addf %83, %84 : vector<1x2xf32>
    %86 = vector.shape_cast %85 : vector<1x2xf32> to vector<1x1x2xf32>
    %c0_63 = arith.constant 0 : index
    %c0_64 = arith.constant 0 : index
    %c0_65 = arith.constant 0 : index
    %87 = vector.load %arg6[%c0_63, %c0_64, %c0_65] : memref<1x1x2xf32, #tpu.memory_space<vmem>>, vector<1x1x2xf32>
    tpu.vector_store %arg6[%c0_63, %c0_64, %c0_65], %86 {strides = array<i32>} : memref<1x1x2xf32, #tpu.memory_space<vmem>>, vector<1x1x2xf32>,
    return
  }
  func.func @transform_0(%arg0: i32) -> (i32, i32, i32) {
    %c0_i32 = arith.constant 0 : i32
    %c0_i32_0 = arith.constant 0 : i32
    %c0_i32_1 = arith.constant 0 : i32
    return %arg0, %c0_i32, %c0_i32_0 : i32, i32, i32
  }
  func.func @transform_1(%arg0: i32) -> (i32, i32, i32) {
    %c0_i32 = arith.constant 0 : i32
    %c0_i32_0 = arith.constant 0 : i32
    %c0_i32_1 = arith.constant 0 : i32
    %c0_i32_2 = arith.constant 0 : i32
    return %c0_i32, %c0_i32_0, %c0_i32_1 : i32, i32, i32
  }
  func.func @transform_2(%arg0: i32) -> (i32, i32) {
    %c0_i32 = arith.constant 0 : i32
    %c0_i32_0 = arith.constant 0 : i32
    %c0_i32_1 = arith.constant 0 : i32
    return %c0_i32, %c0_i32_0 : i32, i32
  }
  func.func @transform_3(%arg0: i32) -> (i32, i32, i32) {
    %c0_i32 = arith.constant 0 : i32
    %c0_i32_0 = arith.constant 0 : i32
    %c0_i32_1 = arith.constant 0 : i32
    %c0_i32_2 = arith.constant 0 : i32
    return %c0_i32, %c0_i32_0, %c0_i32_1 : i32, i32, i32
  }
  func.func @transform_4(%arg0: i32) -> (i32, i32) {
    %c0_i32 = arith.constant 0 : i32
    %c0_i32_0 = arith.constant 0 : i32
    %c0_i32_1 = arith.constant 0 : i32
    return %c0_i32, %c0_i32_0 : i32, i32
  }
  func.func @transform_5(%arg0: i32) -> (i32, i32, i32) {
    %c0_i32 = arith.constant 0 : i32
    %c0_i32_0 = arith.constant 0 : i32
    %c0_i32_1 = arith.constant 0 : i32
    return %arg0, %c0_i32, %c0_i32_0 : i32, i32, i32
  }
}

</mosaic_0001>

<bundles_post_ra>
// kernel: custom_model_forward.1
= control target key start
LH: loop header
LB: loop body
LE: loop exit
PB: predicated region body
PF: predicated region fallthrough
CT: control target
= control target key end

     0   :  { %10 = vsyncpa [#allocation3], 0  ;;  %s8466_s0 = inlined_call_operand.vmem [shape: f32[2,328,256], index: 0, kind: input, shape index: {}]   ;;  %s8467_s1 = inlined_call_operand.vmem [shape: f32[9,256,64], index: 1, kind: input, shape index: {}]   ;;  %s8468_s2 = inlined_call_operand.vmem [shape: f32[1,64], index: 2, kind: input, shape index: {}]   ;;  %s8469_s3 = inlined_call_operand.vmem [shape: f32[2,240,64], index: 3, kind: input, shape index: {}]   ;;  %s8470_s4 = inlined_call_operand.vmem [shape: f32[1,2], index: 4, kind: input, shape index: {}]   ;;  %s8471_s5 = inlined_call_operand.hbm [shape: f32[2,1,2], index: 5, kind: output, shape index: {}]  }
   0x1   :  { %12 = vsyncpa [#allocation3 + $0x1], 0  ;;  %s5299_s18 = smov 0   ;;  %s5301_s19 = smov 0  }
   0x2   :  { %s5303_s20 = smov 0   ;;  %s5305_s21 = smov 0  }
   0x3 LB: > { %s5320_s22 = sadd.s32 4294967295, %s5267_s21   ;;  %s4750_s23 = sadd.s32 4294967294, %s5267_s21   ;;  %s5267_s21 = sphi %s5305_s21, %s8763_s21   ;;  %s5263_s20 = sphi %s5303_s20, %s8762_s20   ;;  %s5259_s19 = sphi %s5301_s19, %s8761_s19   ;;  %s5255_s18 = sphi %s5299_s18, %s8760_s18  }
   0x4   : > { %s5324_s24 = sadd.s32 1, %s5267_s21   ;;  %s135_s25 = sadd.s32 1, %s5263_s20 }
   0x5   : > { %s132_s26 = ssub.s32 %s5267_s21, %s5324_s24  ;;  %p145_p0 = scmp.ne.s32.totalorder %s5263_s20, %s5259_s19 }
   0x6   : > { %p133_p1 = scmp.eq.s32.totalorder %s132_s26, 0  ;;  %p146_p2 = scmp.eq.s32.totalorder %s5320_s22, 1 }
   0x7   : > { %p151_p3 = scmp.ne.s32.totalorder %s5259_s19, %s5255_s18  ;;  %p152_p4 = scmp.eq.s32.totalorder %s4750_s23, 1 }
   0x8   : > { %s5335_s27 = scalar_select %p133_p1, %s5263_s20, %s135_s25  }
   0x9   : > { %p5337_p5 = por %p146_p2, %p145_p0  ;;  %p5341_p6 = por %p152_p4, %p151_p3 }
   0xa   : > { %p4753_p7 = scmp.ge.s32.totalorder %s5267_s21, 1  ;;  %p190_p8 = scmp.lt.s32.totalorder %s5267_s21, 3 }
   0xc   : > { %p191_p9 = pnand %p4753_p7, %p190_p8 }
   0xe   : > { %194 = sbr.rel (%p191_p9) target bundleno = 1405 (0x57d), region = 40 }
  0x13   : > { %v4770_v0 = vld [vmem:[%s8467_s1 + $0x178] sm:$0xff]  ;;  %v4769_v2 = vld [vmem:[%s8467_s1 + $0x170] sm:$0xff]  ;;  %v4768_v4 = vld [vmem:[%s8467_s1 + $0x168] sm:$0xff]  ;;  %p217_p10 = scmp.lt.s32.totalorder %s5320_s22, 1  ;;  %vm413_vm0 = vcmask 1046528   ;;  %vm1065_vm1 = vcmask 1045504  }
  0x14   : > { %v4786_v1 = vld [vmem:[%s8467_s1 + $0x1f8] sm:$0xff]  ;;  %5043 = vmatpush.msra.mxu2 %v4770_v0  ;;  %v4785_v3 = vld [vmem:[%s8467_s1 + $0x1f0] sm:$0xff]  ;;  %v4784_v5 = vld [vmem:[%s8467_s1 + $0x1e8] sm:$0xff]  ;;  %596 = vmatpush.msra.mxu0 %v4770_v0  ;;  %vm4362_vm2 = vcmask 523264   ;;  %s215_s12 = sand.u32 1, %s5259_s19   ;;  %vm4680_vm5 = vcmask 8192  }
  0x15   : > { %5059 = vmatpush.msra.mxu3 %v4786_v1  ;;  %703 = vmatpush.msra.mxu1 %v4786_v1  ;;  %v4767_v6 = vld [vmem:[%s8467_s1 + $0x160] sm:$0xff]  ;;  %v4766_v8 = vld [vmem:[%s8467_s1 + $0x158] sm:$0xff]  ;;  %v4765_v10 = vld [vmem:[%s8467_s1 + $0x150] sm:$0xff]  ;;  %s218_s13 = scalar_select %p217_p10, %s5320_s22, 1 }
  0x16   : > { %5044 = vmatpush.msra.mxu2 %v4769_v2  ;;  %v4783_v7 = vld [vmem:[%s8467_s1 + $0x1e0] sm:$0xff]  ;;  %597 = vmatpush.msra.mxu0 %v4769_v2  ;;  %v4782_v9 = vld [vmem:[%s8467_s1 + $0x1d8] sm:$0xff]  ;;  %v4781_v11 = vld [vmem:[%s8467_s1 + $0x1d0] sm:$0xff]  ;;  %s5225_s9 = scalar_lea.hbm %s8471_s5, 2 }
  0x17   : > { %5060 = vmatpush.msra.mxu3 %v4785_v3  ;;  %704 = vmatpush.msra.mxu1 %v4785_v3  ;;  %v4764_v12 = vld [vmem:[%s8467_s1 + $0x148] sm:$0xff]  ;;  %v4763_v14 = vld [vmem:[%s8467_s1 + $0x140] sm:$0xff]  ;;  %s5075_s6 = smul.u32 656, %s218_s13  ;;  %v4762_v16 = vld [vmem:[%s8467_s1 + $0x138] sm:$0xff]  ;;  %s4691_s13 = scalar_lea.hbm %s8471_s5, %s5320_s22 }
  0x18   : > { %5045 = vmatpush.msra.mxu2 %v4768_v4  ;;  %598 = vmatpush.msra.mxu0 %v4768_v4  ;;  %v4780_v13 = vld [vmem:[%s8467_s1 + $0x1c8] sm:$0xff]  ;;  %v4779_v15 = vld [vmem:[%s8467_s1 + $0x1c0] sm:$0xff]  ;;  %v4778_v17 = vld [vmem:[%s8467_s1 + $0x1b8] sm:$0xff]  ;;  %s4695_s26 = sshll.u32 %s4691_s13, 4  ;;  %s4683_s22 = scalar_lea.sflag [#allocation3], %s215_s12  ;;  %s4696_s26 = int_to_ptr.hbm [resolvable:$true] %s4695_s26 }
  0x19   : > { %5061 = vmatpush.msra.mxu3 %v4784_v5  ;;  %705 = vmatpush.msra.mxu1 %v4784_v5  ;;  %v4761_v18 = vld [vmem:[%s8467_s1 + $0x130] sm:$0xff]  ;;  %s5412_s17 = scalar_lea.vmem %s8466_s0, %s5075_s6  ;;  %v4760_v20 = vld [vmem:[%s8467_s1 + $0x128] sm:$0xff]  ;;  %v4759_v22 = vld [vmem:[%s8467_s1 + $0x120] sm:$0xff]  ;;  %s5219_s30 = sshra.s32 %s4696_s26, 4  ;;  %s5220_s30 = int_to_ptr.hbm [resolvable:$true] %s5219_s30 }
  0x1a   : > { %5046 = vmatpush.msra.mxu2 %v4767_v6  ;;  %599 = vmatpush.msra.mxu0 %v4767_v6  ;;  %v4777_v19 = vld [vmem:[%s8467_s1 + $0x1b0] sm:$0xff]  ;;  %v4776_v21 = vld [vmem:[%s8467_s1 + $0x1a8] sm:$0xff]  ;;  %v4775_v23 = vld [vmem:[%s8467_s1 + $0x1a0] sm:$0xff]  ;;  %s5221_s7 = scalar_lea.hbm %s5220_s30, 1  ;;  %p5226_p0 = scmp.lt.s32.totalorder %s5220_s30, %s8471_s5 }
  0x1b   : > { %5062 = vmatpush.msra.mxu3 %v4783_v7  ;;  %706 = vmatpush.msra.mxu1 %v4783_v7  ;;  %v5427_v24 = vld [vmem:[%s5412_s17 + $0xf0] sm:$0xff]  ;;  %v5430_v25 = vld [vmem:[%s5412_s17 + $0x100] sm:$0xff]  ;;  %v5433_v26 = vld [vmem:[%s5412_s17 + $0xf8] sm:$0xff]  ;;  %p5222_p11 = scmp.ne.s32.totalorder %s5220_s30, %s5221_s7  ;;  %p5227_p1 = scmp.lt.s32.totalorder %s5225_s9, %s5221_s7 }
  0x1c   : > { %5047 = vmatpush.msra.mxu2 %v4766_v8  ;;  %600 = vmatpush.msra.mxu0 %v4766_v8  ;;  %v4758_v27 = vld [vmem:[%s8467_s1 + $0x118] sm:$0xff]  ;;  %v5442_v29 = vld [vmem:[%s5412_s17 + $0x108] sm:$0xff]  ;;  %v4757_v30 = vld [vmem:[%s8467_s1 + $0x110] sm:$0xff]  ;;  %v472_v32 = vrot.slane %v5427_v24, 1  ;;  %v476_v33 = vrot.slane %v5430_v25, 1  ;;  %v474_v34 = vrot.slane %v5433_v26, 1 }
  0x1d   : > { %5063 = vmatpush.msra.mxu3 %v4782_v9  ;;  %707 = vmatpush.msra.mxu1 %v4782_v9  ;;  %v4774_v28 = vld [vmem:[%s8467_s1 + $0x198] sm:$0xff]  ;;  %v4773_v31 = vld [vmem:[%s8467_s1 + $0x190] sm:$0xff]  ;;  %v478_v36 = vrot.slane %v5442_v29, 1  ;;  %v314_v37 = vld [vmem:[%s5412_s17] sm:$0xfe]  ;;  %p5223_p12 = pnand %p5222_p11, %p5337_p5  ;;  %p5228_p2 = por %p5227_p1, %p5226_p0 }
  0x1e   : > { %5048 = vmatpush.msra.mxu2 %v4765_v10  ;;  %601 = vmatpush.msra.mxu0 %v4765_v10  ;;  %v5454_v35 = vld [vmem:[%s5412_s17 + $0x10] sm:$0xff]  ;;  %v5459_v38 = vld [vmem:[%s5412_s17 + $0x18] sm:$0xff]  ;;  %v315_v39 = vld [vmem:[%s5412_s17 + $0x8] sm:$0xfe]  ;;  %v414_v44 = vrot.slane %v314_v37, 1  ;;  %v477_v48 = vsel %vm413_vm0, %v472_v32, %v476_v33 }
  0x1f   : > { %5064 = vmatpush.msra.mxu3 %v4781_v11  ;;  %708 = vmatpush.msra.mxu1 %v4781_v11  ;;  %v4756_v40 = vld [vmem:[%s8467_s1 + $0x108] sm:$0xff]  ;;  %v4755_v42 = vld [vmem:[%s8467_s1 + $0x100] sm:$0xff]  ;;  %v415_v45 = vrot.slane %v5454_v35, 1  ;;  %v417_v46 = vrot.slane %v315_v39, 1  ;;  %v418_v47 = vrot.slane %v5459_v38, 1  ;;  %v479_v49 = vsel %vm413_vm0, %v474_v34, %v478_v36  ;;  %v297_v50 = vld [vmem:[%s8467_s1 + $0x78] sm:$0xff]  ;;  %p5224_p13 = pneg %p5223_p12 }
  0x20   : > { %5049 = vmatpush.msra.mxu2 %v4764_v12  ;;  %602 = vmatpush.msra.mxu0 %v4764_v12  ;;  %v4772_v41 = vld [vmem:[%s8467_s1 + $0x188] sm:$0xff]  ;;  %v4771_v43 = vld [vmem:[%s8467_s1 + $0x180] sm:$0xff]  ;;  %v313_v51 = vld [vmem:[%s8467_s1 + $0xf8] sm:$0xff] }
  0x21   : > { %5065 = vmatpush.msra.mxu3 %v4780_v13  ;;  %709 = vmatpush.msra.mxu1 %v4780_v13  ;;  %v5491_v52 = vld [vmem:[%s5412_s17 + $0x110] sm:$0xff]  ;;  %v5494_v53 = vld [vmem:[%s5412_s17 + $0x118] sm:$0xff]  ;;  %v416_v54 = vsel %vm413_vm0, %v414_v44, %v415_v45  ;;  %v419_v55 = vsel %vm413_vm0, %v417_v46, %v418_v47  ;;  %v5507_v60 = vld [vmem:[%s5412_s17 + $0x20] sm:$0xff]  ;;  %p5229_p3 = pnand %p5228_p2, %p5224_p13 }
  0x22   : > { %5050 = vmatpush.msra.mxu2 %v4763_v14  ;;  %603 = vmatpush.msra.mxu0 %v4763_v14  ;;  %v296_v56 = vld [vmem:[%s8467_s1 + $0x70] sm:$0xff]  ;;  %v480_v57 = vrot.slane %v5491_v52, 1  ;;  %v482_v58 = vrot.slane %v5494_v53, 1  ;;  %v5510_v61 = vld [vmem:[%s5412_s17 + $0x28] sm:$0xff]  ;;  %v4802_v62 = vld [vmem:[%s8467_s1 + $0x278] sm:$0xff]  ;;  %v420_v2 = vrot.slane %v5507_v60, 1 }
  0x23   : > { %5066 = vmatpush.msra.mxu3 %v4779_v15  ;;  %710 = vmatpush.msra.mxu1 %v4779_v15  ;;  %v312_v59 = vld [vmem:[%s8467_s1 + $0xf0] sm:$0xff]  ;;  %v4818_v63 = vld [vmem:[%s8467_s1 + $0x2f8] sm:$0xff]  ;;  %v295_v0 = vld [vmem:[%s8467_s1 + $0x68] sm:$0xff]  ;;  %v422_v3 = vrot.slane %v5510_v61, 1 }
  0x24   : > { %5051 = vmatpush.msra.mxu2 %v4762_v16  ;;  %604 = vmatpush.msra.mxu0 %v4762_v16  ;;  %v311_v1 = vld [vmem:[%s8467_s1 + $0xe8] sm:$0xff]  ;;  %v4801_v4 = vld [vmem:[%s8467_s1 + $0x270] sm:$0xff]  ;;  %v481_v6 = vsel %vm413_vm0, %v476_v33, %v480_v57  ;;  %v483_v7 = vsel %vm413_vm0, %v478_v36, %v482_v58  ;;  %v5537_v8 = vld [vmem:[%s5412_s17 + $0x120] sm:$0xff]  ;;  %v421_v14 = vsel %vm413_vm0, %v415_v45, %v420_v2 }
  0x25   : > { %5067 = vmatpush.msra.mxu3 %v4778_v17  ;;  %711 = vmatpush.msra.mxu1 %v4778_v17  ;;  %v4817_v5 = vld [vmem:[%s8467_s1 + $0x2f0] sm:$0xff]  ;;  %v5540_v9 = vld [vmem:[%s5412_s17 + $0x128] sm:$0xff]  ;;  %v294_v10 = vld [vmem:[%s8467_s1 + $0x60] sm:$0xff]  ;;  %v423_v15 = vsel %vm413_vm0, %v418_v47, %v422_v3  ;;  %v484_v17 = vrot.slane %v5537_v8, 1 }
  0x26   : > { %5052 = vmatpush.msra.mxu2 %v4761_v18  ;;  %605 = vmatpush.msra.mxu0 %v4761_v18  ;;  %v310_v11 = vld [vmem:[%s8467_s1 + $0xe0] sm:$0xff]  ;;  %v4800_v12 = vld [vmem:[%s8467_s1 + $0x268] sm:$0xff]  ;;  %v5557_v16 = vld [vmem:[%s5412_s17 + $0x30] sm:$0xff]  ;;  %v486_v18 = vrot.slane %v5540_v9, 1 }
  0x27   : > { %5068 = vmatpush.msra.mxu3 %v4777_v19  ;;  %712 = vmatpush.msra.mxu1 %v4777_v19  ;;  %v4816_v13 = vld [vmem:[%s8467_s1 + $0x2e8] sm:$0xff]  ;;  %v5562_v19 = vld [vmem:[%s5412_s17 + $0x38] sm:$0xff]  ;;  %v292_v25 = vld [vmem:[%s8467_s1 + $0x50] sm:$0xff]  ;;  %v485_v33 = vsel %vm413_vm0, %v480_v57, %v484_v17 }
  0x28   : > { %5053 = vmatpush.msra.mxu2 %v4760_v20  ;;  %606 = vmatpush.msra.mxu0 %v4760_v20  ;;  %v293_v20 = vld [vmem:[%s8467_s1 + $0x58] sm:$0xff]  ;;  %v426_v29 = vrot.slane %v5562_v19, 1  ;;  %v487_v36 = vsel %vm413_vm0, %v482_v58, %v486_v18  ;;  %v260_v37 = vld [vmem:[%s5412_s17 + $0x130] sm:$0xff]  ;;  %v5609_v46 = vld [vmem:[%s5412_s17 + $0x40] sm:$0xff] }
  0x29   : > { %5069 = vmatpush.msra.mxu3 %v4776_v21  ;;  %713 = vmatpush.msra.mxu1 %v4776_v21  ;;  %v309_v21 = vld [vmem:[%s8467_s1 + $0xd8] sm:$0xff]  ;;  %v488_v47 = vrot.slane %v260_v37, 1  ;;  %v4796_v52 = vld [vmem:[%s8467_s1 + $0x248] sm:$0xff]  ;;  %v262_v58 = vld [vmem:[%s5412_s17 + $0x140] sm:$0xff] }
  0x2a   : > { %5054 = vmatpush.msra.mxu2 %v4759_v22  ;;  %607 = vmatpush.msra.mxu0 %v4759_v22  ;;  %v4799_v22 = vld [vmem:[%s8467_s1 + $0x260] sm:$0xff]  ;;  %v261_v39 = vld [vmem:[%s5412_s17 + $0x138] sm:$0xff]  ;;  %v427_v45 = vsel %vm413_vm0, %v422_v3, %v426_v29  ;;  %v4812_v53 = vld [vmem:[%s8467_s1 + $0x2c8] sm:$0xff]  ;;  %v492_v3 = vrot.slane %v262_v58, 1 }
  0x2b   : > { %5070 = vmatpush.msra.mxu3 %v4775_v23  ;;  %714 = vmatpush.msra.mxu1 %v4775_v23  ;;  %v4815_v23 = vld [vmem:[%s8467_s1 + $0x2e0] sm:$0xff]  ;;  %v4832_v24 = vld [vmem:[%s8467_s1 + $0x368] sm:$0xff] }
  0x2c   : > { %5055 = vmatpush.msra.mxu2 %v4758_v27  ;;  %608 = vmatpush.msra.mxu0 %v4758_v27  ;;  %v308_v27 = vld [vmem:[%s8467_s1 + $0xd0] sm:$0xff]  ;;  %v286_v58 = vld [vmem:[%s8467_s1 + $0x20] sm:$0xff]  ;;  %v4848_v26 = vld [vmem:[%s8467_s1 + $0x3e8] sm:$0xff] }
  0x2d   : > { %5071 = vmatpush.msra.mxu3 %v4774_v28  ;;  %715 = vmatpush.msra.mxu1 %v4774_v28  ;;  %v424_v28 = vrot.slane %v5557_v16, 1 }
  0x2e   : > { %5056 = vmatpush.msra.mxu2 %v4757_v30  ;;  %609 = vmatpush.msra.mxu0 %v4757_v30  ;;  %v4798_v30 = vld [vmem:[%s8467_s1 + $0x258] sm:$0xff] }
  0x2f   : > { %5072 = vmatpush.msra.mxu3 %v4773_v31  ;;  %716 = vmatpush.msra.mxu1 %v4773_v31  ;;  %v4814_v31 = vld [vmem:[%s8467_s1 + $0x2d8] sm:$0xff]  ;;  %v425_v44 = vsel %vm413_vm0, %v420_v2, %v424_v28  ;;  %v4795_v2 = vld [vmem:[%s8467_s1 + $0x240] sm:$0xff] }
  0x30   : > { %5057 = vmatpush.msra.mxu2 %v4756_v40  ;;  %610 = vmatpush.msra.mxu0 %v4756_v40  ;;  %v291_v40 = vld [vmem:[%s8467_s1 + $0x48] sm:$0xff] }
  0x31   : > { %5073 = vmatpush.msra.mxu3 %v4772_v41  ;;  %717 = vmatpush.msra.mxu1 %v4772_v41  ;;  %v307_v41 = vld [vmem:[%s8467_s1 + $0xc8] sm:$0xff] }
  0x32   : > { %5058 = vmatpush.msra.mxu2 %v4755_v42  ;;  %611 = vmatpush.msra.mxu0 %v4755_v42  ;;  %v4797_v42 = vld [vmem:[%s8467_s1 + $0x250] sm:$0xff] }
  0x33   : > { %5074 = vmatpush.msra.mxu3 %v4771_v43  ;;  %657 = vmatmul.f32.vlgmr.msra.gmra.mxu2 %v477_v48  ;;  %v490_v48 = vrot.slane %v261_v39, 1 }
  0x34   : > { %764 = vmatmul.f32.vlgmr.msra.gmra.mxu3 %v479_v49  ;;  %810 = vmatpush.msrb.mxu2 %v297_v50  ;;  %v5612_v49 = vld [vmem:[%s5412_s17 + $0x48] sm:$0xff]  ;;  %v290_v50 = vld [vmem:[%s8467_s1 + $0x40] sm:$0xff] }
  0x35   : > { %917 = vmatpush.msrb.mxu3 %v313_v51  ;;  %718 = vmatpush.msra.mxu1 %v4771_v43  ;;  %v4813_v43 = vld [vmem:[%s8467_s1 + $0x2d0] sm:$0xff]  ;;  %v306_v51 = vld [vmem:[%s8467_s1 + $0xc0] sm:$0xff]  ;;  %v491_v57 = vsel %vm413_vm0, %v486_v18, %v490_v48 }
  0x36   : > { %612 = vmatmul.f32.vlgmr.msra.gmra.mxu0 %v416_v54  ;;  %719 = vmatmul.f32.vlgmr.msra.gmra.mxu1 %v419_v55  ;;  %v428_v54 = vrot.slane %v5609_v46, 1  ;;  %v430_v55 = vrot.slane %v5612_v49, 1  ;;  %v304_v18 = vld [vmem:[%s8467_s1 + $0xb0] sm:$0xff] }
  0x37   : > { %811 = vmatpush.msrb.mxu2 %v296_v56  ;;  %918 = vmatpush.msrb.mxu3 %v312_v59  ;;  %v489_v56 = vsel %vm413_vm0, %v484_v17, %v488_v47  ;;  %v263_v59 = vld [vmem:[%s5412_s17 + $0x148] sm:$0xff]  ;;  %v288_v17 = vld [vmem:[%s8467_s1 + $0x30] sm:$0xff] }
  0x38   : > { %1248 = vmatpush.msrb.mxu0 %v4802_v62  ;;  %1355 = vmatpush.msrb.mxu1 %v4818_v63  ;;  %v429_v62 = vsel %vm413_vm0, %v424_v28, %v428_v54  ;;  %v431_v63 = vsel %vm413_vm0, %v426_v29, %v430_v55 }
  0x39   : > { %812 = vmatpush.msrb.mxu2 %v295_v0  ;;  %919 = vmatpush.msrb.mxu3 %v311_v1  ;;  %v289_v0 = vld [vmem:[%s8467_s1 + $0x38] sm:$0xff] }
  0x3a   : > { %1249 = vmatpush.msrb.mxu0 %v4801_v4  ;;  %1356 = vmatpush.msrb.mxu1 %v4817_v5  ;;  %v305_v1 = vld [vmem:[%s8467_s1 + $0xb8] sm:$0xff]  ;;  %v494_v4 = vrot.slane %v263_v59, 1  ;;  %v5644_v5 = vld [vmem:[%s5412_s17 + $0x50] sm:$0xff]  ;;  %v302_v59 = vld [vmem:[%s8467_s1 + $0xa0] sm:$0xff] }
  0x3b   : > { %660 = vmatmul.f32.gmra.mxu2 %v481_v6  ;;  %920 = vmatpush.msrb.mxu3 %v310_v11  ;;  %v5647_v6 = vld [vmem:[%s5412_s17 + $0x58] sm:$0xff]  ;;  %v432_v8 = vrot.slane %v5644_v5, 1 }
  0x3c   : > { %767 = vmatmul.f32.gmra.mxu3 %v483_v7  ;;  %813 = vmatpush.msrb.mxu2 %v294_v10  ;;  %v4811_v7 = vld [vmem:[%s8467_s1 + $0x2c0] sm:$0xff]  ;;  %v434_v9 = vrot.slane %v5647_v6, 1  ;;  %v493_v10 = vsel %vm413_vm0, %v488_v47, %v492_v3  ;;  %v495_v11 = vsel %vm413_vm0, %v490_v48, %v494_v4  ;;  %v5699_v47 = vld [vmem:[%s5412_s17 + $0x78] sm:$0xff]  ;;  %v4809_v48 = vld [vmem:[%s8467_s1 + $0x2b0] sm:$0xff] }
  0x3d   : > { %1250 = vmatpush.msrb.mxu0 %v4800_v12  ;;  %1357 = vmatpush.msrb.mxu1 %v4816_v13  ;;  %v264_v12 = vld [vmem:[%s5412_s17 + $0x150] sm:$0xff]  ;;  %v265_v13 = vld [vmem:[%s5412_s17 + $0x158] sm:$0xff] }
  0x3e   : > { %615 = vmatmul.f32.gmra.mxu0 %v421_v14  ;;  %722 = vmatmul.f32.gmra.mxu1 %v423_v15  ;;  %v433_v14 = vsel %vm413_vm0, %v428_v54, %v432_v8  ;;  %v435_v15 = vsel %vm413_vm0, %v430_v55, %v434_v9  ;;  %v268_v54 = vld [vmem:[%s5412_s17 + $0x170] sm:$0xff]  ;;  %v269_v55 = vld [vmem:[%s5412_s17 + $0x178] sm:$0xff] }
  0x3f   : > { %814 = vmatpush.msrb.mxu2 %v293_v20  ;;  %921 = vmatpush.msrb.mxu3 %v309_v21  ;;  %v4794_v20 = vld [vmem:[%s8467_s1 + $0x238] sm:$0xff]  ;;  %v496_v21 = vrot.slane %v264_v12, 1 }
  0x40   : > { %1251 = vmatpush.msrb.mxu0 %v4799_v22  ;;  %1358 = vmatpush.msrb.mxu1 %v4815_v23  ;;  %v498_v22 = vrot.slane %v265_v13, 1  ;;  %v5670_v23 = vld [vmem:[%s5412_s17 + $0x60] sm:$0xff] }
  0x41   : > { %815 = vmatpush.msrb.mxu2 %v292_v25  ;;  %922 = vmatpush.msrb.mxu3 %v308_v27  ;;  %v5673_v25 = vld [vmem:[%s5412_s17 + $0x68] sm:$0xff]  ;;  %v4810_v27 = vld [vmem:[%s8467_s1 + $0x2b8] sm:$0xff]  ;;  %v436_v28 = vrot.slane %v5670_v23, 1 }
  0x42   : > { %1252 = vmatpush.msrb.mxu0 %v4798_v30  ;;  %1359 = vmatpush.msrb.mxu1 %v4814_v31  ;;  %v438_v29 = vrot.slane %v5673_v25, 1  ;;  %v497_v30 = vsel %vm413_vm0, %v492_v3, %v496_v21  ;;  %v499_v31 = vsel %vm413_vm0, %v494_v4, %v498_v22  ;;  %v4808_v3 = vld [vmem:[%s8467_s1 + $0x2a8] sm:$0xff] }
  0x43   : > { %663 = vmatmul.f32.gmra.mxu2 %v485_v33  ;;  %923 = vmatpush.msrb.mxu3 %v307_v41  ;;  %v266_v33 = vld [vmem:[%s5412_s17 + $0x160] sm:$0xff]  ;;  %v437_v37 = vsel %vm413_vm0, %v432_v8, %v436_v28  ;;  %v303_v41 = vld [vmem:[%s8467_s1 + $0xa8] sm:$0xff] }
  0x44   : > { %770 = vmatmul.f32.gmra.mxu3 %v487_v36  ;;  %816 = vmatpush.msrb.mxu2 %v291_v40  ;;  %v267_v36 = vld [vmem:[%s5412_s17 + $0x168] sm:$0xff]  ;;  %v439_v39 = vsel %vm413_vm0, %v434_v9, %v438_v29 }
  0x45   : > { %1253 = vmatpush.msrb.mxu0 %v4797_v42  ;;  %1360 = vmatpush.msrb.mxu1 %v4813_v43  ;;  %v287_v40 = vld [vmem:[%s8467_s1 + $0x28] sm:$0xff]  ;;  %v4793_v42 = vld [vmem:[%s8467_s1 + $0x230] sm:$0xff]  ;;  %v500_v43 = vrot.slane %v266_v33, 1 }
  0x46   : > { %618 = vmatmul.f32.gmra.mxu0 %v425_v44  ;;  %725 = vmatmul.f32.gmra.mxu1 %v427_v45  ;;  %v502_v44 = vrot.slane %v267_v36, 1  ;;  %v5696_v45 = vld [vmem:[%s5412_s17 + $0x70] sm:$0xff]  ;;  %v273_v36 = vld [vmem:[%s5412_s17 + $0x198] sm:$0xff] }
  0x47   : > { %817 = vmatpush.msrb.mxu2 %v290_v50  ;;  %924 = vmatpush.msrb.mxu3 %v306_v51  ;;  %v440_v50 = vrot.slane %v5696_v45, 1  ;;  %v442_v51 = vrot.slane %v5699_v47, 1  ;;  %v272_v33 = vld [vmem:[%s5412_s17 + $0x190] sm:$0xff] }
  0x48   : > { %1254 = vmatpush.msrb.mxu0 %v4796_v52  ;;  %1361 = vmatpush.msrb.mxu1 %v4812_v53  ;;  %v501_v52 = vsel %vm413_vm0, %v496_v21, %v500_v43  ;;  %v503_v53 = vsel %vm413_vm0, %v498_v22, %v502_v44  ;;  %v5748_v21 = vld [vmem:[%s5412_s17 + $0x90] sm:$0xff]  ;;  %v5751_v22 = vld [vmem:[%s5412_s17 + $0x98] sm:$0xff] }
  0x49   : > { %818 = vmatpush.msrb.mxu2 %v289_v0  ;;  %925 = vmatpush.msrb.mxu3 %v305_v1  ;;  %v506_v0 = vrot.slane %v269_v55, 1  ;;  %v5722_v1 = vld [vmem:[%s5412_s17 + $0x80] sm:$0xff] }
  0x4a   : > { %1255 = vmatpush.msrb.mxu0 %v4795_v2  ;;  %1362 = vmatpush.msrb.mxu1 %v4811_v7  ;;  %v5725_v2 = vld [vmem:[%s5412_s17 + $0x88] sm:$0xff]  ;;  %v444_v4 = vrot.slane %v5722_v1, 1 }
  0x4b   : > { %666 = vmatmul.f32.gmra.mxu2 %v489_v56  ;;  %926 = vmatpush.msrb.mxu3 %v304_v18  ;;  %v441_v56 = vsel %vm413_vm0, %v436_v28, %v440_v50  ;;  %v446_v7 = vrot.slane %v5725_v2, 1  ;;  %v507_v9 = vsel %vm413_vm0, %v502_v44, %v506_v0  ;;  %v448_v28 = vrot.slane %v5748_v21, 1 }
  0x4c   : > { %773 = vmatmul.f32.gmra.mxu3 %v491_v57  ;;  %819 = vmatpush.msrb.mxu2 %v288_v17  ;;  %v443_v57 = vsel %vm413_vm0, %v438_v29, %v442_v51  ;;  %v445_v12 = vsel %vm413_vm0, %v440_v50, %v444_v4  ;;  %v4791_v17 = vld [vmem:[%s8467_s1 + $0x220] sm:$0xff]  ;;  %v450_v29 = vrot.slane %v5751_v22, 1  ;;  %v514_v44 = vrot.slane %v273_v36, 1  ;;  %v5777_v50 = vld [vmem:[%s5412_s17 + $0xa8] sm:$0xff] }
  0x4d   : > { %1256 = vmatpush.msrb.mxu0 %v4794_v20  ;;  %1363 = vmatpush.msrb.mxu1 %v4810_v27  ;;  %v447_v13 = vsel %vm413_vm0, %v442_v51, %v446_v7  ;;  %v4807_v27 = vld [vmem:[%s8467_s1 + $0x2a0] sm:$0xff]  ;;  %v4806_v51 = vld [vmem:[%s8467_s1 + $0x298] sm:$0xff]  ;;  %v4804_v36 = vld [vmem:[%s8467_s1 + $0x288] sm:$0xff] }
  0x4e   : > { %621 = vmatmul.f32.gmra.mxu0 %v429_v62  ;;  %728 = vmatmul.f32.gmra.mxu1 %v431_v63  ;;  %v4792_v62 = vld [vmem:[%s8467_s1 + $0x228] sm:$0xff]  ;;  %v504_v63 = vrot.slane %v268_v54, 1 }
  0x4f   : > { %820 = vmatpush.msrb.mxu2 %v287_v40  ;;  %927 = vmatpush.msrb.mxu3 %v303_v41  ;;  %v284_v40 = vld [vmem:[%s8467_s1 + $0x10] sm:$0xff] }
  0x50   : > { %1257 = vmatpush.msrb.mxu0 %v4793_v42  ;;  %1364 = vmatpush.msrb.mxu1 %v4809_v48  ;;  %v505_v8 = vsel %vm413_vm0, %v500_v43, %v504_v63  ;;  %v300_v41 = vld [vmem:[%s8467_s1 + $0x90] sm:$0xff]  ;;  %v4790_v42 = vld [vmem:[%s8467_s1 + $0x218] sm:$0xff]  ;;  %v512_v43 = vrot.slane %v272_v33, 1  ;;  %v5774_v48 = vld [vmem:[%s5412_s17 + $0xa0] sm:$0xff] }
  0x51   : > { %821 = vmatpush.msrb.mxu2 %v286_v58  ;;  %928 = vmatpush.msrb.mxu3 %v302_v59  ;;  %v5829_v33 = vld [vmem:[%s5412_s17 + $0xc8] sm:$0xff] }
  0x52   : > { %1258 = vmatpush.msrb.mxu0 %v4792_v62  ;;  %1365 = vmatpush.msrb.mxu1 %v4808_v3  ;;  %v283_v62 = vld [vmem:[%s8467_s1 + $0x8] sm:$0xff] }
  0x53   : > { %669 = vmatmul.f32.gmra.mxu2 %v493_v10  ;;  %v270_v10 = vld [vmem:[%s5412_s17 + $0x180] sm:$0xff] }
  0x54   : > { %776 = vmatmul.f32.gmra.mxu3 %v495_v11  ;;  %v271_v11 = vld [vmem:[%s5412_s17 + $0x188] sm:$0xff]  ;;  %v508_v18 = vrot.slane %v270_v10, 1  ;;  %1259 = vmatpush.msrb.mxu0 %v4791_v17 }
  0x55   : > { %v510_v20 = vrot.slane %v271_v11, 1  ;;  %1366 = vmatpush.msrb.mxu1 %v4807_v27  ;;  %v298_v27 = vld [vmem:[%s8467_s1 + $0x80] sm:$0xff] }
  0x56   : > { %624 = vmatmul.f32.gmra.mxu0 %v433_v14  ;;  %731 = vmatmul.f32.gmra.mxu1 %v435_v15  ;;  %v285_v14 = vld [vmem:[%s8467_s1 + $0x18] sm:$0xff]  ;;  %v513_v54 = vsel %vm413_vm0, %v508_v18, %v512_v43 }
  0x57   : > { %v301_v15 = vld [vmem:[%s8467_s1 + $0x98] sm:$0xff]  ;;  %822 = vmatpush.msrb.mxu2 %v285_v14  ;;  %1260 = vmatpush.msrb.mxu0 %v4790_v42  ;;  %v515_v55 = vsel %vm413_vm0, %v510_v20, %v514_v44  ;;  %v276_v14 = vld [vmem:[%s5412_s17 + $0x1b0] sm:$0xff]  ;;  %v278_v42 = vld [vmem:[%s5412_s17 + $0x1c0] sm:$0xff] }
  0x58   : > { %929 = vmatpush.msrb.mxu3 %v301_v15  ;;  %1367 = vmatpush.msrb.mxu1 %v4806_v51  ;;  %v277_v15 = vld [vmem:[%s5412_s17 + $0x1b8] sm:$0xff] }
  0x59   : > { %823 = vmatpush.msrb.mxu2 %v284_v40 }
  0x5a   : > { %930 = vmatpush.msrb.mxu3 %v300_v41 }
  0x5b   : > { %672 = vmatmul.f32.gmra.mxu2 %v497_v30  ;;  %v509_v30 = vsel %vm413_vm0, %v504_v63, %v508_v18  ;;  %v299_v63 = vld [vmem:[%s8467_s1 + $0x88] sm:$0xff] }
  0x5c   : > { %779 = vmatmul.f32.gmra.mxu3 %v499_v31  ;;  %v511_v31 = vsel %vm413_vm0, %v506_v0, %v510_v20  ;;  %v4789_v0 = vld [vmem:[%s8467_s1 + $0x210] sm:$0xff]  ;;  %824 = vmatpush.msrb.mxu2 %v283_v62  ;;  %v282_v20 = vld [vmem:[%s8467_s1] sm:$0xff] }
  0x5d   : > { %931 = vmatpush.msrb.mxu3 %v299_v63  ;;  %1261 = vmatpush.msrb.mxu0 %v4789_v0 }
  0x5e   : > { %627 = vmatmul.f32.gmra.mxu0 %v437_v37  ;;  %734 = vmatmul.f32.gmra.mxu1 %v439_v39  ;;  %v449_v37 = vsel %vm413_vm0, %v444_v4, %v448_v28  ;;  %v451_v39 = vsel %vm413_vm0, %v446_v7, %v450_v29  ;;  %v5800_v7 = vld [vmem:[%s5412_s17 + $0xb0] sm:$0xff] }
  0x5f   : > { %v456_v10 = vrot.slane %v5800_v7, 1  ;;  %825 = vmatpush.msrb.mxu2 %v282_v20  ;;  %932 = vmatpush.msrb.mxu3 %v298_v27 }
  0x63   : > { %675 = vmatmul.f32.gmra.mxu2 %v501_v52  ;;  %v452_v52 = vrot.slane %v5774_v48, 1 }
  0x64   : > { %782 = vmatmul.f32.gmra.mxu3 %v503_v53  ;;  %v454_v53 = vrot.slane %v5777_v50, 1 }
  0x65   : > { %v453_v58 = vsel %vm413_vm0, %v448_v28, %v452_v52  ;;  %v457_v17 = vsel %vm413_vm0, %v452_v52, %v456_v10  ;;  %v4788_v28 = vld [vmem:[%s8467_s1 + $0x208] sm:$0xff]  ;;  %v4834_v52 = vld [vmem:[%s8467_s1 + $0x378] sm:$0xff] }
  0x66   : > { %630 = vmatmul.f32.gmra.mxu0 %v441_v56  ;;  %737 = vmatmul.f32.gmra.mxu1 %v443_v57  ;;  %v274_v56 = vld [vmem:[%s5412_s17 + $0x1a0] sm:$0xff]  ;;  %v275_v57 = vld [vmem:[%s5412_s17 + $0x1a8] sm:$0xff]  ;;  %v455_v59 = vsel %vm413_vm0, %v450_v29, %v454_v53  ;;  %v520_v29 = vrot.slane %v276_v14, 1 }
  0x67   : > { %v516_v3 = vrot.slane %v274_v56, 1  ;;  %v518_v4 = vrot.slane %v275_v57, 1  ;;  %1262 = vmatpush.msrb.mxu0 %v4788_v28  ;;  %v5852_v57 = vld [vmem:[%s5412_s17 + $0xd0] sm:$0xff]  ;;  %1585 = vmatpush.msra.mxu2 %v4834_v52 }
  0x68   : > { %v464_v62 = vrot.slane %v5852_v57, 1  ;;  %v4833_v28 = vld [vmem:[%s8467_s1 + $0x370] sm:$0xff] }
  0x69   : > { %v521_v40 = vsel %vm413_vm0, %v516_v3, %v520_v29  ;;  %1586 = vmatpush.msra.mxu2 %v4833_v28 }
  0x6b   : > { %678 = vmatmul.f32.gmra.mxu2 %v505_v8  ;;  %v5803_v8 = vld [vmem:[%s5412_s17 + $0xb8] sm:$0xff] }
  0x6c   : > { %785 = vmatmul.f32.gmra.mxu3 %v507_v9  ;;  %v4805_v9 = vld [vmem:[%s8467_s1 + $0x290] sm:$0xff]  ;;  %v458_v11 = vrot.slane %v5803_v8, 1  ;;  %1587 = vmatpush.msra.mxu2 %v4832_v24  ;;  %v4846_v24 = vld [vmem:[%s8467_s1 + $0x3d8] sm:$0xff] }
  0x6d   : > { %1368 = vmatpush.msrb.mxu1 %v4805_v9  ;;  %v281_v9 = vld [vmem:[%s5412_s17 + $0x1d8] sm:$0xff] }
  0x6e   : > { %633 = vmatmul.f32.gmra.mxu0 %v445_v12  ;;  %740 = vmatmul.f32.gmra.mxu1 %v447_v13  ;;  %v517_v12 = vsel %vm413_vm0, %v512_v43, %v516_v3  ;;  %v519_v13 = vsel %vm413_vm0, %v514_v44, %v518_v4  ;;  %v459_v18 = vsel %vm413_vm0, %v454_v53, %v458_v11  ;;  %v279_v43 = vld [vmem:[%s5412_s17 + $0x1c8] sm:$0xff]  ;;  %v4850_v53 = vld [vmem:[%s8467_s1 + $0x3f8] sm:$0xff] }
  0x6f   : > { %1369 = vmatpush.msrb.mxu1 %v4804_v36  ;;  %v526_v56 = vrot.slane %v279_v43, 1  ;;  %1692 = vmatpush.msra.mxu3 %v4850_v53 }
  0x73   : > { %681 = vmatmul.f32.gmra.mxu2 %v509_v30  ;;  %v522_v30 = vrot.slane %v277_v15, 1  ;;  %v530_v15 = vrot.slane %v281_v9, 1 }
  0x74   : > { %788 = vmatmul.f32.gmra.mxu3 %v511_v31  ;;  %v5826_v31 = vld [vmem:[%s5412_s17 + $0xc0] sm:$0xff] }
  0x75   : > { %v523_v41 = vsel %vm413_vm0, %v518_v4, %v522_v30  ;;  %v527_v3 = vsel %vm413_vm0, %v522_v30, %v526_v56  ;;  %v280_v4 = vld [vmem:[%s5412_s17 + $0x1d0] sm:$0xff]  ;;  %v531_v36 = vsel %vm413_vm0, %v526_v56, %v530_v15  ;;  %v1024_v56 = vld [vmem:[%s5412_s17] sm:$0xfc] }
  0x76   : > { %636 = vmatmul.f32.gmra.mxu0 %v449_v37  ;;  %743 = vmatmul.f32.gmra.mxu1 %v451_v39  ;;  %v460_v37 = vrot.slane %v5826_v31, 1  ;;  %v462_v39 = vrot.slane %v5829_v33, 1  ;;  %v528_v14 = vrot.slane %v280_v4, 1 }
  0x78   : > { %v461_v44 = vsel %vm413_vm0, %v456_v10, %v460_v37  ;;  %v463_v51 = vsel %vm413_vm0, %v458_v11, %v462_v39  ;;  %v465_v10 = vsel %vm413_vm0, %v460_v37, %v464_v62  ;;  %v316_v37 = vld [vmem:[%s5412_s17 + $0x1e0] sm:$0x1] }
  0x7b   : > { %684 = vmatmul.f32.gmra.mxu2 %v513_v54  ;;  %v4787_v54 = vld [vmem:[%s8467_s1 + $0x200] sm:$0xff] }
  0x7c   : > { %791 = vmatmul.f32.gmra.mxu3 %v515_v55  ;;  %v524_v55 = vrot.slane %v278_v42, 1  ;;  %1263 = vmatpush.msrb.mxu0 %v4787_v54  ;;  %v532_v42 = vrot.slane %v316_v37, 1  ;;  %v4847_v37 = vld [vmem:[%s8467_s1 + $0x3e0] sm:$0xff] }
  0x7e   : > { %639 = vmatmul.f32.gmra.mxu0 %v453_v58  ;;  %746 = vmatmul.f32.gmra.mxu1 %v455_v59  ;;  %v5855_v58 = vld [vmem:[%s5412_s17 + $0xd8] sm:$0xff]  ;;  %v4803_v59 = vld [vmem:[%s8467_s1 + $0x280] sm:$0xff]  ;;  %v525_v0 = vsel %vm413_vm0, %v520_v29, %v524_v55  ;;  %v4849_v29 = vld [vmem:[%s8467_s1 + $0x3f0] sm:$0xff]  ;;  %v529_v30 = vsel %vm413_vm0, %v524_v55, %v528_v14  ;;  %v533_v52 = vsel %vm413_vm0, %v528_v14, %v532_v42 }
  0x7f   : > { %1370 = vmatpush.msrb.mxu1 %v4803_v59  ;;  %v466_v63 = vrot.slane %v5855_v58, 1  ;;  %1693 = vmatpush.msra.mxu3 %v4849_v29  ;;  %v1025_v59 = vld [vmem:[%s5412_s17 + $0x8] sm:$0xfc] }
  0x81   : > { %v467_v11 = vsel %vm413_vm0, %v462_v39, %v466_v63  ;;  %v317_v39 = vld [vmem:[%s5412_s17 + $0x1e8] sm:$0x1]  ;;  %1694 = vmatpush.msra.mxu3 %v4848_v26 }
  0x82   : > { %v534_v43 = vrot.slane %v317_v39, 1 }
  0x83   : > { %687 = vmatmul.f32.gmra.mxu2 %v517_v12  ;;  %v4866_v12 = vld [vmem:[%s8467_s1 + $0x478] sm:$0xff]  ;;  %1695 = vmatpush.msra.mxu3 %v4847_v37  ;;  %v1092_v37 = vrot.slane %v5696_v45, 2 }
  0x84   : > { %794 = vmatmul.f32.gmra.mxu3 %v519_v13  ;;  %v4882_v13 = vld [vmem:[%s8467_s1 + $0x4f8] sm:$0xff]  ;;  %2168 = vmatpush.msra.mxu0 %v4866_v12  ;;  %v535_v53 = vsel %vm413_vm0, %v530_v15, %v534_v43  ;;  %v4864_v12 = vld [vmem:[%s8467_s1 + $0x468] sm:$0xff] }
  0x85   : > { %2275 = vmatpush.msra.mxu1 %v4882_v13  ;;  %v4880_v13 = vld [vmem:[%s8467_s1 + $0x4e8] sm:$0xff]  ;;  %1696 = vmatpush.msra.mxu3 %v4846_v24 }
  0x86   : > { %642 = vmatmul.f32.gmra.mxu0 %v457_v17  ;;  %749 = vmatmul.f32.gmra.mxu1 %v459_v18  ;;  %v5875_v17 = vld [vmem:[%s5412_s17 + $0xe0] sm:$0xff]  ;;  %v5878_v18 = vld [vmem:[%s5412_s17 + $0xe8] sm:$0xff] }
  0x87   : > { %v468_v20 = vrot.slane %v5875_v17, 1  ;;  %v470_v27 = vrot.slane %v5878_v18, 1  ;;  %v4844_v24 = vld [vmem:[%s8467_s1 + $0x3c8] sm:$0xff] }
  0x89   : > { %v473_v54 = vsel %vm413_vm0, %v468_v20, %v472_v32  ;;  %v475_v55 = vsel %vm413_vm0, %v470_v27, %v474_v34  ;;  %v222_v32 = vld [vmem:[%s5412_s17] sm:$0xff]  ;;  %v223_v34 = vld [vmem:[%s5412_s17 + $0x8] sm:$0xff] }
  0x8b   : > { %690 = vmatmul.f32.gmra.mxu2 %v521_v40  ;;  %v469_v40 = vsel %vm413_vm0, %v464_v62, %v468_v20  ;;  %v1066_v62 = vrot.slane %v1024_v56, 2 }
  0x8c   : > { %797 = vmatmul.f32.gmra.mxu3 %v523_v41  ;;  %v471_v41 = vsel %vm413_vm0, %v466_v63, %v470_v27  ;;  %v1067_v63 = vrot.slane %v5454_v35, 2 }
  0x8e   : > { %645 = vmatmul.f32.gmra.mxu0 %v461_v44  ;;  %752 = vmatmul.f32.gmra.mxu1 %v463_v51  ;;  %v4865_v44 = vld [vmem:[%s8467_s1 + $0x470] sm:$0xff]  ;;  %v1068_v4 = vsel %vm1065_vm1, %v1066_v62, %v1067_v63 }
  0x8f   : > { %v4881_v51 = vld [vmem:[%s8467_s1 + $0x4f0] sm:$0xff]  ;;  %2169 = vmatpush.msra.mxu0 %v4865_v44 }
  0x90   : > { %2276 = vmatpush.msra.mxu1 %v4881_v51 }
  0x91   : > { %2170 = vmatpush.msra.mxu0 %v4864_v12  ;;  %v1088_v12 = vrot.slane %v5670_v23, 2 }
  0x92   : > { %2277 = vmatpush.msra.mxu1 %v4880_v13  ;;  %v4878_v13 = vld [vmem:[%s8467_s1 + $0x4d8] sm:$0xff] }
  0x93   : > { %693 = vmatmul.f32.gmra.mxu2 %v525_v0  ;;  %v1069_v0 = vrot.slane %v1025_v59, 2 }
  0x94   : > { %800 = vmatmul.f32.gmra.mxu3 %v527_v3  ;;  %v1070_v3 = vrot.slane %v5459_v38, 2 }
  0x96   : > { %648 = vmatmul.f32.gmra.mxu0 %v465_v10  ;;  %755 = vmatmul.f32.gmra.mxu1 %v467_v11  ;;  %v1071_v9 = vsel %vm1065_vm1, %v1069_v0, %v1070_v3  ;;  %v1072_v10 = vrot.slane %v5507_v60, 2  ;;  %v1074_v11 = vrot.slane %v5510_v61, 2 }
  0x98   : > { %v1073_v20 = vsel %vm1065_vm1, %v1067_v63, %v1072_v10  ;;  %v1075_v27 = vsel %vm1065_vm1, %v1070_v3, %v1074_v11  ;;  %v1084_v3 = vrot.slane %v5644_v5, 2 }
  0x9b   : > { %696 = vmatmul.f32.gmra.mxu2 %v529_v30 }
  0x9c   : > { %803 = vmatmul.f32.gmra.mxu3 %v531_v36  ;;  %v1076_v36 = vrot.slane %v5557_v16, 2 }
  0x9e   : > { %651 = vmatmul.f32.gmra.mxu0 %v469_v40  ;;  %758 = vmatmul.f32.gmra.mxu1 %v471_v41  ;;  %v1077_v41 = vsel %vm1065_vm1, %v1072_v10, %v1076_v36 }
  0xa3   : > { %699 = vmatmul.f32.gmra.mxu2 %v533_v52  ;;  %v1080_v52 = vrot.slane %v5609_v46, 2 }
  0xa4   : > { %806 = vmatmul.f32.gmra.mxu3 %v535_v53  ;;  %v4879_v53 = vld [vmem:[%s8467_s1 + $0x4e0] sm:$0xff] }
  0xa5   : > { %2278 = vmatpush.msra.mxu1 %v4879_v53  ;;  %v1081_v56 = vsel %vm1065_vm1, %v1076_v36, %v1080_v52 }
  0xa6   : > { %654 = vmatmul.f32.gmra.mxu0 %v473_v54  ;;  %761 = vmatmul.f32.gmra.mxu1 %v475_v55 }
  0xa7   : > { %2279 = vmatpush.msra.mxu1 %v4878_v13  ;;  %v4860_v13 = vld [vmem:[%s8467_s1 + $0x448] sm:$0xff] }
  0xab   : > { %826 = vmatmul.f32.vlgmr.msrb.gmra.mxu2 %v222_v32 }
  0xac   : > { %933 = vmatmul.f32.vlgmr.msrb.gmra.mxu3 %v223_v34  ;;  %v1085_v34 = vsel %vm1065_vm1, %v1080_v52, %v1084_v3 }
  0xae   : > { %1264 = vmatmul.f32.vlgmr.msrb.gmra.mxu0 %v1068_v4  ;;  %1371 = vmatmul.f32.vlgmr.msrb.gmra.mxu1 %v1071_v9 }
  0xb3   : > { %829 = vmatmul.f32.gmra.mxu2 %v5454_v35  ;;  %v5932_v14 = vpop.f32.mrf.mxu0  ;;  %v5934_v15 = vpop.f32.mrf.mxu1  ;;  %v1078_v35 = vrot.slane %v5562_v19, 2 }
  0xb4   : > { %936 = vmatmul.f32.gmra.mxu3 %v5459_v38  ;;  %v4831_v38 = vld [vmem:[%s8467_s1 + $0x360] sm:$0xff] }
  0xb5   : > { %1588 = vmatpush.msra.mxu2 %v4831_v38  ;;  %v1079_v42 = vsel %vm1065_vm1, %v1074_v11, %v1078_v35 }
  0xb6   : > { %v658_v28 = vpop.f32.mrf.mxu2  ;;  %1267 = vmatmul.f32.gmra.mxu0 %v1073_v20  ;;  %1374 = vmatmul.f32.gmra.mxu1 %v1075_v27 }
  0xb7   : > { %v765_v29 = vpop.f32.mrf.mxu3 }
  0xb8   : > { %v5938_v30 = vadd.f32 %v765_v29, %v658_v28  ;;  %v1089_v28 = vsel %vm1065_vm1, %v1084_v3, %v1088_v12 }
  0xbb   : > { %832 = vmatmul.f32.gmra.mxu2 %v5507_v60  ;;  %v5950_v39 = vpop.f32.mrf.mxu0  ;;  %v5952_v40 = vpop.f32.mrf.mxu1  ;;  %v1082_v60 = vrot.slane %v5612_v49, 2 }
  0xbc   : > { %939 = vmatmul.f32.gmra.mxu3 %v5510_v61  ;;  %v4863_v61 = vld [vmem:[%s8467_s1 + $0x460] sm:$0xff] }
  0xbd   : > { %2171 = vmatpush.msra.mxu0 %v4863_v61  ;;  %v1083_v59 = vsel %vm1065_vm1, %v1078_v35, %v1082_v60 }
  0xbe   : > { %v661_v43 = vpop.f32.mrf.mxu2  ;;  %1270 = vmatmul.f32.gmra.mxu0 %v1077_v41  ;;  %1377 = vmatmul.f32.gmra.mxu1 %v1079_v42  ;;  %v4845_v41 = vld [vmem:[%s8467_s1 + $0x3d0] sm:$0xff] }
  0xbf   : > { %v768_v44 = vpop.f32.mrf.mxu3  ;;  %1697 = vmatpush.msra.mxu3 %v4845_v41 }
  0xc0   : > { %v5956_v51 = vadd.f32 %v768_v44, %v661_v43  ;;  %v1093_v44 = vsel %vm1065_vm1, %v1088_v12, %v1092_v37 }
  0xc1   : > { %1698 = vmatpush.msra.mxu3 %v4844_v24 }
  0xc3   : > { %835 = vmatmul.f32.gmra.mxu2 %v5557_v16  ;;  %v5968_v54 = vpop.f32.mrf.mxu0  ;;  %v5970_v55 = vpop.f32.mrf.mxu1  ;;  %v1086_v16 = vrot.slane %v5647_v6, 2 }
  0xc4   : > { %942 = vmatmul.f32.gmra.mxu3 %v5562_v19  ;;  %v4830_v19 = vld [vmem:[%s8467_s1 + $0x358] sm:$0xff] }
  0xc5   : > { %1589 = vmatpush.msra.mxu2 %v4830_v19  ;;  %v1087_v4 = vsel %vm1065_vm1, %v1082_v60, %v1086_v16  ;;  %v4828_v19 = vld [vmem:[%s8467_s1 + $0x348] sm:$0xff] }
  0xc6   : > { %v664_v62 = vpop.f32.mrf.mxu2  ;;  %1273 = vmatmul.f32.gmra.mxu0 %v1081_v56  ;;  %1380 = vmatmul.f32.gmra.mxu1 %v1083_v59  ;;  %v1096_v56 = vrot.slane %v5722_v1, 2  ;;  %v4877_v59 = vld [vmem:[%s8467_s1 + $0x4d0] sm:$0xff] }
  0xc7   : > { %v771_v63 = vpop.f32.mrf.mxu3  ;;  %2280 = vmatpush.msra.mxu1 %v4877_v59 }
  0xc8   : > { %v5974_v0 = vadd.f32 %v771_v63, %v664_v62  ;;  %v1097_v3 = vsel %vm1065_vm1, %v1092_v37, %v1096_v56 }
  0xcb   : > { %838 = vmatmul.f32.gmra.mxu2 %v5609_v46  ;;  %v5986_v26 = vpop.f32.mrf.mxu0  ;;  %v5988_v32 = vpop.f32.mrf.mxu1  ;;  %v1090_v46 = vrot.slane %v5673_v25, 2 }
  0xcc   : > { %945 = vmatmul.f32.gmra.mxu3 %v5612_v49  ;;  %v4862_v49 = vld [vmem:[%s8467_s1 + $0x458] sm:$0xff] }
  0xcd   : > { %2172 = vmatpush.msra.mxu0 %v4862_v49  ;;  %v1091_v29 = vsel %vm1065_vm1, %v1086_v16, %v1090_v46 }
  0xce   : > { %v667_v9 = vpop.f32.mrf.mxu2  ;;  %1276 = vmatmul.f32.gmra.mxu0 %v1085_v34  ;;  %1383 = vmatmul.f32.gmra.mxu1 %v1087_v4  ;;  %v1100_v4 = vrot.slane %v5748_v21, 2 }
  0xcf   : > { %v774_v10 = vpop.f32.mrf.mxu3 }
  0xd0   : > { %v5992_v11 = vadd.f32 %v774_v10, %v667_v9  ;;  %v1102_v9 = vrot.slane %v5751_v22, 2 }
  0xd3   : > { %841 = vmatmul.f32.gmra.mxu2 %v5644_v5  ;;  %v6004_v20 = vpop.f32.mrf.mxu0  ;;  %v6006_v27 = vpop.f32.mrf.mxu1  ;;  %v1094_v5 = vrot.slane %v5699_v47, 2 }
  0xd4   : > { %948 = vmatmul.f32.gmra.mxu3 %v5647_v6  ;;  %v4829_v6 = vld [vmem:[%s8467_s1 + $0x350] sm:$0xff] }
  0xd5   : > { %1590 = vmatpush.msra.mxu2 %v4829_v6  ;;  %v1095_v52 = vsel %vm1065_vm1, %v1090_v46, %v1094_v5  ;;  %v1101_v46 = vsel %vm1065_vm1, %v1096_v56, %v1100_v4  ;;  %v1110_v56 = vrot.slane %v5803_v8, 2 }
  0xd6   : > { %v670_v36 = vpop.f32.mrf.mxu2  ;;  %1279 = vmatmul.f32.gmra.mxu0 %v1089_v28  ;;  %1386 = vmatmul.f32.gmra.mxu1 %v1091_v29  ;;  %v4876_v28 = vld [vmem:[%s8467_s1 + $0x4c8] sm:$0xff] }
  0xd7   : > { %v777_v35 = vpop.f32.mrf.mxu3  ;;  %1591 = vmatpush.msra.mxu2 %v4828_v19  ;;  %2281 = vmatpush.msra.mxu1 %v4876_v28  ;;  %v4875_v19 = vld [vmem:[%s8467_s1 + $0x4c0] sm:$0xff]  ;;  %v4842_v28 = vld [vmem:[%s8467_s1 + $0x3b8] sm:$0xff] }
  0xd8   : > { %v6010_v38 = vadd.f32 %v777_v35, %v670_v36  ;;  %v1104_v36 = vrot.slane %v5774_v48, 2  ;;  %v1106_v35 = vrot.slane %v5777_v50, 2 }
  0xd9   : > { %2282 = vmatpush.msra.mxu1 %v4875_v19 }
  0xda   : > { %v1105_v6 = vsel %vm1065_vm1, %v1100_v4, %v1104_v36  ;;  %v1107_v41 = vsel %vm1065_vm1, %v1102_v9, %v1106_v35 }
  0xdb   : > { %844 = vmatmul.f32.gmra.mxu2 %v5670_v23  ;;  %v6022_v42 = vpop.f32.mrf.mxu0  ;;  %v6024_v43 = vpop.f32.mrf.mxu1  ;;  %v1098_v23 = vrot.slane %v5725_v2, 2 }
  0xdc   : > { %951 = vmatmul.f32.gmra.mxu3 %v5673_v25  ;;  %v4861_v25 = vld [vmem:[%s8467_s1 + $0x450] sm:$0xff] }
  0xdd   : > { %2173 = vmatpush.msra.mxu0 %v4861_v25  ;;  %v1099_v16 = vsel %vm1065_vm1, %v1094_v5, %v1098_v23  ;;  %v1103_v49 = vsel %vm1065_vm1, %v1098_v23, %v1102_v9 }
  0xde   : > { %v673_v60 = vpop.f32.mrf.mxu2  ;;  %1282 = vmatmul.f32.gmra.mxu0 %v1093_v44  ;;  %1389 = vmatmul.f32.gmra.mxu1 %v1095_v52  ;;  %v4827_v44 = vld [vmem:[%s8467_s1 + $0x340] sm:$0xff] }
  0xdf   : > { %v780_v61 = vpop.f32.mrf.mxu3  ;;  %2174 = vmatpush.msra.mxu0 %v4860_v13  ;;  %v4843_v52 = vld [vmem:[%s8467_s1 + $0x3c0] sm:$0xff]  ;;  %1592 = vmatpush.msra.mxu2 %v4827_v44  ;;  %v4826_v13 = vld [vmem:[%s8467_s1 + $0x338] sm:$0xff] }
  0xe0   : > { %v6028_v53 = vadd.f32 %v780_v61, %v673_v60  ;;  %1699 = vmatpush.msra.mxu3 %v4843_v52  ;;  %v1108_v61 = vrot.slane %v5800_v7, 2  ;;  %v4858_v52 = vld [vmem:[%s8467_s1 + $0x438] sm:$0xff] }
  0xe1   : > { %1593 = vmatpush.msra.mxu2 %v4826_v13 }
  0xe2   : > { %v1109_v59 = vsel %vm1065_vm1, %v1104_v36, %v1108_v61  ;;  %1700 = vmatpush.msra.mxu3 %v4842_v28  ;;  %v1118_v36 = vrot.slane %v5855_v58, 2 }
  0xe3   : > { %847 = vmatmul.f32.gmra.mxu2 %v5696_v45  ;;  %v6040_v62 = vpop.f32.mrf.mxu0  ;;  %v6042_v63 = vpop.f32.mrf.mxu1 }
  0xe4   : > { %954 = vmatmul.f32.gmra.mxu3 %v5699_v47 }
  0xe6   : > { %v676_v45 = vpop.f32.mrf.mxu2  ;;  %1285 = vmatmul.f32.gmra.mxu0 %v1097_v3  ;;  %1392 = vmatmul.f32.gmra.mxu1 %v1099_v16  ;;  %v1111_v3 = vsel %vm1065_vm1, %v1106_v35, %v1110_v56  ;;  %v4859_v16 = vld [vmem:[%s8467_s1 + $0x440] sm:$0xff] }
  0xe7   : > { %v783_v47 = vpop.f32.mrf.mxu3  ;;  %2175 = vmatpush.msra.mxu0 %v4859_v16 }
  0xe8   : > { %v6052_v34 = vadd.f32 %v783_v47, %v676_v45  ;;  %v1112_v45 = vrot.slane %v5826_v31, 2  ;;  %v1114_v47 = vrot.slane %v5829_v33, 2 }
  0xe9   : > { %2176 = vmatpush.msra.mxu0 %v4858_v52  ;;  %v5118_v52 = vld [vmem:[%s5412_s17 + $0x100] sm:$0xff] }
  0xea   : > { %v1119_v44 = vsel %vm1065_vm1, %v1114_v47, %v1118_v36 }
  0xeb   : > { %850 = vmatmul.f32.gmra.mxu2 %v5722_v1  ;;  %v6058_v10 = vpop.f32.mrf.mxu0  ;;  %v6060_v12 = vpop.f32.mrf.mxu1 }
  0xec   : > { %957 = vmatmul.f32.gmra.mxu3 %v5725_v2 }
  0xee   : > { %v679_v1 = vpop.f32.mrf.mxu2  ;;  %1288 = vmatmul.f32.gmra.mxu0 %v1101_v46  ;;  %1395 = vmatmul.f32.gmra.mxu1 %v1103_v49  ;;  %v1113_v46 = vsel %vm1065_vm1, %v1108_v61, %v1112_v45  ;;  %v1115_v49 = vsel %vm1065_vm1, %v1110_v56, %v1114_v47  ;;  %v1120_v61 = vrot.slane %v5875_v17, 2  ;;  %v1122_v56 = vrot.slane %v5878_v18, 2  ;;  %v5116_v47 = vld [vmem:[%s5412_s17 + $0xf0] sm:$0xff] }
  0xef   : > { %v786_v2 = vpop.f32.mrf.mxu3 }
  0xf0   : > { %v6070_v29 = vadd.f32 %v786_v2, %v679_v1  ;;  %v1116_v2 = vrot.slane %v5852_v57, 2  ;;  %v1123_v19 = vsel %vm1065_vm1, %v1118_v36, %v1122_v56  ;;  %v4857_v36 = vld [vmem:[%s8467_s1 + $0x430] sm:$0xff] }
  0xf1   : > { %2177 = vmatpush.msra.mxu0 %v4857_v36 }
  0xf2   : > { %v1121_v16 = vsel %vm1065_vm1, %v1116_v2, %v1120_v61 }
  0xf3   : > { %853 = vmatmul.f32.gmra.mxu2 %v5748_v21  ;;  %v6076_v37 = vpop.f32.mrf.mxu0  ;;  %v6078_v5 = vpop.f32.mrf.mxu1 }
  0xf4   : > { %960 = vmatmul.f32.gmra.mxu3 %v5751_v22 }
  0xf6   : > { %v682_v21 = vpop.f32.mrf.mxu2  ;;  %1291 = vmatmul.f32.gmra.mxu0 %v1105_v6  ;;  %1398 = vmatmul.f32.gmra.mxu1 %v1107_v41  ;;  %v1117_v41 = vsel %vm1065_vm1, %v1112_v45, %v1116_v2 }
  0xf7   : > { %v789_v22 = vpop.f32.mrf.mxu3 }
  0xf8   : > { %v6088_v60 = vadd.f32 %v789_v22, %v682_v21  ;;  %v4874_v21 = vld [vmem:[%s8467_s1 + $0x4b8] sm:$0xff] }
  0xf9   : > { %2283 = vmatpush.msra.mxu1 %v4874_v21  ;;  %v1128_v21 = vrot.slane %v5118_v52, 2 }
  0xfb   : > { %856 = vmatmul.f32.gmra.mxu2 %v5774_v48  ;;  %v6094_v23 = vpop.f32.mrf.mxu0  ;;  %v6096_v25 = vpop.f32.mrf.mxu1 }
  0xfc   : > { %963 = vmatmul.f32.gmra.mxu3 %v5777_v50 }
  0xfe   : > { %v685_v48 = vpop.f32.mrf.mxu2  ;;  %1294 = vmatmul.f32.gmra.mxu0 %v1109_v59  ;;  %1401 = vmatmul.f32.gmra.mxu1 %v1111_v3 }
  0xff   : > { %v792_v50 = vpop.f32.mrf.mxu3 }
 0x100   : > { %v6106_v24 = vadd.f32 %v792_v50, %v685_v48  ;;  %v4825_v48 = vld [vmem:[%s8467_s1 + $0x330] sm:$0xff] }
 0x101   : > { %v4841_v50 = vld [vmem:[%s8467_s1 + $0x3b0] sm:$0xff]  ;;  %1594 = vmatpush.msra.mxu2 %v4825_v48  ;;  %v4824_v48 = vld [vmem:[%s8467_s1 + $0x328] sm:$0xff] }
 0x102   : > { %1701 = vmatpush.msra.mxu3 %v4841_v50  ;;  %v4840_v50 = vld [vmem:[%s8467_s1 + $0x3a8] sm:$0xff] }
 0x103   : > { %859 = vmatmul.f32.gmra.mxu2 %v5800_v7  ;;  %v6112_v4 = vpop.f32.mrf.mxu0  ;;  %v6114_v9 = vpop.f32.mrf.mxu1 }
 0x104   : > { %966 = vmatmul.f32.gmra.mxu3 %v5803_v8  ;;  %1595 = vmatpush.msra.mxu2 %v4824_v48  ;;  %v5122_v48 = vld [vmem:[%s5412_s17 + $0x120] sm:$0xff] }
 0x105   : > { %1702 = vmatpush.msra.mxu3 %v4840_v50  ;;  %v5123_v50 = vld [vmem:[%s5412_s17 + $0x128] sm:$0xff] }
 0x106   : > { %v688_v7 = vpop.f32.mrf.mxu2  ;;  %1297 = vmatmul.f32.gmra.mxu0 %v1113_v46  ;;  %1404 = vmatmul.f32.gmra.mxu1 %v1115_v49  ;;  %v1124_v46 = vrot.slane %v5116_v47, 2  ;;  %v5117_v49 = vld [vmem:[%s5412_s17 + $0xf8] sm:$0xff] }
 0x107   : > { %v795_v8 = vpop.f32.mrf.mxu3  ;;  %v1126_v13 = vrot.slane %v5117_v49, 2 }
 0x108   : > { %v6124_v1 = vadd.f32 %v795_v8, %v688_v7  ;;  %v1125_v8 = vsel %vm1065_vm1, %v1120_v61, %v1124_v46 }
 0x109   : > { %v1127_v2 = vsel %vm1065_vm1, %v1122_v56, %v1126_v13 }
 0x10b   : > { %862 = vmatmul.f32.gmra.mxu2 %v5826_v31  ;;  %v6130_v35 = vpop.f32.mrf.mxu0  ;;  %v6132_v6 = vpop.f32.mrf.mxu1 }
 0x10c   : > { %969 = vmatmul.f32.gmra.mxu3 %v5829_v33 }
 0x10e   : > { %v691_v31 = vpop.f32.mrf.mxu2  ;;  %1300 = vmatmul.f32.gmra.mxu0 %v1117_v41  ;;  %1407 = vmatmul.f32.gmra.mxu1 %v1119_v44  ;;  %v4873_v41 = vld [vmem:[%s8467_s1 + $0x4b0] sm:$0xff] }
 0x10f   : > { %v798_v33 = vpop.f32.mrf.mxu3  ;;  %2284 = vmatpush.msra.mxu1 %v4873_v41 }
 0x110   : > { %v6142_v22 = vadd.f32 %v798_v33, %v691_v31  ;;  %v5119_v31 = vld [vmem:[%s5412_s17 + $0x108] sm:$0xff] }
 0x111   : > { %v1130_v33 = vrot.slane %v5119_v31, 2 }
 0x113   : > { %865 = vmatmul.f32.gmra.mxu2 %v5852_v57  ;;  %v6148_v59 = vpop.f32.mrf.mxu0  ;;  %v6150_v3 = vpop.f32.mrf.mxu1 }
 0x114   : > { %972 = vmatmul.f32.gmra.mxu3 %v5855_v58 }
 0x116   : > { %v694_v57 = vpop.f32.mrf.mxu2  ;;  %1303 = vmatmul.f32.gmra.mxu0 %v1121_v16  ;;  %1410 = vmatmul.f32.gmra.mxu1 %v1123_v19  ;;  %v1129_v16 = vsel %vm1065_vm1, %v1124_v46, %v1128_v21  ;;  %v1131_v19 = vsel %vm1065_vm1, %v1126_v13, %v1130_v33 }
 0x117   : > { %v801_v58 = vpop.f32.mrf.mxu3 }
 0x118   : > { %v6160_v45 = vadd.f32 %v801_v58, %v694_v57 }
 0x11b   : > { %868 = vmatmul.f32.gmra.mxu2 %v5875_v17  ;;  %v6166_v28 = vpop.f32.mrf.mxu0  ;;  %v6168_v7 = vpop.f32.mrf.mxu1 }
 0x11c   : > { %975 = vmatmul.f32.gmra.mxu3 %v5878_v18 }
 0x11e   : > { %v697_v17 = vpop.f32.mrf.mxu2  ;;  %1306 = vmatmul.f32.gmra.mxu0 %v1125_v8  ;;  %1413 = vmatmul.f32.gmra.mxu1 %v1127_v2  ;;  %v5121_v8 = vld [vmem:[%s5412_s17 + $0x118] sm:$0xff] }
 0x11f   : > { %v804_v18 = vpop.f32.mrf.mxu3  ;;  %v1134_v13 = vrot.slane %v5121_v8, 2 }
 0x120   : > { %v6178_v44 = vadd.f32 %v804_v18, %v697_v17  ;;  %v4856_v18 = vld [vmem:[%s8467_s1 + $0x428] sm:$0xff] }
 0x121   : > { %v1135_v17 = vsel %vm1065_vm1, %v1130_v33, %v1134_v13  ;;  %2178 = vmatpush.msra.mxu0 %v4856_v18  ;;  %v1136_v33 = vrot.slane %v5122_v48, 2 }
 0x123   : > { %871 = vmatmul.f32.gmra.mxu2 %v5116_v47  ;;  %v6182_v61 = vpop.f32.mrf.mxu0  ;;  %v6184_v56 = vpop.f32.mrf.mxu1 }
 0x124   : > { %978 = vmatmul.f32.gmra.mxu3 %v5117_v49  ;;  %v5120_v49 = vld [vmem:[%s5412_s17 + $0x110] sm:$0xff] }
 0x125   : > { %v1132_v46 = vrot.slane %v5120_v49, 2 }
 0x126   : > { %v700_v57 = vpop.f32.mrf.mxu2  ;;  %1309 = vmatmul.f32.gmra.mxu0 %v1129_v16  ;;  %1416 = vmatmul.f32.gmra.mxu1 %v1131_v19  ;;  %v4872_v16 = vld [vmem:[%s8467_s1 + $0x4a8] sm:$0xff] }
 0x127   : > { %v807_v58 = vpop.f32.mrf.mxu3  ;;  %v1133_v41 = vsel %vm1065_vm1, %v1128_v21, %v1132_v46  ;;  %2285 = vmatpush.msra.mxu1 %v4872_v16 }
 0x128   : > { %v6194_v47 = vadd.f32 %v807_v58, %v700_v57  ;;  %v1138_v57 = vrot.slane %v5123_v50, 2 }
 0x12b   : > { %874 = vmatmul.f32.gmra.mxu2 %v5118_v52  ;;  %v6198_v2 = vpop.f32.mrf.mxu0  ;;  %v6200_v36 = vpop.f32.mrf.mxu1  ;;  %v721_v52 = vadd.f32 %v5934_v15, %v5932_v14  ;;  %v1137_v14 = vsel %vm1065_vm1, %v1132_v46, %v1136_v33  ;;  %v1139_v15 = vsel %vm1065_vm1, %v1134_v13, %v1138_v57 }
 0x12c   : > { %981 = vmatmul.f32.gmra.mxu3 %v5119_v31  ;;  %8474 = vst [vmem:[#allocation5_spill] sm:$0xff] %v6200_v36 }
 0x12e   : > { %v827_v31 = vpop.f32.mrf.mxu2  ;;  %1312 = vmatmul.f32.gmra.mxu0 %v1133_v41  ;;  %1419 = vmatmul.f32.gmra.mxu1 %v1135_v17  ;;  %v4823_v41 = vld [vmem:[%s8467_s1 + $0x320] sm:$0xff] }
 0x12f   : > { %v934_v19 = vpop.f32.mrf.mxu3  ;;  %v828_v21 = vadd.f32 %v827_v31, %v721_v52  ;;  %v4839_v17 = vld [vmem:[%s8467_s1 + $0x3a0] sm:$0xff]  ;;  %1596 = vmatpush.msra.mxu2 %v4823_v41  ;;  %v5124_v52 = vld [vmem:[%s5412_s17 + $0x130] sm:$0xff]  ;;  %v5125_v31 = vld [vmem:[%s5412_s17 + $0x138] sm:$0xff] }
 0x130   : > { %1703 = vmatpush.msra.mxu3 %v4839_v17  ;;  %v1140_v13 = vrot.slane %v5124_v52, 2 }
 0x131   : > { %v6214_v58 = vadd.f32 %v934_v19, %v828_v21  ;;  %v1142_v19 = vrot.slane %v5125_v31, 2 }
 0x133   : > { %877 = vmatmul.f32.gmra.mxu2 %v5120_v49  ;;  %v6216_v36 = vpop.f32.mrf.mxu0  ;;  %v6218_v18 = vpop.f32.mrf.mxu1  ;;  %v724_v49 = vadd.f32 %v5952_v40, %v5950_v39  ;;  %v1141_v39 = vsel %vm1065_vm1, %v1136_v33, %v1140_v13  ;;  %v1143_v40 = vsel %vm1065_vm1, %v1138_v57, %v1142_v19 }
 0x134   : > { %984 = vmatmul.f32.gmra.mxu3 %v5121_v8  ;;  %8475 = vst [vmem:[#allocation6_spill] sm:$0xff] %v6218_v18 }
 0x136   : > { %v830_v8 = vpop.f32.mrf.mxu2  ;;  %1315 = vmatmul.f32.gmra.mxu0 %v1137_v14  ;;  %1422 = vmatmul.f32.gmra.mxu1 %v1139_v15  ;;  %v4855_v14 = vld [vmem:[%s8467_s1 + $0x420] sm:$0xff] }
 0x137   : > { %v937_v16 = vpop.f32.mrf.mxu3  ;;  %v831_v46 = vadd.f32 %v830_v8, %v724_v49  ;;  %v4871_v15 = vld [vmem:[%s8467_s1 + $0x4a0] sm:$0xff]  ;;  %2179 = vmatpush.msra.mxu0 %v4855_v14  ;;  %v5127_v8 = vld [vmem:[%s5412_s17 + $0x148] sm:$0xff] }
 0x138   : > { %2286 = vmatpush.msra.mxu1 %v4871_v15  ;;  %v5126_v49 = vld [vmem:[%s5412_s17 + $0x140] sm:$0xff]  ;;  %v730_v15 = vadd.f32 %v5988_v32, %v5986_v26  ;;  %v4870_v26 = vld [vmem:[%s8467_s1 + $0x498] sm:$0xff] }
 0x139   : > { %v6232_v21 = vadd.f32 %v937_v16, %v831_v46  ;;  %v1144_v57 = vrot.slane %v5126_v49, 2  ;;  %v1146_v16 = vrot.slane %v5127_v8, 2 }
 0x13a   : > { %2287 = vmatpush.msra.mxu1 %v4870_v26 }
 0x13b   : > { %880 = vmatmul.f32.gmra.mxu2 %v5122_v48  ;;  %v6234_v18 = vpop.f32.mrf.mxu0  ;;  %v6236_v41 = vpop.f32.mrf.mxu1  ;;  %v727_v48 = vadd.f32 %v5970_v55, %v5968_v54  ;;  %v4838_v54 = vld [vmem:[%s8467_s1 + $0x398] sm:$0xff]  ;;  %v1147_v14 = vsel %vm1065_vm1, %v1142_v19, %v1146_v16 }
 0x13c   : > { %987 = vmatmul.f32.gmra.mxu3 %v5123_v50  ;;  %8476 = vst [vmem:[#allocation7_spill] sm:$0xff] %v6236_v41  ;;  %v4822_v41 = vld [vmem:[%s8467_s1 + $0x318] sm:$0xff] }
 0x13d   : > { %1597 = vmatpush.msra.mxu2 %v4822_v41  ;;  %1704 = vmatpush.msra.mxu3 %v4838_v54 }
 0x13e   : > { %v833_v50 = vpop.f32.mrf.mxu2  ;;  %1318 = vmatmul.f32.gmra.mxu0 %v1141_v39  ;;  %1425 = vmatmul.f32.gmra.mxu1 %v1143_v40  ;;  %v1145_v40 = vsel %vm1065_vm1, %v1140_v13, %v1144_v57  ;;  %v4854_v13 = vld [vmem:[%s8467_s1 + $0x418] sm:$0xff] }
 0x13f   : > { %v940_v17 = vpop.f32.mrf.mxu3  ;;  %v834_v33 = vadd.f32 %v833_v50, %v727_v48  ;;  %2180 = vmatpush.msra.mxu0 %v4854_v13  ;;  %v5130_v13 = vld [vmem:[%s5412_s17 + $0x160] sm:$0xff] }
 0x140   : > { %v1152_v26 = vrot.slane %v5130_v13, 2 }
 0x141   : > { %v6250_v46 = vadd.f32 %v940_v17, %v834_v33  ;;  %v5128_v17 = vld [vmem:[%s5412_s17 + $0x150] sm:$0xff] }
 0x142   : > { %v1148_v33 = vrot.slane %v5128_v17, 2 }
 0x143   : > { %883 = vmatmul.f32.gmra.mxu2 %v5124_v52  ;;  %v6258_v55 = vpop.f32.mrf.mxu0  ;;  %v6260_v39 = vpop.f32.mrf.mxu1  ;;  %v5129_v52 = vld [vmem:[%s5412_s17 + $0x158] sm:$0xff] }
 0x144   : > { %990 = vmatmul.f32.gmra.mxu3 %v5125_v31  ;;  %v1150_v31 = vrot.slane %v5129_v52, 2 }
 0x146   : > { %v836_v48 = vpop.f32.mrf.mxu2  ;;  %1321 = vmatmul.f32.gmra.mxu0 %v1145_v40  ;;  %1428 = vmatmul.f32.gmra.mxu1 %v1147_v14  ;;  %v1149_v40 = vsel %vm1065_vm1, %v1144_v57, %v1148_v33  ;;  %v1151_v14 = vsel %vm1065_vm1, %v1146_v16, %v1150_v31  ;;  %v4821_v57 = vld [vmem:[%s8467_s1 + $0x310] sm:$0xff] }
 0x147   : > { %v943_v50 = vpop.f32.mrf.mxu3  ;;  %v837_v41 = vadd.f32 %v836_v48, %v730_v15  ;;  %v733_v15 = vadd.f32 %v6006_v27, %v6004_v20  ;;  %v4837_v20 = vld [vmem:[%s8467_s1 + $0x390] sm:$0xff]  ;;  %1598 = vmatpush.msra.mxu2 %v4821_v57 }
 0x148   : > { %1705 = vmatpush.msra.mxu3 %v4837_v20  ;;  %v5132_v57 = vld [vmem:[%s5412_s17 + $0x170] sm:$0xff] }
 0x149   : > { %v6268_v54 = vadd.f32 %v943_v50, %v837_v41  ;;  %v1156_v20 = vrot.slane %v5132_v57, 2 }
 0x14b   : > { %8477 = vst [vmem:[#allocation8_spill] sm:$0xff] %v6268_v54  ;;  %886 = vmatmul.f32.gmra.mxu2 %v5126_v49  ;;  %v6276_v32 = vpop.f32.mrf.mxu0  ;;  %v6278_v19 = vpop.f32.mrf.mxu1  ;;  %v5131_v49 = vld [vmem:[%s5412_s17 + $0x168] sm:$0xff] }
 0x14c   : > { %993 = vmatmul.f32.gmra.mxu3 %v5127_v8  ;;  %v1154_v8 = vrot.slane %v5131_v49, 2 }
 0x14e   : > { %v839_v48 = vpop.f32.mrf.mxu2  ;;  %1324 = vmatmul.f32.gmra.mxu0 %v1149_v40  ;;  %1431 = vmatmul.f32.gmra.mxu1 %v1151_v14  ;;  %v1153_v40 = vsel %vm1065_vm1, %v1148_v33, %v1152_v26  ;;  %v1155_v14 = vsel %vm1065_vm1, %v1150_v31, %v1154_v8  ;;  %v4853_v33 = vld [vmem:[%s8467_s1 + $0x410] sm:$0xff] }
 0x14f   : > { %v946_v50 = vpop.f32.mrf.mxu3  ;;  %v840_v41 = vadd.f32 %v839_v48, %v733_v15  ;;  %v736_v15 = vadd.f32 %v6024_v43, %v6022_v42  ;;  %v4869_v31 = vld [vmem:[%s8467_s1 + $0x490] sm:$0xff]  ;;  %2181 = vmatpush.msra.mxu0 %v4853_v33  ;;  %v5135_v33 = vld [vmem:[%s5412_s17 + $0x188] sm:$0xff] }
 0x150   : > { %2288 = vmatpush.msra.mxu1 %v4869_v31  ;;  %v1162_v31 = vrot.slane %v5135_v33, 2 }
 0x151   : > { %v6286_v54 = vadd.f32 %v946_v50, %v840_v41 }
 0x153   : > { %8478 = vst [vmem:[#allocation9_spill] sm:$0xff] %v6286_v54  ;;  %889 = vmatmul.f32.gmra.mxu2 %v5128_v17  ;;  %v6294_v27 = vpop.f32.mrf.mxu0  ;;  %v6296_v16 = vpop.f32.mrf.mxu1  ;;  %v5133_v17 = vld [vmem:[%s5412_s17 + $0x178] sm:$0xff] }
 0x154   : > { %996 = vmatmul.f32.gmra.mxu3 %v5129_v52  ;;  %v1158_v52 = vrot.slane %v5133_v17, 2 }
 0x156   : > { %v842_v48 = vpop.f32.mrf.mxu2  ;;  %1327 = vmatmul.f32.gmra.mxu0 %v1153_v40  ;;  %1434 = vmatmul.f32.gmra.mxu1 %v1155_v14  ;;  %v1157_v40 = vsel %vm1065_vm1, %v1152_v26, %v1156_v20  ;;  %v1159_v14 = vsel %vm1065_vm1, %v1154_v8, %v1158_v52 }
 0x157   : > { %v949_v50 = vpop.f32.mrf.mxu3  ;;  %v843_v41 = vadd.f32 %v842_v48, %v736_v15  ;;  %v4820_v15 = vld [vmem:[%s8467_s1 + $0x308] sm:$0xff] }
 0x158   : > { %v4836_v48 = vld [vmem:[%s8467_s1 + $0x388] sm:$0xff]  ;;  %1599 = vmatpush.msra.mxu2 %v4820_v15 }
 0x159   : > { %v6304_v54 = vadd.f32 %v949_v50, %v843_v41  ;;  %1706 = vmatpush.msra.mxu3 %v4836_v48  ;;  %v5134_v41 = vld [vmem:[%s5412_s17 + $0x180] sm:$0xff] }
 0x15a   : > { %v1160_v8 = vrot.slane %v5134_v41, 2 }
 0x15b   : > { %892 = vmatmul.f32.gmra.mxu2 %v5130_v13  ;;  %v6312_v42 = vpop.f32.mrf.mxu0  ;;  %v6314_v43 = vpop.f32.mrf.mxu1  ;;  %v739_v13 = vadd.f32 %v6042_v63, %v6040_v62  ;;  %v1163_v63 = vsel %vm1065_vm1, %v1158_v52, %v1162_v31 }
 0x15c   : > { %999 = vmatmul.f32.gmra.mxu3 %v5131_v49  ;;  %8479 = vst [vmem:[#allocation10_spill] sm:$0xff] %v6312_v42  ;;  %v1161_v62 = vsel %vm1065_vm1, %v1156_v20, %v1160_v8 }
 0x15d   : > { %8480 = vst [vmem:[#allocation11_spill] sm:$0xff] %v6314_v43 }
 0x15e   : > { %v845_v49 = vpop.f32.mrf.mxu2  ;;  %1330 = vmatmul.f32.gmra.mxu0 %v1157_v40  ;;  %1437 = vmatmul.f32.gmra.mxu1 %v1159_v14  ;;  %v4852_v40 = vld [vmem:[%s8467_s1 + $0x408] sm:$0xff] }
 0x15f   : > { %v952_v50 = vpop.f32.mrf.mxu3  ;;  %v846_v26 = vadd.f32 %v845_v49, %v739_v13  ;;  %v4868_v14 = vld [vmem:[%s8467_s1 + $0x488] sm:$0xff]  ;;  %2182 = vmatpush.msra.mxu0 %v4852_v40  ;;  %v5136_v13 = vld [vmem:[%s5412_s17 + $0x190] sm:$0xff]  ;;  %v5137_v49 = vld [vmem:[%s5412_s17 + $0x198] sm:$0xff] }
 0x160   : > { %2289 = vmatpush.msra.mxu1 %v4868_v14  ;;  %v1164_v52 = vrot.slane %v5136_v13, 2 }
 0x161   : > { %v6328_v43 = vadd.f32 %v952_v50, %v846_v26  ;;  %v1166_v50 = vrot.slane %v5137_v49, 2 }
 0x163   : > { %895 = vmatmul.f32.gmra.mxu2 %v5132_v57  ;;  %v6330_v42 = vpop.f32.mrf.mxu0  ;;  %v6332_v15 = vpop.f32.mrf.mxu1  ;;  %v742_v57 = vadd.f32 %v6060_v12, %v6058_v10  ;;  %v1165_v10 = vsel %vm1065_vm1, %v1160_v8, %v1164_v52  ;;  %v1167_v12 = vsel %vm1065_vm1, %v1162_v31, %v1166_v50 }
 0x164   : > { %1002 = vmatmul.f32.gmra.mxu3 %v5133_v17  ;;  %8481 = vst [vmem:[#allocation12_spill] sm:$0xff] %v6332_v15 }
 0x166   : > { %v848_v17 = vpop.f32.mrf.mxu2  ;;  %1333 = vmatmul.f32.gmra.mxu0 %v1161_v62  ;;  %1440 = vmatmul.f32.gmra.mxu1 %v1163_v63  ;;  %v4819_v62 = vld [vmem:[%s8467_s1 + $0x300] sm:$0xff] }
 0x167   : > { %v955_v48 = vpop.f32.mrf.mxu3  ;;  %v849_v20 = vadd.f32 %v848_v17, %v742_v57  ;;  %v4835_v63 = vld [vmem:[%s8467_s1 + $0x380] sm:$0xff]  ;;  %1600 = vmatpush.msra.mxu2 %v4819_v62  ;;  %v5139_v17 = vld [vmem:[%s5412_s17 + $0x1a8] sm:$0xff] }
 0x168   : > { %1707 = vmatpush.msra.mxu3 %v4835_v63  ;;  %v5138_v57 = vld [vmem:[%s5412_s17 + $0x1a0] sm:$0xff] }
 0x169   : > { %v6346_v26 = vadd.f32 %v955_v48, %v849_v20  ;;  %v1168_v31 = vrot.slane %v5138_v57, 2  ;;  %v1170_v48 = vrot.slane %v5139_v17, 2 }
 0x16b   : > { %898 = vmatmul.f32.gmra.mxu2 %v5134_v41  ;;  %v6348_v15 = vpop.f32.mrf.mxu0  ;;  %v6350_v40 = vpop.f32.mrf.mxu1  ;;  %v745_v41 = vadd.f32 %v6078_v5, %v6076_v37  ;;  %v1169_v37 = vsel %vm1065_vm1, %v1164_v52, %v1168_v31  ;;  %v1171_v5 = vsel %vm1065_vm1, %v1166_v50, %v1170_v48 }
 0x16c   : > { %1005 = vmatmul.f32.gmra.mxu3 %v5135_v33  ;;  %8482 = vst [vmem:[#allocation13_spill] sm:$0xff] %v6350_v40 }
 0x16e   : > { %v851_v33 = vpop.f32.mrf.mxu2  ;;  %1336 = vmatmul.f32.gmra.mxu0 %v1165_v10  ;;  %1443 = vmatmul.f32.gmra.mxu1 %v1167_v12  ;;  %v4851_v10 = vld [vmem:[%s8467_s1 + $0x400] sm:$0xff] }
 0x16f   : > { %v958_v14 = vpop.f32.mrf.mxu3  ;;  %v852_v8 = vadd.f32 %v851_v33, %v745_v41  ;;  %v4867_v12 = vld [vmem:[%s8467_s1 + $0x480] sm:$0xff]  ;;  %2183 = vmatpush.msra.mxu0 %v4851_v10  ;;  %v5140_v41 = vld [vmem:[%s5412_s17 + $0x1b0] sm:$0xff]  ;;  %v5141_v33 = vld [vmem:[%s5412_s17 + $0x1b8] sm:$0xff] }
 0x170   : > { %2290 = vmatpush.msra.mxu1 %v4867_v12  ;;  %v1172_v50 = vrot.slane %v5140_v41, 2 }
 0x171   : > { %v6364_v20 = vadd.f32 %v958_v14, %v852_v8  ;;  %v1174_v14 = vrot.slane %v5141_v33, 2 }
 0x173   : > { %901 = vmatmul.f32.gmra.mxu2 %v5136_v13  ;;  %v6366_v40 = vpop.f32.mrf.mxu0  ;;  %v6368_v62 = vpop.f32.mrf.mxu1  ;;  %v748_v13 = vadd.f32 %v6096_v25, %v6094_v23  ;;  %v1173_v23 = vsel %vm1065_vm1, %v1168_v31, %v1172_v50  ;;  %v1175_v25 = vsel %vm1065_vm1, %v1170_v48, %v1174_v14 }
 0x174   : > { %1008 = vmatmul.f32.gmra.mxu3 %v5137_v49  ;;  %8483 = vst [vmem:[#allocation14_spill] sm:$0xff] %v6368_v62 }
 0x176   : > { %v854_v49 = vpop.f32.mrf.mxu2  ;;  %1339 = vmatmul.f32.gmra.mxu0 %v1169_v37  ;;  %1446 = vmatmul.f32.gmra.mxu1 %v1171_v5  ;;  %v4898_v37 = vld [vmem:[%s8467_s1 + $0x578] sm:$0xff] }
 0x177   : > { %v961_v63 = vpop.f32.mrf.mxu3  ;;  %v855_v52 = vadd.f32 %v854_v49, %v748_v13  ;;  %v4914_v5 = vld [vmem:[%s8467_s1 + $0x5f8] sm:$0xff]  ;;  %2635 = vmatpush.msrb.mxu2 %v4898_v37  ;;  %v5142_v13 = vld [vmem:[%s5412_s17 + $0x1c0] sm:$0xff]  ;;  %v5143_v49 = vld [vmem:[%s5412_s17 + $0x1c8] sm:$0xff] }
 0x178   : > { %2742 = vmatpush.msrb.mxu3 %v4914_v5  ;;  %v1176_v48 = vrot.slane %v5142_v13, 2 }
 0x179   : > { %v6382_v8 = vadd.f32 %v961_v63, %v855_v52  ;;  %v1178_v63 = vrot.slane %v5143_v49, 2 }
 0x17b   : > { %904 = vmatmul.f32.gmra.mxu2 %v5138_v57  ;;  %v6384_v62 = vpop.f32.mrf.mxu0  ;;  %v6386_v10 = vpop.f32.mrf.mxu1  ;;  %v751_v57 = vadd.f32 %v6114_v9, %v6112_v4  ;;  %v1177_v4 = vsel %vm1065_vm1, %v1172_v50, %v1176_v48  ;;  %v1179_v9 = vsel %vm1065_vm1, %v1174_v14, %v1178_v63  ;;  %v5144_v14 = vld [vmem:[%s5412_s17 + $0x1d0] sm:$0xff] }
 0x17c   : > { %1011 = vmatmul.f32.gmra.mxu3 %v5139_v17  ;;  %8484 = vst [vmem:[#allocation15_spill] sm:$0xff] %v6386_v10 }
 0x17e   : > { %v857_v17 = vpop.f32.mrf.mxu2  ;;  %1342 = vmatmul.f32.gmra.mxu0 %v1173_v23  ;;  %1449 = vmatmul.f32.gmra.mxu1 %v1175_v25  ;;  %v4930_v23 = vld [vmem:[%s8467_s1 + $0x678] sm:$0xff] }
 0x17f   : > { %v964_v12 = vpop.f32.mrf.mxu3  ;;  %v858_v31 = vadd.f32 %v857_v17, %v751_v57  ;;  %v4946_v25 = vld [vmem:[%s8467_s1 + $0x6f8] sm:$0xff]  ;;  %2972 = vmatpush.msrb.mxu0 %v4930_v23  ;;  %v1180_v57 = vrot.slane %v5144_v14, 2 }
 0x180   : > { %3079 = vmatpush.msrb.mxu1 %v4946_v25  ;;  %v5145_v17 = vld [vmem:[%s5412_s17 + $0x1d8] sm:$0xff] }
 0x181   : > { %v6400_v52 = vadd.f32 %v964_v12, %v858_v31  ;;  %v1182_v12 = vrot.slane %v5145_v17, 2 }
 0x183   : > { %907 = vmatmul.f32.gmra.mxu2 %v5140_v41  ;;  %v6402_v10 = vpop.f32.mrf.mxu0  ;;  %v6404_v37 = vpop.f32.mrf.mxu1  ;;  %v754_v41 = vadd.f32 %v6132_v6, %v6130_v35  ;;  %v1181_v35 = vsel %vm1065_vm1, %v1176_v48, %v1180_v57  ;;  %v1183_v6 = vsel %vm1065_vm1, %v1178_v63, %v1182_v12 }
 0x184   : > { %1014 = vmatmul.f32.gmra.mxu3 %v5141_v33 }
 0x186   : > { %v860_v33 = vpop.f32.mrf.mxu2  ;;  %1345 = vmatmul.f32.gmra.mxu0 %v1177_v4  ;;  %1452 = vmatmul.f32.gmra.mxu1 %v1179_v9  ;;  %v4897_v4 = vld [vmem:[%s8467_s1 + $0x570] sm:$0xff] }
 0x187   : > { %v967_v5 = vpop.f32.mrf.mxu3  ;;  %v861_v50 = vadd.f32 %v860_v33, %v754_v41  ;;  %v4913_v9 = vld [vmem:[%s8467_s1 + $0x5f0] sm:$0xff]  ;;  %v1026_v41 = vld [vmem:[%s5412_s17 + $0x1e0] sm:$0x3]  ;;  %v1027_v33 = vld [vmem:[%s5412_s17 + $0x1e8] sm:$0x3]  ;;  %2636 = vmatpush.msrb.mxu2 %v4897_v4 }
 0x188   : > { %2743 = vmatpush.msrb.mxu3 %v4913_v9 }
 0x189   : > { %v6418_v31 = vadd.f32 %v967_v5, %v861_v50  ;;  %v1184_v5 = vrot.slane %v1026_v41, 2  ;;  %v1186_v50 = vrot.slane %v1027_v33, 2  ;;  %v1830_v41 = vld [vmem:[%s5412_s17 + $0x58] sm:$0xfe] }
 0x18b   : > { %910 = vmatmul.f32.gmra.mxu2 %v5142_v13  ;;  %v6420_v23 = vpop.f32.mrf.mxu0  ;;  %v6422_v25 = vpop.f32.mrf.mxu1  ;;  %v757_v13 = vadd.f32 %v6150_v3, %v6148_v59  ;;  %v1185_v59 = vsel %vm1065_vm1, %v1180_v57, %v1184_v5  ;;  %v1187_v3 = vsel %vm1065_vm1, %v1182_v12, %v1186_v50  ;;  %v760_v57 = vadd.f32 %v6168_v7, %v6166_v28  ;;  %v1492_v50 = vld [vmem:[%s5412_s17 + $0x50] sm:$0xff] }
 0x18c   : > { %1017 = vmatmul.f32.gmra.mxu3 %v5143_v49  ;;  %8485 = vst [vmem:[#allocation16_spill] sm:$0xff] %v6420_v23  ;;  %v1829_v23 = vld [vmem:[%s5412_s17 + $0x50] sm:$0xfe] }
 0x18d   : > { %8486 = vst [vmem:[#allocation17_spill] sm:$0xff] %v6422_v25 }
 0x18e   : > { %v863_v49 = vpop.f32.mrf.mxu2  ;;  %1348 = vmatmul.f32.gmra.mxu0 %v1181_v35  ;;  %1455 = vmatmul.f32.gmra.mxu1 %v1183_v6  ;;  %v4929_v35 = vld [vmem:[%s8467_s1 + $0x670] sm:$0xff] }
 0x18f   : > { %v970_v48 = vpop.f32.mrf.mxu3  ;;  %v864_v63 = vadd.f32 %v863_v49, %v757_v13  ;;  %v4945_v6 = vld [vmem:[%s8467_s1 + $0x6f0] sm:$0xff]  ;;  %2973 = vmatpush.msrb.mxu0 %v4929_v35  ;;  %v1986_v13 = vrot.slane %v1829_v23, 1 }
 0x190   : > { %3080 = vmatpush.msrb.mxu1 %v4945_v6  ;;  %v1496_v6 = vld [vmem:[%s5412_s17 + $0x70] sm:$0xff] }
 0x191   : > { %v6436_v25 = vadd.f32 %v970_v48, %v864_v63  ;;  %v1989_v63 = vrot.slane %v1830_v41, 1  ;;  %v1497_v41 = vld [vmem:[%s5412_s17 + $0x78] sm:$0xff] }
 0x193   : > { %913 = vmatmul.f32.gmra.mxu2 %v5144_v14  ;;  %v6438_v4 = vpop.f32.mrf.mxu0  ;;  %v6440_v9 = vpop.f32.mrf.mxu1  ;;  %v1494_v14 = vld [vmem:[%s5412_s17 + $0x60] sm:$0xff] }
 0x194   : > { %1020 = vmatmul.f32.gmra.mxu3 %v5145_v17  ;;  %8487 = vst [vmem:[#allocation18_spill] sm:$0xff] %v6438_v4  ;;  %v1495_v17 = vld [vmem:[%s5412_s17 + $0x68] sm:$0xff]  ;;  %v1987_v48 = vrot.slane %v1494_v14, 1 }
 0x195   : > { %8488 = vst [vmem:[#allocation19_spill] sm:$0xff] %v6440_v9  ;;  %v1990_v5 = vrot.slane %v1495_v17, 1  ;;  %v1493_v9 = vld [vmem:[%s5412_s17 + $0x58] sm:$0xff] }
 0x196   : > { %v866_v12 = vpop.f32.mrf.mxu2  ;;  %1351 = vmatmul.f32.gmra.mxu0 %v1185_v59  ;;  %1458 = vmatmul.f32.gmra.mxu1 %v1187_v3  ;;  %v1988_v7 = vsel %vm413_vm0, %v1986_v13, %v1987_v48  ;;  %v4896_v59 = vld [vmem:[%s8467_s1 + $0x568] sm:$0xff]  ;;  %v1992_v13 = vrot.slane %v1496_v6, 1 }
 0x197   : > { %v973_v33 = vpop.f32.mrf.mxu3  ;;  %v867_v49 = vadd.f32 %v866_v12, %v760_v57  ;;  %v1991_v23 = vsel %vm413_vm0, %v1989_v63, %v1990_v5  ;;  %v4912_v3 = vld [vmem:[%s8467_s1 + $0x5e8] sm:$0xff]  ;;  %2637 = vmatpush.msrb.mxu2 %v4896_v59 }
 0x198   : > { %2744 = vmatpush.msrb.mxu3 %v4912_v3  ;;  %v1993_v3 = vsel %vm413_vm0, %v1987_v48, %v1992_v13 }
 0x199   : > { %v6458_v4 = vadd.f32 %v973_v33, %v867_v49  ;;  %v1994_v49 = vrot.slane %v1497_v41, 1 }
 0x19b   : > { %1601 = vmatmul.f32.vlgmr.msra.gmra.mxu2 %v1492_v50  ;;  %v6460_v35 = vpop.f32.mrf.mxu0  ;;  %v6462_v28 = vpop.f32.mrf.mxu1 }
 0x19c   : > { %1708 = vmatmul.f32.vlgmr.msra.gmra.mxu3 %v1493_v9  ;;  %v763_v9 = vadd.f32 %v6184_v56, %v6182_v61  ;;  %v1995_v61 = vsel %vm413_vm0, %v1990_v5, %v1994_v49  ;;  %v4928_v56 = vld [vmem:[%s8467_s1 + $0x668] sm:$0xff] }
 0x19d   : > { %2974 = vmatpush.msrb.mxu0 %v4928_v56 }
 0x19e   : > { %v869_v57 = vpop.f32.mrf.mxu2  ;;  %2184 = vmatmul.f32.vlgmr.msra.gmra.mxu0 %v1988_v7  ;;  %2291 = vmatmul.f32.vlgmr.msra.gmra.mxu1 %v1991_v23  ;;  %v4944_v7 = vld [vmem:[%s8467_s1 + $0x6e8] sm:$0xff]  ;;  %v1498_v23 = vld [vmem:[%s5412_s17 + $0x80] sm:$0xff] }
 0x19f   : > { %v976_v12 = vpop.f32.mrf.mxu3  ;;  %v870_v33 = vadd.f32 %v869_v57, %v763_v9  ;;  %v1499_v9 = vld [vmem:[%s5412_s17 + $0x88] sm:$0xff]  ;;  %3081 = vmatpush.msrb.mxu1 %v4944_v7  ;;  %v1996_v5 = vrot.slane %v1498_v23, 1 }
 0x1a0   : > { %v1998_v57 = vrot.slane %v1499_v9, 1 }
 0x1a1   : > { %v6476_v63 = vadd.f32 %v976_v12, %v870_v33  ;;  %v1997_v56 = vsel %vm413_vm0, %v1992_v13, %v1996_v5 }
 0x1a2   : > { %v1999_v7 = vsel %vm413_vm0, %v1994_v49, %v1998_v57 }
 0x1a3   : > { %1604 = vmatmul.f32.gmra.mxu2 %v1494_v14  ;;  %v6478_v50 = vpop.f32.mrf.mxu0  ;;  %v6480_v59 = vpop.f32.mrf.mxu1 }
 0x1a4   : > { %1711 = vmatmul.f32.gmra.mxu3 %v1495_v17  ;;  %8489 = vst [vmem:[#allocation20_spill] sm:$0xff] %v6480_v59 }
 0x1a6   : > { %v872_v14 = vpop.f32.mrf.mxu2  ;;  %2187 = vmatmul.f32.gmra.mxu0 %v1993_v3  ;;  %2294 = vmatmul.f32.gmra.mxu1 %v1995_v61  ;;  %v4895_v3 = vld [vmem:[%s8467_s1 + $0x560] sm:$0xff]  ;;  %v1500_v61 = vld [vmem:[%s5412_s17 + $0x90] sm:$0xff] }
 0x1a7   : > { %v979_v17 = vpop.f32.mrf.mxu3  ;;  %v873_v48 = vadd.f32 %v872_v14, %v5938_v30  ;;  %v4911_v30 = vld [vmem:[%s8467_s1 + $0x5e0] sm:$0xff]  ;;  %v1501_v14 = vld [vmem:[%s5412_s17 + $0x98] sm:$0xff]  ;;  %2638 = vmatpush.msrb.mxu2 %v4895_v3  ;;  %v2000_v49 = vrot.slane %v1500_v61, 1 }
 0x1a8   : > { %2745 = vmatpush.msrb.mxu3 %v4911_v30 }
 0x1a9   : > { %v6493_v12 = vadd.f32 %v979_v17, %v873_v48  ;;  %v2002_v17 = vrot.slane %v1501_v14, 1  ;;  %v2001_v3 = vsel %vm413_vm0, %v1996_v5, %v2000_v49 }
 0x1ab   : > { %1607 = vmatmul.f32.gmra.mxu2 %v1496_v6  ;;  %v6495_v33 = vpop.f32.mrf.mxu0  ;;  %v6497_v59 = vpop.f32.mrf.mxu1  ;;  %v2003_v30 = vsel %vm413_vm0, %v1998_v57, %v2002_v17 }
 0x1ac   : > { %1714 = vmatmul.f32.gmra.mxu3 %v1497_v41  ;;  %8490 = vst [vmem:[#allocation21_spill] sm:$0xff] %v6495_v33 }
 0x1ad   : > { %8491 = vst [vmem:[#allocation22_spill] sm:$0xff] %v6497_v59 }
 0x1ae   : > { %v875_v6 = vpop.f32.mrf.mxu2  ;;  %2190 = vmatmul.f32.gmra.mxu0 %v1997_v56  ;;  %2297 = vmatmul.f32.gmra.mxu1 %v1999_v7  ;;  %v4927_v56 = vld [vmem:[%s8467_s1 + $0x660] sm:$0xff] }
 0x1af   : > { %v982_v41 = vpop.f32.mrf.mxu3  ;;  %v876_v13 = vadd.f32 %v875_v6, %v5956_v51  ;;  %v4943_v51 = vld [vmem:[%s8467_s1 + $0x6e0] sm:$0xff]  ;;  %v1503_v6 = vld [vmem:[%s5412_s17 + $0xa8] sm:$0xff]  ;;  %2975 = vmatpush.msrb.mxu0 %v4927_v56  ;;  %v4910_v56 = vld [vmem:[%s8467_s1 + $0x5d8] sm:$0xff] }
 0x1b0   : > { %v1502_v7 = vld [vmem:[%s5412_s17 + $0xa0] sm:$0xff]  ;;  %3082 = vmatpush.msrb.mxu1 %v4943_v51  ;;  %2746 = vmatpush.msrb.mxu3 %v4910_v56 }
 0x1b1   : > { %v6510_v48 = vadd.f32 %v982_v41, %v876_v13  ;;  %v2004_v57 = vrot.slane %v1502_v7, 1  ;;  %v2006_v41 = vrot.slane %v1503_v6, 1 }
 0x1b3   : > { %1610 = vmatmul.f32.gmra.mxu2 %v1498_v23  ;;  %v6512_v59 = vpop.f32.mrf.mxu0  ;;  %v6514_v33 = vpop.f32.mrf.mxu1  ;;  %v2007_v51 = vsel %vm413_vm0, %v2002_v17, %v2006_v41  ;;  %v4942_v17 = vld [vmem:[%s8467_s1 + $0x6d8] sm:$0xff] }
 0x1b4   : > { %1717 = vmatmul.f32.gmra.mxu3 %v1499_v9  ;;  %8492 = vst [vmem:[#allocation23_spill] sm:$0xff] %v6514_v33  ;;  %v4894_v33 = vld [vmem:[%s8467_s1 + $0x558] sm:$0xff]  ;;  %3083 = vmatpush.msrb.mxu1 %v4942_v17 }
 0x1b5   : > { %2639 = vmatpush.msrb.mxu2 %v4894_v33 }
 0x1b6   : > { %v878_v23 = vpop.f32.mrf.mxu2  ;;  %2193 = vmatmul.f32.gmra.mxu0 %v2001_v3  ;;  %2300 = vmatmul.f32.gmra.mxu1 %v2003_v30 }
 0x1b7   : > { %v985_v9 = vpop.f32.mrf.mxu3  ;;  %v879_v5 = vadd.f32 %v878_v23, %v5974_v0  ;;  %v2005_v0 = vsel %vm413_vm0, %v2000_v49, %v2004_v57  ;;  %v1504_v23 = vld [vmem:[%s5412_s17 + $0xb0] sm:$0xff]  ;;  %v4926_v49 = vld [vmem:[%s8467_s1 + $0x658] sm:$0xff] }
 0x1b8   : > { %2976 = vmatpush.msrb.mxu0 %v4926_v49 }
 0x1b9   : > { %v6527_v13 = vadd.f32 %v985_v9, %v879_v5  ;;  %v1505_v9 = vld [vmem:[%s5412_s17 + $0xb8] sm:$0xff] }
 0x1bb   : > { %8493 = vst [vmem:[#allocation24_spill] sm:$0xff] %v6527_v13  ;;  %1613 = vmatmul.f32.gmra.mxu2 %v1500_v61  ;;  %v6535_v3 = vpop.f32.mrf.mxu0  ;;  %v6537_v30 = vpop.f32.mrf.mxu1  ;;  %v2008_v61 = vrot.slane %v1504_v23, 1 }
 0x1bc   : > { %1720 = vmatmul.f32.gmra.mxu3 %v1501_v14  ;;  %8494 = vst [vmem:[#allocation25_spill] sm:$0xff] %v6537_v30  ;;  %v2010_v14 = vrot.slane %v1505_v9, 1 }
 0x1be   : > { %v881_v5 = vpop.f32.mrf.mxu2  ;;  %2196 = vmatmul.f32.gmra.mxu0 %v2005_v0  ;;  %2303 = vmatmul.f32.gmra.mxu1 %v2007_v51 }
 0x1bf   : > { %v988_v13 = vpop.f32.mrf.mxu3  ;;  %v882_v33 = vadd.f32 %v881_v5, %v5992_v11  ;;  %v2009_v11 = vsel %vm413_vm0, %v2004_v57, %v2008_v61  ;;  %v1506_v5 = vld [vmem:[%s5412_s17 + $0xc0] sm:$0xff]  ;;  %v4893_v57 = vld [vmem:[%s8467_s1 + $0x550] sm:$0xff] }
 0x1c0   : > { %2640 = vmatpush.msrb.mxu2 %v4893_v57 }
 0x1c1   : > { %v6544_v56 = vadd.f32 %v988_v13, %v882_v33  ;;  %v2011_v13 = vsel %vm413_vm0, %v2006_v41, %v2010_v14  ;;  %v1507_v33 = vld [vmem:[%s5412_s17 + $0xc8] sm:$0xff]  ;;  %v4909_v41 = vld [vmem:[%s8467_s1 + $0x5d0] sm:$0xff] }
 0x1c2   : > { %2747 = vmatpush.msrb.mxu3 %v4909_v41 }
 0x1c3   : > { %8495 = vst [vmem:[#allocation26_spill] sm:$0xff] %v6544_v56  ;;  %1616 = vmatmul.f32.gmra.mxu2 %v1502_v7  ;;  %v6552_v0 = vpop.f32.mrf.mxu0  ;;  %v6554_v51 = vpop.f32.mrf.mxu1  ;;  %v2012_v7 = vrot.slane %v1506_v5, 1 }
 0x1c4   : > { %1723 = vmatmul.f32.gmra.mxu3 %v1503_v6  ;;  %8496 = vst [vmem:[#allocation27_spill] sm:$0xff] %v6552_v0  ;;  %v2014_v6 = vrot.slane %v1507_v33, 1 }
 0x1c5   : > { %8497 = vst [vmem:[#allocation28_spill] sm:$0xff] %v6554_v51 }
 0x1c6   : > { %v884_v56 = vpop.f32.mrf.mxu2  ;;  %2199 = vmatmul.f32.gmra.mxu0 %v2009_v11  ;;  %2306 = vmatmul.f32.gmra.mxu1 %v2011_v13 }
 0x1c7   : > { %v991_v30 = vpop.f32.mrf.mxu3  ;;  %v885_v49 = vadd.f32 %v884_v56, %v6010_v38  ;;  %v2013_v38 = vsel %vm413_vm0, %v2008_v61, %v2012_v7  ;;  %v1508_v56 = vld [vmem:[%s5412_s17 + $0xd0] sm:$0xff] }
 0x1c8   : > { %v2016_v57 = vrot.slane %v1508_v56, 1  ;;  %v4925_v61 = vld [vmem:[%s8467_s1 + $0x650] sm:$0xff] }
 0x1c9   : > { %v6561_v17 = vadd.f32 %v991_v30, %v885_v49  ;;  %v2015_v30 = vsel %vm413_vm0, %v2010_v14, %v2014_v6  ;;  %v1509_v49 = vld [vmem:[%s5412_s17 + $0xd8] sm:$0xff]  ;;  %v4941_v14 = vld [vmem:[%s8467_s1 + $0x6d0] sm:$0xff]  ;;  %2977 = vmatpush.msrb.mxu0 %v4925_v61  ;;  %v1511_v61 = vld [vmem:[%s5412_s17 + $0xe8] sm:$0xff] }
 0x1ca   : > { %3084 = vmatpush.msrb.mxu1 %v4941_v14  ;;  %v2022_v14 = vrot.slane %v1511_v61, 1 }
 0x1cb   : > { %8498 = vst [vmem:[#allocation29_spill] sm:$0xff] %v6561_v17  ;;  %1619 = vmatmul.f32.gmra.mxu2 %v1504_v23  ;;  %v6569_v11 = vpop.f32.mrf.mxu0  ;;  %v6571_v13 = vpop.f32.mrf.mxu1  ;;  %v2018_v23 = vrot.slane %v1509_v49, 1 }
 0x1cc   : > { %1726 = vmatmul.f32.gmra.mxu3 %v1505_v9 }
 0x1ce   : > { %v887_v17 = vpop.f32.mrf.mxu2  ;;  %2202 = vmatmul.f32.gmra.mxu0 %v2013_v38  ;;  %2309 = vmatmul.f32.gmra.mxu1 %v2015_v30  ;;  %v4908_v38 = vld [vmem:[%s8467_s1 + $0x5c8] sm:$0xff]  ;;  %v1510_v30 = vld [vmem:[%s5412_s17 + $0xe0] sm:$0xff] }
 0x1cf   : > { %v994_v51 = vpop.f32.mrf.mxu3  ;;  %v888_v0 = vadd.f32 %v887_v17, %v6028_v53  ;;  %v2017_v17 = vsel %vm413_vm0, %v2012_v7, %v2016_v57  ;;  %2748 = vmatpush.msrb.mxu3 %v4908_v38  ;;  %v2023_v38 = vsel %vm413_vm0, %v2018_v23, %v2022_v14 }
 0x1d1   : > { %v6578_v9 = vadd.f32 %v994_v51, %v888_v0  ;;  %v2019_v0 = vsel %vm413_vm0, %v2014_v6, %v2018_v23  ;;  %v4892_v51 = vld [vmem:[%s8467_s1 + $0x548] sm:$0xff]  ;;  %v2020_v6 = vrot.slane %v1510_v30, 1 }
 0x1d2   : > { %2641 = vmatpush.msrb.mxu2 %v4892_v51 }
 0x1d3   : > { %8499 = vst [vmem:[#allocation30_spill] sm:$0xff] %v6578_v9  ;;  %1622 = vmatmul.f32.gmra.mxu2 %v1506_v5  ;;  %v6586_v41 = vpop.f32.mrf.mxu0  ;;  %v6588_v53 = vpop.f32.mrf.mxu1  ;;  %v2021_v51 = vsel %vm413_vm0, %v2016_v57, %v2020_v6 }
 0x1d4   : > { %1729 = vmatmul.f32.gmra.mxu3 %v1507_v33  ;;  %8500 = vst [vmem:[#allocation31_spill] sm:$0xff] %v6586_v41 }
 0x1d5   : > { %8501 = vst [vmem:[#allocation32_spill] sm:$0xff] %v6588_v53 }
 0x1d6   : > { %v890_v5 = vpop.f32.mrf.mxu2  ;;  %2205 = vmatmul.f32.gmra.mxu0 %v2017_v17  ;;  %2312 = vmatmul.f32.gmra.mxu1 %v2019_v0  ;;  %v4924_v17 = vld [vmem:[%s8467_s1 + $0x648] sm:$0xff]  ;;  %v1512_v0 = vld [vmem:[%s5412_s17 + $0xf0] sm:$0xff] }
 0x1d7   : > { %v997_v33 = vpop.f32.mrf.mxu3  ;;  %v891_v7 = vadd.f32 %v890_v5, %v6052_v34  ;;  %v4940_v34 = vld [vmem:[%s8467_s1 + $0x6c8] sm:$0xff]  ;;  %v1513_v5 = vld [vmem:[%s5412_s17 + $0xf8] sm:$0xff]  ;;  %2978 = vmatpush.msrb.mxu0 %v4924_v17  ;;  %v2024_v23 = vrot.slane %v1512_v0, 1 }
 0x1d8   : > { %3085 = vmatpush.msrb.mxu1 %v4940_v34 }
 0x1d9   : > { %v6601_v53 = vadd.f32 %v997_v33, %v891_v7  ;;  %v2026_v33 = vrot.slane %v1513_v5, 1  ;;  %v2025_v17 = vsel %vm413_vm0, %v2020_v6, %v2024_v23 }
 0x1db   : > { %1625 = vmatmul.f32.gmra.mxu2 %v1508_v56  ;;  %v6603_v41 = vpop.f32.mrf.mxu0  ;;  %v6605_v9 = vpop.f32.mrf.mxu1  ;;  %v2027_v34 = vsel %vm413_vm0, %v2022_v14, %v2026_v33 }
 0x1dc   : > { %1732 = vmatmul.f32.gmra.mxu3 %v1509_v49  ;;  %8502 = vst [vmem:[#allocation33_spill] sm:$0xff] %v6603_v41 }
 0x1dd   : > { %8503 = vst [vmem:[#allocation34_spill] sm:$0xff] %v6605_v9 }
 0x1de   : > { %v893_v56 = vpop.f32.mrf.mxu2  ;;  %2208 = vmatmul.f32.gmra.mxu0 %v2021_v51  ;;  %2315 = vmatmul.f32.gmra.mxu1 %v2023_v38  ;;  %v4891_v51 = vld [vmem:[%s8467_s1 + $0x540] sm:$0xff] }
 0x1df   : > { %v1000_v49 = vpop.f32.mrf.mxu3  ;;  %v894_v57 = vadd.f32 %v893_v56, %v6070_v29  ;;  %v4907_v29 = vld [vmem:[%s8467_s1 + $0x5c0] sm:$0xff]  ;;  %v1515_v56 = vld [vmem:[%s5412_s17 + $0x108] sm:$0xff]  ;;  %2642 = vmatpush.msrb.mxu2 %v4891_v51 }
 0x1e0   : > { %v1514_v38 = vld [vmem:[%s5412_s17 + $0x100] sm:$0xff]  ;;  %2749 = vmatpush.msrb.mxu3 %v4907_v29 }
 0x1e1   : > { %v6618_v7 = vadd.f32 %v1000_v49, %v894_v57  ;;  %v2028_v14 = vrot.slane %v1514_v38, 1  ;;  %v2030_v49 = vrot.slane %v1515_v56, 1 }
 0x1e3   : > { %1628 = vmatmul.f32.gmra.mxu2 %v1510_v30  ;;  %v6620_v9 = vpop.f32.mrf.mxu0  ;;  %v6622_v41 = vpop.f32.mrf.mxu1  ;;  %v2029_v51 = vsel %vm413_vm0, %v2024_v23, %v2028_v14  ;;  %v2031_v29 = vsel %vm413_vm0, %v2026_v33, %v2030_v49 }
 0x1e4   : > { %1735 = vmatmul.f32.gmra.mxu3 %v1511_v61  ;;  %8504 = vst [vmem:[#allocation35_spill] sm:$0xff] %v6620_v9 }
 0x1e5   : > { %8505 = vst [vmem:[#allocation36_spill] sm:$0xff] %v6622_v41 }
 0x1e6   : > { %v896_v30 = vpop.f32.mrf.mxu2  ;;  %2211 = vmatmul.f32.gmra.mxu0 %v2025_v17  ;;  %2318 = vmatmul.f32.gmra.mxu1 %v2027_v34  ;;  %v4923_v17 = vld [vmem:[%s8467_s1 + $0x640] sm:$0xff]  ;;  %v1516_v34 = vld [vmem:[%s5412_s17 + $0x110] sm:$0xff] }
 0x1e7   : > { %v1003_v61 = vpop.f32.mrf.mxu3  ;;  %v897_v6 = vadd.f32 %v896_v30, %v6088_v60  ;;  %v4939_v60 = vld [vmem:[%s8467_s1 + $0x6c0] sm:$0xff]  ;;  %v1517_v30 = vld [vmem:[%s5412_s17 + $0x118] sm:$0xff]  ;;  %2979 = vmatpush.msrb.mxu0 %v4923_v17  ;;  %v2032_v33 = vrot.slane %v1516_v34, 1 }
 0x1e8   : > { %3086 = vmatpush.msrb.mxu1 %v4939_v60 }
 0x1e9   : > { %v6635_v57 = vadd.f32 %v1003_v61, %v897_v6  ;;  %v2034_v61 = vrot.slane %v1517_v30, 1  ;;  %v2033_v17 = vsel %vm413_vm0, %v2028_v14, %v2032_v33 }
 0x1eb   : > { %1631 = vmatmul.f32.gmra.mxu2 %v1512_v0  ;;  %v6637_v41 = vpop.f32.mrf.mxu0  ;;  %v6639_v9 = vpop.f32.mrf.mxu1  ;;  %v2035_v60 = vsel %vm413_vm0, %v2030_v49, %v2034_v61 }
 0x1ec   : > { %1738 = vmatmul.f32.gmra.mxu3 %v1513_v5  ;;  %8506 = vst [vmem:[#allocation37_spill] sm:$0xff] %v6637_v41 }
 0x1ed   : > { %8507 = vst [vmem:[#allocation38_spill] sm:$0xff] %v6639_v9 }
 0x1ee   : > { %v899_v0 = vpop.f32.mrf.mxu2  ;;  %2214 = vmatmul.f32.gmra.mxu0 %v2029_v51  ;;  %2321 = vmatmul.f32.gmra.mxu1 %v2031_v29  ;;  %v4890_v51 = vld [vmem:[%s8467_s1 + $0x538] sm:$0xff]  ;;  %v1518_v29 = vld [vmem:[%s5412_s17 + $0x120] sm:$0xff] }
 0x1ef   : > { %v1006_v5 = vpop.f32.mrf.mxu3  ;;  %v900_v23 = vadd.f32 %v899_v0, %v6106_v24  ;;  %v4906_v24 = vld [vmem:[%s8467_s1 + $0x5b8] sm:$0xff]  ;;  %v1519_v0 = vld [vmem:[%s5412_s17 + $0x128] sm:$0xff]  ;;  %2643 = vmatpush.msrb.mxu2 %v4890_v51  ;;  %v2036_v49 = vrot.slane %v1518_v29, 1 }
 0x1f0   : > { %2750 = vmatpush.msrb.mxu3 %v4906_v24 }
 0x1f1   : > { %v6652_v6 = vadd.f32 %v1006_v5, %v900_v23  ;;  %v2038_v5 = vrot.slane %v1519_v0, 1  ;;  %v2037_v51 = vsel %vm413_vm0, %v2032_v33, %v2036_v49 }
 0x1f3   : > { %1634 = vmatmul.f32.gmra.mxu2 %v1514_v38  ;;  %v6654_v9 = vpop.f32.mrf.mxu0  ;;  %v6656_v41 = vpop.f32.mrf.mxu1  ;;  %v2039_v24 = vsel %vm413_vm0, %v2034_v61, %v2038_v5 }
 0x1f4   : > { %1741 = vmatmul.f32.gmra.mxu3 %v1515_v56  ;;  %8508 = vst [vmem:[#allocation39_spill] sm:$0xff] %v6654_v9 }
 0x1f5   : > { %8509 = vst [vmem:[#allocation40_spill] sm:$0xff] %v6656_v41 }
 0x1f6   : > { %v902_v38 = vpop.f32.mrf.mxu2  ;;  %2217 = vmatmul.f32.gmra.mxu0 %v2033_v17  ;;  %2324 = vmatmul.f32.gmra.mxu1 %v2035_v60  ;;  %v4922_v17 = vld [vmem:[%s8467_s1 + $0x638] sm:$0xff]  ;;  %v1520_v60 = vld [vmem:[%s5412_s17 + $0x130] sm:$0xff] }
 0x1f7   : > { %v1009_v56 = vpop.f32.mrf.mxu3  ;;  %v903_v14 = vadd.f32 %v902_v38, %v6124_v1  ;;  %v4938_v1 = vld [vmem:[%s8467_s1 + $0x6b8] sm:$0xff]  ;;  %2980 = vmatpush.msrb.mxu0 %v4922_v17  ;;  %v2040_v61 = vrot.slane %v1520_v60, 1 }
 0x1f8   : > { %v1521_v38 = vld [vmem:[%s5412_s17 + $0x138] sm:$0xff]  ;;  %3087 = vmatpush.msrb.mxu1 %v4938_v1 }
 0x1f9   : > { %v6669_v23 = vadd.f32 %v1009_v56, %v903_v14  ;;  %v2042_v56 = vrot.slane %v1521_v38, 1  ;;  %v2041_v17 = vsel %vm413_vm0, %v2036_v49, %v2040_v61 }
 0x1fb   : > { %1637 = vmatmul.f32.gmra.mxu2 %v1516_v34  ;;  %v6671_v41 = vpop.f32.mrf.mxu0  ;;  %v6673_v9 = vpop.f32.mrf.mxu1  ;;  %v2043_v1 = vsel %vm413_vm0, %v2038_v5, %v2042_v56 }
 0x1fc   : > { %1744 = vmatmul.f32.gmra.mxu3 %v1517_v30  ;;  %8510 = vst [vmem:[#allocation41_spill] sm:$0xff] %v6671_v41 }
 0x1fd   : > { %8511 = vst [vmem:[#allocation42_spill] sm:$0xff] %v6673_v9 }
 0x1fe   : > { %v905_v34 = vpop.f32.mrf.mxu2  ;;  %2220 = vmatmul.f32.gmra.mxu0 %v2037_v51  ;;  %2327 = vmatmul.f32.gmra.mxu1 %v2039_v24  ;;  %v4889_v51 = vld [vmem:[%s8467_s1 + $0x530] sm:$0xff]  ;;  %v1522_v24 = vld [vmem:[%s5412_s17 + $0x140] sm:$0xff] }
 0x1ff   : > { %v1012_v30 = vpop.f32.mrf.mxu3  ;;  %v906_v33 = vadd.f32 %v905_v34, %v6142_v22  ;;  %v4905_v22 = vld [vmem:[%s8467_s1 + $0x5b0] sm:$0xff]  ;;  %v1523_v34 = vld [vmem:[%s5412_s17 + $0x148] sm:$0xff]  ;;  %2644 = vmatpush.msrb.mxu2 %v4889_v51  ;;  %v2044_v5 = vrot.slane %v1522_v24, 1 }
 0x200   : > { %2751 = vmatpush.msrb.mxu3 %v4905_v22 }
 0x201   : > { %v6686_v14 = vadd.f32 %v1012_v30, %v906_v33  ;;  %v2046_v30 = vrot.slane %v1523_v34, 1  ;;  %v2045_v51 = vsel %vm413_vm0, %v2040_v61, %v2044_v5 }
 0x203   : > { %1640 = vmatmul.f32.gmra.mxu2 %v1518_v29  ;;  %v6688_v9 = vpop.f32.mrf.mxu0  ;;  %v6690_v41 = vpop.f32.mrf.mxu1  ;;  %v2047_v22 = vsel %vm413_vm0, %v2042_v56, %v2046_v30 }
 0x204   : > { %1747 = vmatmul.f32.gmra.mxu3 %v1519_v0  ;;  %8512 = vst [vmem:[#allocation43_spill] sm:$0xff] %v6688_v9 }
 0x205   : > { %8513 = vst [vmem:[#allocation44_spill] sm:$0xff] %v6690_v41 }
 0x206   : > { %v908_v29 = vpop.f32.mrf.mxu2  ;;  %2223 = vmatmul.f32.gmra.mxu0 %v2041_v17  ;;  %2330 = vmatmul.f32.gmra.mxu1 %v2043_v1  ;;  %v4921_v17 = vld [vmem:[%s8467_s1 + $0x630] sm:$0xff] }
 0x207   : > { %v1015_v0 = vpop.f32.mrf.mxu3  ;;  %v909_v49 = vadd.f32 %v908_v29, %v6160_v45  ;;  %v4937_v45 = vld [vmem:[%s8467_s1 + $0x6b0] sm:$0xff]  ;;  %v1525_v29 = vld [vmem:[%s5412_s17 + $0x158] sm:$0xff]  ;;  %2981 = vmatpush.msrb.mxu0 %v4921_v17 }
 0x208   : > { %v1524_v1 = vld [vmem:[%s5412_s17 + $0x150] sm:$0xff]  ;;  %3088 = vmatpush.msrb.mxu1 %v4937_v45 }
 0x209   : > { %v6703_v33 = vadd.f32 %v1015_v0, %v909_v49  ;;  %v2048_v56 = vrot.slane %v1524_v1, 1  ;;  %v2050_v0 = vrot.slane %v1525_v29, 1 }
 0x20b   : > { %1643 = vmatmul.f32.gmra.mxu2 %v1520_v60  ;;  %v6705_v41 = vpop.f32.mrf.mxu0  ;;  %v6707_v9 = vpop.f32.mrf.mxu1  ;;  %v2049_v17 = vsel %vm413_vm0, %v2044_v5, %v2048_v56  ;;  %v2051_v45 = vsel %vm413_vm0, %v2046_v30, %v2050_v0 }
 0x20c   : > { %1750 = vmatmul.f32.gmra.mxu3 %v1521_v38  ;;  %8514 = vst [vmem:[#allocation45_spill] sm:$0xff] %v6705_v41 }
 0x20d   : > { %8515 = vst [vmem:[#allocation46_spill] sm:$0xff] %v6707_v9 }
 0x20e   : > { %v911_v60 = vpop.f32.mrf.mxu2  ;;  %2226 = vmatmul.f32.gmra.mxu0 %v2045_v51  ;;  %2333 = vmatmul.f32.gmra.mxu1 %v2047_v22  ;;  %v4888_v51 = vld [vmem:[%s8467_s1 + $0x528] sm:$0xff]  ;;  %v1526_v22 = vld [vmem:[%s5412_s17 + $0x160] sm:$0xff] }
 0x20f   : > { %v1018_v38 = vpop.f32.mrf.mxu3  ;;  %v912_v61 = vadd.f32 %v911_v60, %v6178_v44  ;;  %v4904_v44 = vld [vmem:[%s8467_s1 + $0x5a8] sm:$0xff]  ;;  %2645 = vmatpush.msrb.mxu2 %v4888_v51  ;;  %v2052_v30 = vrot.slane %v1526_v22, 1 }
 0x210   : > { %v1527_v60 = vld [vmem:[%s5412_s17 + $0x168] sm:$0xff]  ;;  %2752 = vmatpush.msrb.mxu3 %v4904_v44 }
 0x211   : > { %v6720_v49 = vadd.f32 %v1018_v38, %v912_v61  ;;  %v2054_v38 = vrot.slane %v1527_v60, 1  ;;  %v2053_v44 = vsel %vm413_vm0, %v2048_v56, %v2052_v30 }
 0x213   : > { %8516 = vst [vmem:[#allocation47_spill] sm:$0xff] %v6720_v49  ;;  %1646 = vmatmul.f32.gmra.mxu2 %v1522_v24  ;;  %v6722_v9 = vpop.f32.mrf.mxu0  ;;  %v6724_v41 = vpop.f32.mrf.mxu1 }
 0x214   : > { %1753 = vmatmul.f32.gmra.mxu3 %v1523_v34  ;;  %8517 = vst [vmem:[#allocation48_spill] sm:$0xff] %v6722_v9 }
 0x215   : > { %8518 = vst [vmem:[#allocation49_spill] sm:$0xff] %v6724_v41  ;;  %v8519_v41 = vld [vmem:[#allocation5_spill] sm:$0xff] }
 0x216   : > { %v914_v24 = vpop.f32.mrf.mxu2  ;;  %2229 = vmatmul.f32.gmra.mxu0 %v2049_v17  ;;  %2336 = vmatmul.f32.gmra.mxu1 %v2051_v45  ;;  %v1373_v9 = vadd.f32 %v8519_v41, %v6198_v2  ;;  %v2055_v17 = vsel %vm413_vm0, %v2050_v0, %v2054_v38  ;;  %v4936_v45 = vld [vmem:[%s8467_s1 + $0x6a8] sm:$0xff]  ;;  %v1529_v2 = vld [vmem:[%s5412_s17 + $0x178] sm:$0xff] }
 0x217   : > { %v1021_v34 = vpop.f32.mrf.mxu3  ;;  %v915_v5 = vadd.f32 %v914_v24, %v6194_v47  ;;  %v4920_v47 = vld [vmem:[%s8467_s1 + $0x628] sm:$0xff]  ;;  %v1528_v24 = vld [vmem:[%s5412_s17 + $0x170] sm:$0xff]  ;;  %3089 = vmatpush.msrb.mxu1 %v4936_v45 }
 0x218   : > { %2982 = vmatpush.msrb.mxu0 %v4920_v47  ;;  %v2056_v0 = vrot.slane %v1528_v24, 1 }
 0x219   : > { %v6737_v61 = vadd.f32 %v1021_v34, %v915_v5  ;;  %v2058_v34 = vrot.slane %v1529_v2, 1 }
 0x21b   : > { %1649 = vmatmul.f32.gmra.mxu2 %v1524_v1  ;;  %v6741_v49 = vpop.f32.mrf.mxu0  ;;  %v6743_v51 = vpop.f32.mrf.mxu1 }
 0x21c   : > { %1756 = vmatmul.f32.gmra.mxu3 %v1525_v29  ;;  %8520 = vst [vmem:[#allocation5_spill] sm:$0xff] %v6741_v49  ;;  %v1462_v29 = vadd.f32 %v1373_v9, %v6214_v58  ;;  %v4887_v58 = vld [vmem:[%s8467_s1 + $0x520] sm:$0xff] }
 0x21d   : > { %8521 = vst [vmem:[#allocation50_spill] sm:$0xff] %v6743_v51  ;;  %v8522_v51 = vld [vmem:[#allocation6_spill] sm:$0xff]  ;;  %v4903_v9 = vld [vmem:[%s8467_s1 + $0x5a0] sm:$0xff]  ;;  %2646 = vmatpush.msrb.mxu2 %v4887_v58 }
 0x21e   : > { %v1602_v41 = vpop.f32.mrf.mxu2  ;;  %2232 = vmatmul.f32.gmra.mxu0 %v2053_v44  ;;  %2339 = vmatmul.f32.gmra.mxu1 %v2055_v17  ;;  %v1376_v49 = vadd.f32 %v8522_v51, %v6216_v36  ;;  %v2057_v44 = vsel %vm413_vm0, %v2052_v30, %v2056_v0  ;;  %v2059_v17 = vsel %vm413_vm0, %v2054_v38, %v2058_v34  ;;  %v1531_v36 = vld [vmem:[%s5412_s17 + $0x188] sm:$0xff] }
 0x21f   : > { %v1709_v1 = vpop.f32.mrf.mxu3  ;;  %2753 = vmatpush.msrb.mxu3 %v4903_v9 }
 0x220   : > { %v1710_v56 = vadd.f32 %v1709_v1, %v1602_v41  ;;  %v1530_v41 = vld [vmem:[%s5412_s17 + $0x180] sm:$0xff]  ;;  %v1463_v30 = vadd.f32 %v1376_v49, %v6232_v21  ;;  %v2062_v1 = vrot.slane %v1531_v36, 1 }
 0x221   : > { %v2060_v51 = vrot.slane %v1530_v41, 1  ;;  %v4919_v21 = vld [vmem:[%s8467_s1 + $0x620] sm:$0xff] }
 0x222   : > { %v6756_v5 = vadd.f32 %v1710_v56, %v1462_v29  ;;  %v8524_v56 = vld [vmem:[#allocation7_spill] sm:$0xff]  ;;  %v4935_v49 = vld [vmem:[%s8467_s1 + $0x6a0] sm:$0xff]  ;;  %2983 = vmatpush.msrb.mxu0 %v4919_v21 }
 0x223   : > { %1652 = vmatmul.f32.gmra.mxu2 %v1526_v22  ;;  %v6760_v47 = vpop.f32.mrf.mxu0  ;;  %v6762_v45 = vpop.f32.mrf.mxu1  ;;  %3090 = vmatpush.msrb.mxu1 %v4935_v49  ;;  %v4902_v21 = vld [vmem:[%s8467_s1 + $0x598] sm:$0xff] }
 0x224   : > { %1759 = vmatmul.f32.gmra.mxu3 %v1527_v60  ;;  %8523 = vst [vmem:[#allocation6_spill] sm:$0xff] %v6762_v45  ;;  %v1379_v45 = vadd.f32 %v8524_v56, %v6234_v18  ;;  %v1533_v18 = vld [vmem:[%s5412_s17 + $0x198] sm:$0xff] }
 0x225   : > { %v4886_v56 = vld [vmem:[%s8467_s1 + $0x518] sm:$0xff]  ;;  %2754 = vmatpush.msrb.mxu3 %v4902_v21 }
 0x226   : > { %v1605_v22 = vpop.f32.mrf.mxu2  ;;  %2235 = vmatmul.f32.gmra.mxu0 %v2057_v44  ;;  %2342 = vmatmul.f32.gmra.mxu1 %v2059_v17  ;;  %v2061_v44 = vsel %vm413_vm0, %v2056_v0, %v2060_v51  ;;  %v2063_v17 = vsel %vm413_vm0, %v2058_v34, %v2062_v1  ;;  %v1464_v0 = vadd.f32 %v1379_v45, %v6250_v46 }
 0x227   : > { %v1712_v60 = vpop.f32.mrf.mxu3  ;;  %2647 = vmatpush.msrb.mxu2 %v4886_v56  ;;  %v1382_v46 = vadd.f32 %v6260_v39, %v6258_v55  ;;  %v8525_v56 = vld [vmem:[#allocation8_spill] sm:$0xff] }
 0x228   : > { %v1713_v38 = vadd.f32 %v1712_v60, %v1605_v22  ;;  %v1532_v22 = vld [vmem:[%s5412_s17 + $0x190] sm:$0xff] }
 0x229   : > { %v2064_v60 = vrot.slane %v1532_v22, 1  ;;  %v1465_v21 = vadd.f32 %v1382_v46, %v8525_v56  ;;  %v1385_v46 = vadd.f32 %v6278_v19, %v6276_v32  ;;  %v1536_v56 = vld [vmem:[%s5412_s17 + $0x1b0] sm:$0xff] }
 0x22a   : > { %v6775_v29 = vadd.f32 %v1713_v38, %v1463_v30  ;;  %v2066_v30 = vrot.slane %v1533_v18, 1  ;;  %v2072_v19 = vrot.slane %v1536_v56, 1 }
 0x22b   : > { %1655 = vmatmul.f32.gmra.mxu2 %v1528_v24  ;;  %v6779_v58 = vpop.f32.mrf.mxu0  ;;  %v6781_v9 = vpop.f32.mrf.mxu1 }
 0x22c   : > { %1762 = vmatmul.f32.gmra.mxu3 %v1529_v2  ;;  %v2067_v49 = vsel %vm413_vm0, %v2062_v1, %v2066_v30  ;;  %v4934_v1 = vld [vmem:[%s8467_s1 + $0x698] sm:$0xff] }
 0x22d   : > { %3091 = vmatpush.msrb.mxu1 %v4934_v1 }
 0x22e   : > { %v1608_v24 = vpop.f32.mrf.mxu2  ;;  %2238 = vmatmul.f32.gmra.mxu0 %v2061_v44  ;;  %2345 = vmatmul.f32.gmra.mxu1 %v2063_v17  ;;  %v2065_v17 = vsel %vm413_vm0, %v2060_v51, %v2064_v60  ;;  %v4918_v51 = vld [vmem:[%s8467_s1 + $0x618] sm:$0xff] }
 0x22f   : > { %v1715_v2 = vpop.f32.mrf.mxu3  ;;  %2984 = vmatpush.msrb.mxu0 %v4918_v51  ;;  %v8527_v51 = vld [vmem:[#allocation9_spill] sm:$0xff] }
 0x230   : > { %v1716_v34 = vadd.f32 %v1715_v2, %v1608_v24  ;;  %v1534_v24 = vld [vmem:[%s5412_s17 + $0x1a0] sm:$0xff]  ;;  %v1535_v2 = vld [vmem:[%s5412_s17 + $0x1a8] sm:$0xff]  ;;  %v1466_v1 = vadd.f32 %v1385_v46, %v8527_v51  ;;  %v1388_v46 = vadd.f32 %v6296_v16, %v6294_v27 }
 0x231   : > { %v2068_v39 = vrot.slane %v1534_v24, 1  ;;  %v1538_v51 = vld [vmem:[%s5412_s17 + $0x1c0] sm:$0xff] }
 0x232   : > { %v6794_v38 = vadd.f32 %v1716_v34, %v1464_v0  ;;  %v2076_v27 = vrot.slane %v1538_v51, 1 }
 0x233   : > { %1658 = vmatmul.f32.gmra.mxu2 %v1530_v41  ;;  %v6804_v45 = vpop.f32.mrf.mxu0  ;;  %v6806_v44 = vpop.f32.mrf.mxu1  ;;  %v2070_v41 = vrot.slane %v1535_v2, 1 }
 0x234   : > { %1765 = vmatmul.f32.gmra.mxu3 %v1531_v36 }
 0x236   : > { %v1611_v0 = vpop.f32.mrf.mxu2  ;;  %2241 = vmatmul.f32.gmra.mxu0 %v2065_v17  ;;  %2348 = vmatmul.f32.gmra.mxu1 %v2067_v49 }
 0x237   : > { %v1718_v34 = vpop.f32.mrf.mxu3 }
 0x238   : > { %v1719_v55 = vadd.f32 %v1718_v34, %v1611_v0  ;;  %v2069_v0 = vsel %vm413_vm0, %v2064_v60, %v2068_v39  ;;  %v2071_v34 = vsel %vm413_vm0, %v2066_v30, %v2070_v41  ;;  %v4885_v60 = vld [vmem:[%s8467_s1 + $0x510] sm:$0xff] }
 0x239   : > { %v4901_v30 = vld [vmem:[%s8467_s1 + $0x590] sm:$0xff]  ;;  %2648 = vmatpush.msrb.mxu2 %v4885_v60  ;;  %v1467_v60 = vadd.f32 %v1388_v46, %v6304_v54 }
 0x23a   : > { %v6813_v36 = vadd.f32 %v1719_v55, %v1465_v21  ;;  %v1537_v21 = vld [vmem:[%s5412_s17 + $0x1b8] sm:$0xff]  ;;  %2755 = vmatpush.msrb.mxu3 %v4901_v30 }
 0x23b   : > { %1661 = vmatmul.f32.gmra.mxu2 %v1532_v22  ;;  %v6823_v17 = vpop.f32.mrf.mxu0  ;;  %v6825_v49 = vpop.f32.mrf.mxu1  ;;  %v2074_v22 = vrot.slane %v1537_v21, 1 }
 0x23c   : > { %8526 = vst [vmem:[#allocation7_spill] sm:$0xff] %v6813_v36  ;;  %1768 = vmatmul.f32.gmra.mxu3 %v1533_v18 }
 0x23e   : > { %v1614_v55 = vpop.f32.mrf.mxu2  ;;  %2244 = vmatmul.f32.gmra.mxu0 %v2069_v0  ;;  %2351 = vmatmul.f32.gmra.mxu1 %v2071_v34  ;;  %v2073_v34 = vsel %vm413_vm0, %v2068_v39, %v2072_v19  ;;  %v4933_v39 = vld [vmem:[%s8467_s1 + $0x690] sm:$0xff] }
 0x23f   : > { %v1721_v36 = vpop.f32.mrf.mxu3  ;;  %3092 = vmatpush.msrb.mxu1 %v4933_v39  ;;  %v1541_v39 = vld [vmem:[%s5412_s17 + $0x1d8] sm:$0xff] }
 0x240   : > { %v1722_v32 = vadd.f32 %v1721_v36, %v1614_v55  ;;  %v2075_v55 = vsel %vm413_vm0, %v2070_v41, %v2074_v22  ;;  %v8530_v41 = vld [vmem:[#allocation10_spill] sm:$0xff] }
 0x242   : > { %v6832_v18 = vadd.f32 %v1722_v32, %v1466_v1  ;;  %v1539_v1 = vld [vmem:[%s5412_s17 + $0x1c8] sm:$0xff] }
 0x243   : > { %1664 = vmatmul.f32.gmra.mxu2 %v1534_v24  ;;  %v6842_v36 = vpop.f32.mrf.mxu0  ;;  %v6844_v0 = vpop.f32.mrf.mxu1  ;;  %v2078_v16 = vrot.slane %v1539_v1, 1 }
 0x244   : > { %8528 = vst [vmem:[#allocation8_spill] sm:$0xff] %v6832_v18  ;;  %1771 = vmatmul.f32.gmra.mxu3 %v1535_v2  ;;  %v4917_v2 = vld [vmem:[%s8467_s1 + $0x610] sm:$0xff] }
 0x245   : > { %2985 = vmatpush.msrb.mxu0 %v4917_v2  ;;  %v1540_v2 = vld [vmem:[%s5412_s17 + $0x1d0] sm:$0xff] }
 0x246   : > { %v1617_v32 = vpop.f32.mrf.mxu2  ;;  %2247 = vmatmul.f32.gmra.mxu0 %v2073_v34  ;;  %2354 = vmatmul.f32.gmra.mxu1 %v2075_v55  ;;  %v8531_v34 = vld [vmem:[#allocation11_spill] sm:$0xff]  ;;  %v2077_v55 = vsel %vm413_vm0, %v2072_v19, %v2076_v27 }
 0x247   : > { %v1724_v18 = vpop.f32.mrf.mxu3  ;;  %v1391_v54 = vadd.f32 %v8531_v34, %v8530_v41  ;;  %v2080_v41 = vrot.slane %v1540_v2, 1  ;;  %v2082_v34 = vrot.slane %v1541_v39, 1 }
 0x248   : > { %v1725_v30 = vadd.f32 %v1724_v18, %v1617_v32  ;;  %v2079_v32 = vsel %vm413_vm0, %v2074_v22, %v2078_v16 }
 0x249   : > { %v1468_v19 = vadd.f32 %v1391_v54, %v6328_v43  ;;  %v4916_v43 = vld [vmem:[%s8467_s1 + $0x608] sm:$0xff] }
 0x24a   : > { %v6851_v24 = vadd.f32 %v1725_v30, %v1467_v60  ;;  %v4884_v60 = vld [vmem:[%s8467_s1 + $0x508] sm:$0xff]  ;;  %2986 = vmatpush.msrb.mxu0 %v4916_v43 }
 0x24b   : > { %1667 = vmatmul.f32.gmra.mxu2 %v1536_v56  ;;  %v6861_v18 = vpop.f32.mrf.mxu0  ;;  %v6863_v46 = vpop.f32.mrf.mxu1  ;;  %v4900_v30 = vld [vmem:[%s8467_s1 + $0x588] sm:$0xff] }
 0x24c   : > { %8529 = vst [vmem:[#allocation9_spill] sm:$0xff] %v6851_v24  ;;  %1774 = vmatmul.f32.gmra.mxu3 %v1537_v21  ;;  %2649 = vmatpush.msrb.mxu2 %v4884_v60  ;;  %v4932_v54 = vld [vmem:[%s8467_s1 + $0x688] sm:$0xff] }
 0x24d   : > { %8532 = vst [vmem:[#allocation10_spill] sm:$0xff] %v6861_v18  ;;  %2756 = vmatpush.msrb.mxu3 %v4900_v30  ;;  %v8534_v18 = vld [vmem:[#allocation12_spill] sm:$0xff]  ;;  %3093 = vmatpush.msrb.mxu1 %v4932_v54 }
 0x24e   : > { %8533 = vst [vmem:[#allocation11_spill] sm:$0xff] %v6863_v46  ;;  %v1620_v56 = vpop.f32.mrf.mxu2  ;;  %2250 = vmatmul.f32.gmra.mxu0 %v2077_v55  ;;  %2357 = vmatmul.f32.gmra.mxu1 %v2079_v32  ;;  %v1394_v24 = vadd.f32 %v8534_v18, %v6330_v42  ;;  %v2081_v55 = vsel %vm413_vm0, %v2076_v27, %v2080_v41  ;;  %v1543_v42 = vld [vmem:[%s5412_s17 + $0x1e8] sm:$0xff] }
 0x24f   : > { %v1727_v21 = vpop.f32.mrf.mxu3  ;;  %v2083_v32 = vsel %vm413_vm0, %v2078_v16, %v2082_v34 }
 0x250   : > { %v1728_v22 = vadd.f32 %v1727_v21, %v1620_v56  ;;  %v1542_v56 = vld [vmem:[%s5412_s17 + $0x1e0] sm:$0xff]  ;;  %v1469_v27 = vadd.f32 %v1394_v24, %v6346_v26  ;;  %v2086_v21 = vrot.slane %v1543_v42, 1 }
 0x251   : > { %v2084_v18 = vrot.slane %v1542_v56, 1  ;;  %v4883_v26 = vld [vmem:[%s8467_s1 + $0x500] sm:$0xff] }
 0x252   : > { %v6876_v46 = vadd.f32 %v1728_v22, %v1468_v19  ;;  %v8536_v22 = vld [vmem:[#allocation13_spill] sm:$0xff]  ;;  %2650 = vmatpush.msrb.mxu2 %v4883_v26 }
 0x253   : > { %1670 = vmatmul.f32.gmra.mxu2 %v1538_v51  ;;  %v6880_v60 = vpop.f32.mrf.mxu0  ;;  %v6882_v30 = vpop.f32.mrf.mxu1  ;;  %v4899_v24 = vld [vmem:[%s8467_s1 + $0x580] sm:$0xff] }
 0x254   : > { %1777 = vmatmul.f32.gmra.mxu3 %v1539_v1  ;;  %8535 = vst [vmem:[#allocation12_spill] sm:$0xff] %v6882_v30  ;;  %v1397_v30 = vadd.f32 %v8536_v22, %v6348_v15  ;;  %v1545_v15 = vld [vmem:[%s5412_s17 + $0x1f8] sm:$0xff]  ;;  %v8538_v22 = vld [vmem:[#allocation14_spill] sm:$0xff] }
 0x255   : > { %2757 = vmatpush.msrb.mxu3 %v4899_v24 }
 0x256   : > { %v1623_v51 = vpop.f32.mrf.mxu2  ;;  %2253 = vmatmul.f32.gmra.mxu0 %v2081_v55  ;;  %2360 = vmatmul.f32.gmra.mxu1 %v2083_v32  ;;  %v2085_v55 = vsel %vm413_vm0, %v2080_v41, %v2084_v18  ;;  %v2087_v32 = vsel %vm413_vm0, %v2082_v34, %v2086_v21  ;;  %v1470_v41 = vadd.f32 %v1397_v30, %v6364_v20  ;;  %v4915_v20 = vld [vmem:[%s8467_s1 + $0x600] sm:$0xff] }
 0x257   : > { %v1730_v1 = vpop.f32.mrf.mxu3  ;;  %v4931_v30 = vld [vmem:[%s8467_s1 + $0x680] sm:$0xff]  ;;  %2987 = vmatpush.msrb.mxu0 %v4915_v20 }
 0x258   : > { %v1731_v16 = vadd.f32 %v1730_v1, %v1623_v51  ;;  %v1544_v51 = vld [vmem:[%s5412_s17 + $0x1f0] sm:$0xff]  ;;  %3094 = vmatpush.msrb.mxu1 %v4931_v30 }
 0x259   : > { %v2088_v1 = vrot.slane %v1544_v51, 1 }
 0x25a   : > { %v6895_v19 = vadd.f32 %v1731_v16, %v1469_v27  ;;  %v2090_v27 = vrot.slane %v1545_v15, 1 }
 0x25b   : > { %1673 = vmatmul.f32.gmra.mxu2 %v1540_v2  ;;  %v6899_v43 = vpop.f32.mrf.mxu0  ;;  %v6901_v54 = vpop.f32.mrf.mxu1 }
 0x25c   : > { %1780 = vmatmul.f32.gmra.mxu3 %v1541_v39  ;;  %8537 = vst [vmem:[#allocation13_spill] sm:$0xff] %v6901_v54  ;;  %v1400_v54 = vadd.f32 %v8538_v22, %v6366_v40  ;;  %v1547_v40 = vld [vmem:[%s5412_s17 + $0x208] sm:$0xff]  ;;  %v8540_v22 = vld [vmem:[#allocation15_spill] sm:$0xff] }
 0x25e   : > { %v1626_v2 = vpop.f32.mrf.mxu2  ;;  %2256 = vmatmul.f32.gmra.mxu0 %v2085_v55  ;;  %2363 = vmatmul.f32.gmra.mxu1 %v2087_v32  ;;  %v2089_v55 = vsel %vm413_vm0, %v2084_v18, %v2088_v1  ;;  %v2091_v32 = vsel %vm413_vm0, %v2086_v21, %v2090_v27  ;;  %v1471_v18 = vadd.f32 %v1400_v54, %v6382_v8  ;;  %v4962_v8 = vld [vmem:[%s8467_s1 + $0x778] sm:$0xff] }
 0x25f   : > { %v1733_v39 = vpop.f32.mrf.mxu3  ;;  %v4978_v54 = vld [vmem:[%s8467_s1 + $0x7f8] sm:$0xff]  ;;  %3555 = vmatpush.msra.mxu2 %v4962_v8 }
 0x260   : > { %v1734_v34 = vadd.f32 %v1733_v39, %v1626_v2  ;;  %v1546_v2 = vld [vmem:[%s5412_s17 + $0x200] sm:$0xff]  ;;  %3662 = vmatpush.msra.mxu3 %v4978_v54 }
 0x261   : > { %v2092_v39 = vrot.slane %v1546_v2, 1 }
 0x262   : > { %v6914_v16 = vadd.f32 %v1734_v34, %v1470_v41  ;;  %v2094_v41 = vrot.slane %v1547_v40, 1 }
 0x263   : > { %1676 = vmatmul.f32.gmra.mxu2 %v1542_v56  ;;  %v6918_v26 = vpop.f32.mrf.mxu0  ;;  %v6920_v24 = vpop.f32.mrf.mxu1 }
 0x264   : > { %1783 = vmatmul.f32.gmra.mxu3 %v1543_v42  ;;  %8539 = vst [vmem:[#allocation14_spill] sm:$0xff] %v6920_v24  ;;  %v1403_v24 = vadd.f32 %v8540_v22, %v6384_v62  ;;  %v1549_v62 = vld [vmem:[%s5412_s17 + $0x218] sm:$0xff]  ;;  %v1406_v22 = vadd.f32 %v6404_v37, %v6402_v10  ;;  %v1551_v10 = vld [vmem:[%s5412_s17 + $0x228] sm:$0xff] }
 0x266   : > { %v1629_v56 = vpop.f32.mrf.mxu2  ;;  %2259 = vmatmul.f32.gmra.mxu0 %v2089_v55  ;;  %2366 = vmatmul.f32.gmra.mxu1 %v2091_v32  ;;  %v2093_v55 = vsel %vm413_vm0, %v2088_v1, %v2092_v39  ;;  %v2095_v32 = vsel %vm413_vm0, %v2090_v27, %v2094_v41  ;;  %v1472_v1 = vadd.f32 %v1403_v24, %v6400_v52  ;;  %v4994_v52 = vld [vmem:[%s8467_s1 + $0x878] sm:$0xff] }
 0x267   : > { %v1736_v42 = vpop.f32.mrf.mxu3  ;;  %v5010_v24 = vld [vmem:[%s8467_s1 + $0x8f8] sm:$0xff]  ;;  %4022 = vmatpush.msra.mxu0 %v4994_v52 }
 0x268   : > { %v1737_v21 = vadd.f32 %v1736_v42, %v1629_v56  ;;  %v1548_v56 = vld [vmem:[%s5412_s17 + $0x210] sm:$0xff]  ;;  %4129 = vmatpush.msra.mxu1 %v5010_v24 }
 0x269   : > { %v2096_v42 = vrot.slane %v1548_v56, 1 }
 0x26a   : > { %v6933_v34 = vadd.f32 %v1737_v21, %v1471_v18  ;;  %v2098_v18 = vrot.slane %v1549_v62, 1 }
 0x26b   : > { %1679 = vmatmul.f32.gmra.mxu2 %v1544_v51  ;;  %v6937_v20 = vpop.f32.mrf.mxu0  ;;  %v6939_v30 = vpop.f32.mrf.mxu1 }
 0x26c   : > { %1786 = vmatmul.f32.gmra.mxu3 %v1545_v15 }
 0x26e   : > { %v1632_v51 = vpop.f32.mrf.mxu2  ;;  %2262 = vmatmul.f32.gmra.mxu0 %v2093_v55  ;;  %2369 = vmatmul.f32.gmra.mxu1 %v2095_v32  ;;  %v2097_v55 = vsel %vm413_vm0, %v2092_v39, %v2096_v42  ;;  %v2099_v32 = vsel %vm413_vm0, %v2094_v41, %v2098_v18 }
 0x26f   : > { %v1739_v15 = vpop.f32.mrf.mxu3 }
 0x270   : > { %v1740_v27 = vadd.f32 %v1739_v15, %v1632_v51  ;;  %v1550_v51 = vld [vmem:[%s5412_s17 + $0x220] sm:$0xff]  ;;  %v2102_v15 = vrot.slane %v1551_v10, 1 }
 0x271   : > { %v2100_v41 = vrot.slane %v1550_v51, 1 }
 0x272   : > { %v6952_v21 = vadd.f32 %v1740_v27, %v1472_v1  ;;  %v8545_v27 = vld [vmem:[#allocation16_spill] sm:$0xff] }
 0x273   : > { %1682 = vmatmul.f32.gmra.mxu2 %v1546_v2  ;;  %v6956_v8 = vpop.f32.mrf.mxu0  ;;  %v6958_v54 = vpop.f32.mrf.mxu1 }
 0x274   : > { %8541 = vst [vmem:[#allocation15_spill] sm:$0xff] %v6952_v21  ;;  %1789 = vmatmul.f32.gmra.mxu3 %v1547_v40  ;;  %v1473_v40 = vadd.f32 %v1406_v22, %v6418_v31  ;;  %v4961_v31 = vld [vmem:[%s8467_s1 + $0x770] sm:$0xff] }
 0x275   : > { %8542 = vst [vmem:[#allocation51_spill] sm:$0xff] %v6956_v8  ;;  %v4977_v22 = vld [vmem:[%s8467_s1 + $0x7f0] sm:$0xff]  ;;  %3556 = vmatpush.msra.mxu2 %v4961_v31 }
 0x276   : > { %8543 = vst [vmem:[#allocation52_spill] sm:$0xff] %v6958_v54  ;;  %v1635_v37 = vpop.f32.mrf.mxu2  ;;  %2265 = vmatmul.f32.gmra.mxu0 %v2097_v55  ;;  %2372 = vmatmul.f32.gmra.mxu1 %v2099_v32  ;;  %v8546_v54 = vld [vmem:[#allocation17_spill] sm:$0xff]  ;;  %v2101_v55 = vsel %vm413_vm0, %v2096_v42, %v2100_v41  ;;  %v2103_v32 = vsel %vm413_vm0, %v2098_v18, %v2102_v15 }
 0x277   : > { %v1742_v2 = vpop.f32.mrf.mxu3  ;;  %v1409_v8 = vadd.f32 %v8546_v54, %v8545_v27  ;;  %3663 = vmatpush.msra.mxu3 %v4977_v22  ;;  %v2412_v27 = vld [vmem:[%s5412_s17 + $0x50] sm:$0xfc] }
 0x278   : > { %v1743_v39 = vadd.f32 %v1742_v2, %v1635_v37  ;;  %v5009_v22 = vld [vmem:[%s8467_s1 + $0x8f0] sm:$0xff] }
 0x279   : > { %v1474_v42 = vadd.f32 %v1409_v8, %v6436_v25  ;;  %4130 = vmatpush.msra.mxu1 %v5009_v22 }
 0x27a   : > { %v6971_v1 = vadd.f32 %v1743_v39, %v1473_v40 }
 0x27b   : > { %1685 = vmatmul.f32.gmra.mxu2 %v1548_v56  ;;  %v6975_v52 = vpop.f32.mrf.mxu0  ;;  %v6977_v24 = vpop.f32.mrf.mxu1  ;;  %v1889_v56 = vld [vmem:[%s5412_s17 + $0x230] sm:$0x1] }
 0x27c   : > { %8544 = vst [vmem:[#allocation53_spill] sm:$0xff] %v6971_v1  ;;  %1792 = vmatmul.f32.gmra.mxu3 %v1549_v62  ;;  %v1890_v62 = vld [vmem:[%s5412_s17 + $0x238] sm:$0x1]  ;;  %v2104_v2 = vrot.slane %v1889_v56, 1  ;;  %v2453_v56 = vrot.slane %v2412_v27, 2 }
 0x27d   : > { %8547 = vst [vmem:[#allocation16_spill] sm:$0xff] %v6975_v52  ;;  %v2106_v40 = vrot.slane %v1890_v62, 1  ;;  %v8549_v52 = vld [vmem:[#allocation18_spill] sm:$0xff]  ;;  %v8550_v1 = vld [vmem:[#allocation19_spill] sm:$0xff] }
 0x27e   : > { %8548 = vst [vmem:[#allocation17_spill] sm:$0xff] %v6977_v24  ;;  %v1638_v54 = vpop.f32.mrf.mxu2  ;;  %2268 = vmatmul.f32.gmra.mxu0 %v2101_v55  ;;  %2375 = vmatmul.f32.gmra.mxu1 %v2103_v32  ;;  %v2413_v24 = vld [vmem:[%s5412_s17 + $0x58] sm:$0xfc]  ;;  %v1412_v21 = vadd.f32 %v8550_v1, %v8549_v52  ;;  %v2105_v25 = vsel %vm413_vm0, %v2100_v41, %v2104_v2  ;;  %v4993_v32 = vld [vmem:[%s8467_s1 + $0x870] sm:$0xff]  ;;  %v5146_v1 = vld [vmem:[%s5412_s17 + $0x60] sm:$0xff] }
 0x27f   : > { %v1745_v37 = vpop.f32.mrf.mxu3  ;;  %v2107_v8 = vsel %vm413_vm0, %v2102_v15, %v2106_v40  ;;  %v5147_v52 = vld [vmem:[%s5412_s17 + $0x68] sm:$0xff]  ;;  %4023 = vmatpush.msra.mxu0 %v4993_v32  ;;  %v1415_v40 = vadd.f32 %v6462_v28, %v6460_v35  ;;  %v5148_v32 = vld [vmem:[%s5412_s17 + $0x70] sm:$0xff] }
 0x280   : > { %v1746_v18 = vadd.f32 %v1745_v37, %v1638_v54  ;;  %v2457_v62 = vrot.slane %v5147_v52, 2  ;;  %v1475_v54 = vadd.f32 %v1412_v21, %v6458_v4  ;;  %v4960_v4 = vld [vmem:[%s8467_s1 + $0x768] sm:$0xff]  ;;  %v2459_v22 = vrot.slane %v5148_v32, 2 }
 0x281   : > { %v4976_v21 = vld [vmem:[%s8467_s1 + $0x7e8] sm:$0xff]  ;;  %3557 = vmatpush.msra.mxu2 %v4960_v4 }
 0x282   : > { %v6990_v39 = vadd.f32 %v1746_v18, %v1474_v42  ;;  %3664 = vmatpush.msra.mxu3 %v4976_v21  ;;  %v5151_v21 = vld [vmem:[%s5412_s17 + $0x88] sm:$0xff] }
 0x283   : > { %1688 = vmatmul.f32.gmra.mxu2 %v1550_v51  ;;  %v6996_v31 = vpop.f32.mrf.mxu0  ;;  %v6998_v55 = vpop.f32.mrf.mxu1  ;;  %v2454_v51 = vrot.slane %v5146_v1, 2 }
 0x284   : > { %1795 = vmatmul.f32.gmra.mxu3 %v1551_v10  ;;  %v2456_v10 = vrot.slane %v2413_v24, 2  ;;  %v2879_v24 = vld [vmem:[%s5412_s17 + $0xa0] sm:$0xff] }
 0x285   : > { %v2455_v42 = vsel %vm1065_vm1, %v2453_v56, %v2454_v51  ;;  %v5149_v56 = vld [vmem:[%s5412_s17 + $0x78] sm:$0xff] }
 0x286   : > { %v1641_v41 = vpop.f32.mrf.mxu2  ;;  %2271 = vmatmul.f32.gmra.mxu0 %v2105_v25  ;;  %2378 = vmatmul.f32.gmra.mxu1 %v2107_v8  ;;  %v2458_v18 = vsel %vm1065_vm1, %v2456_v10, %v2457_v62  ;;  %v2880_v8 = vld [vmem:[%s5412_s17 + $0xa8] sm:$0xff]  ;;  %v2461_v35 = vrot.slane %v5149_v56, 2  ;;  %v1476_v10 = vadd.f32 %v1415_v40, %v6476_v63 }
 0x287   : > { %v1748_v15 = vpop.f32.mrf.mxu3  ;;  %v4992_v63 = vld [vmem:[%s8467_s1 + $0x868] sm:$0xff] }
 0x288   : > { %v1749_v37 = vadd.f32 %v1748_v15, %v1641_v41  ;;  %v2460_v41 = vsel %vm1065_vm1, %v2454_v51, %v2459_v22  ;;  %v2462_v15 = vsel %vm1065_vm1, %v2457_v62, %v2461_v35  ;;  %v5008_v51 = vld [vmem:[%s8467_s1 + $0x8e8] sm:$0xff]  ;;  %v5150_v62 = vld [vmem:[%s5412_s17 + $0x80] sm:$0xff]  ;;  %4024 = vmatpush.msra.mxu0 %v4992_v63 }
 0x289   : > { %v2463_v40 = vrot.slane %v5150_v62, 2  ;;  %4131 = vmatpush.msra.mxu1 %v5008_v51  ;;  %v8553_v63 = vld [vmem:[#allocation22_spill] sm:$0xff] }
 0x28a   : > { %v7013_v2 = vadd.f32 %v1749_v37, %v1475_v54  ;;  %v2881_v37 = vld [vmem:[%s5412_s17 + $0xb0] sm:$0xff] }
 0x28b   : > { %2651 = vmatmul.f32.vlgmr.msrb.gmra.mxu2 %v2455_v42  ;;  %v7018_v27 = vpop.f32.mrf.mxu0  ;;  %v7020_v25 = vpop.f32.mrf.mxu1  ;;  %v8551_v42 = vld [vmem:[#allocation20_spill] sm:$0xff] }
 0x28c   : > { %2758 = vmatmul.f32.vlgmr.msrb.gmra.mxu3 %v2458_v18  ;;  %v1418_v18 = vadd.f32 %v8551_v42, %v6478_v50  ;;  %v2465_v50 = vrot.slane %v5151_v21, 2  ;;  %v8552_v42 = vld [vmem:[#allocation21_spill] sm:$0xff]  ;;  %v5153_v21 = vld [vmem:[%s5412_s17 + $0x98] sm:$0xff] }
 0x28d   : > { %v1421_v51 = vadd.f32 %v8553_v63, %v8552_v42 }
 0x28e   : > { %v1644_v28 = vpop.f32.mrf.mxu2  ;;  %2988 = vmatmul.f32.vlgmr.msrb.gmra.mxu0 %v2879_v24  ;;  %3095 = vmatmul.f32.vlgmr.msrb.gmra.mxu1 %v2880_v8  ;;  %v2882_v8 = vld [vmem:[%s5412_s17 + $0xb8] sm:$0xff] }
 0x28f   : > { %v1751_v1 = vpop.f32.mrf.mxu3 }
 0x290   : > { %v1752_v52 = vadd.f32 %v1751_v1, %v1644_v28  ;;  %v1477_v28 = vadd.f32 %v1418_v18, %v6493_v12  ;;  %v4959_v12 = vld [vmem:[%s8467_s1 + $0x760] sm:$0xff] }
 0x291   : > { %3558 = vmatpush.msra.mxu2 %v4959_v12  ;;  %v8554_v12 = vld [vmem:[#allocation23_spill] sm:$0xff] }
 0x292   : > { %v7034_v54 = vadd.f32 %v1752_v52, %v1476_v10  ;;  %v2464_v10 = vsel %vm1065_vm1, %v2459_v22, %v2463_v40  ;;  %v2466_v52 = vsel %vm1065_vm1, %v2461_v35, %v2465_v50  ;;  %v4975_v22 = vld [vmem:[%s8467_s1 + $0x7e0] sm:$0xff]  ;;  %v5152_v35 = vld [vmem:[%s5412_s17 + $0x90] sm:$0xff] }
 0x293   : > { %2654 = vmatmul.f32.gmra.mxu2 %v2460_v41  ;;  %v7039_v4 = vpop.f32.mrf.mxu0  ;;  %v7041_v24 = vpop.f32.mrf.mxu1  ;;  %v2467_v18 = vrot.slane %v5152_v35, 2  ;;  %3665 = vmatpush.msra.mxu3 %v4975_v22  ;;  %v2885_v35 = vld [vmem:[%s5412_s17 + $0xd0] sm:$0xff]  ;;  %v1424_v22 = vadd.f32 %v8554_v12, %v6512_v59 }
 0x294   : > { %2761 = vmatmul.f32.gmra.mxu3 %v2462_v15  ;;  %v2883_v15 = vld [vmem:[%s5412_s17 + $0xc0] sm:$0xff] }
 0x296   : > { %v1647_v32 = vpop.f32.mrf.mxu2  ;;  %2991 = vmatmul.f32.gmra.mxu0 %v2881_v37  ;;  %3098 = vmatmul.f32.gmra.mxu1 %v2882_v8  ;;  %v2884_v8 = vld [vmem:[%s5412_s17 + $0xc8] sm:$0xff] }
 0x297   : > { %v1754_v56 = vpop.f32.mrf.mxu3 }
 0x298   : > { %v1755_v1 = vadd.f32 %v1754_v56, %v1647_v32  ;;  %v2469_v32 = vrot.slane %v5153_v21, 2 }
 0x29a   : > { %v7055_v41 = vadd.f32 %v1755_v1, %v1477_v28  ;;  %v1478_v1 = vadd.f32 %v1421_v51, %v6510_v48  ;;  %v2470_v42 = vsel %vm1065_vm1, %v2465_v50, %v2469_v32  ;;  %v4991_v48 = vld [vmem:[%s8467_s1 + $0x860] sm:$0xff] }
 0x29b   : > { %2657 = vmatmul.f32.gmra.mxu2 %v2464_v10  ;;  %v7060_v62 = vpop.f32.mrf.mxu0  ;;  %v7062_v37 = vpop.f32.mrf.mxu1  ;;  %v5154_v50 = vld [vmem:[%s5412_s17 + $0xa0] sm:$0xff]  ;;  %4025 = vmatpush.msra.mxu0 %v4991_v48  ;;  %v4958_v48 = vld [vmem:[%s8467_s1 + $0x758] sm:$0xff] }
 0x29c   : > { %2764 = vmatmul.f32.gmra.mxu3 %v2466_v52  ;;  %v2468_v52 = vsel %vm1065_vm1, %v2463_v40, %v2467_v18  ;;  %v5007_v40 = vld [vmem:[%s8467_s1 + $0x8e0] sm:$0xff]  ;;  %v2471_v51 = vrot.slane %v5154_v50, 2  ;;  %3559 = vmatpush.msra.mxu2 %v4958_v48  ;;  %v8561_v48 = vld [vmem:[#allocation26_spill] sm:$0xff] }
 0x29d   : > { %4132 = vmatpush.msra.mxu1 %v5007_v40  ;;  %v2887_v40 = vld [vmem:[%s5412_s17 + $0xe0] sm:$0xff] }
 0x29e   : > { %v1650_v56 = vpop.f32.mrf.mxu2  ;;  %2994 = vmatmul.f32.gmra.mxu0 %v2883_v15  ;;  %3101 = vmatmul.f32.gmra.mxu1 %v2884_v8  ;;  %v2886_v8 = vld [vmem:[%s5412_s17 + $0xd8] sm:$0xff]  ;;  %v2472_v12 = vsel %vm1065_vm1, %v2467_v18, %v2471_v51 }
 0x29f   : > { %v1757_v28 = vpop.f32.mrf.mxu3 }
 0x2a0   : > { %v1758_v10 = vadd.f32 %v1757_v28, %v1650_v56  ;;  %v5155_v56 = vld [vmem:[%s5412_s17 + $0xa8] sm:$0xff] }
 0x2a1   : > { %v2473_v28 = vrot.slane %v5155_v56, 2  ;;  %v2888_v56 = vld [vmem:[%s5412_s17 + $0xe8] sm:$0xff] }
 0x2a2   : > { %v7076_v63 = vadd.f32 %v1758_v10, %v1478_v1  ;;  %v8556_v10 = vld [vmem:[#allocation24_spill] sm:$0xff] }
 0x2a3   : > { %2660 = vmatmul.f32.gmra.mxu2 %v2468_v52  ;;  %v7081_v21 = vpop.f32.mrf.mxu0  ;;  %v7083_v15 = vpop.f32.mrf.mxu1  ;;  %v1479_v52 = vadd.f32 %v1424_v22, %v8556_v10  ;;  %v8558_v22 = vld [vmem:[#allocation25_spill] sm:$0xff]  ;;  %v5157_v10 = vld [vmem:[%s5412_s17 + $0xb8] sm:$0xff] }
 0x2a4   : > { %2767 = vmatmul.f32.gmra.mxu3 %v2470_v42  ;;  %8555 = vst [vmem:[#allocation18_spill] sm:$0xff] %v7083_v15  ;;  %v2474_v15 = vsel %vm1065_vm1, %v2469_v32, %v2473_v28 }
 0x2a6   : > { %v1653_v59 = vpop.f32.mrf.mxu2  ;;  %2997 = vmatmul.f32.gmra.mxu0 %v2885_v35  ;;  %3104 = vmatmul.f32.gmra.mxu1 %v2886_v8  ;;  %v4974_v35 = vld [vmem:[%s8467_s1 + $0x7d8] sm:$0xff]  ;;  %v1427_v8 = vadd.f32 %v8558_v22, %v6535_v3 }
 0x2a7   : > { %v1760_v1 = vpop.f32.mrf.mxu3  ;;  %3666 = vmatpush.msra.mxu3 %v4974_v35 }
 0x2a8   : > { %v1761_v42 = vadd.f32 %v1760_v1, %v1653_v59  ;;  %v5156_v59 = vld [vmem:[%s5412_s17 + $0xb0] sm:$0xff]  ;;  %v1480_v3 = vadd.f32 %v1427_v8, %v8561_v48  ;;  %v5158_v48 = vld [vmem:[%s5412_s17 + $0xc0] sm:$0xff] }
 0x2a9   : > { %v2475_v1 = vrot.slane %v5156_v59, 2  ;;  %v4990_v59 = vld [vmem:[%s8467_s1 + $0x858] sm:$0xff] }
 0x2aa   : > { %v7097_v50 = vadd.f32 %v1761_v42, %v1479_v52  ;;  %v2477_v52 = vrot.slane %v5157_v10, 2  ;;  %4026 = vmatpush.msra.mxu0 %v4990_v59  ;;  %v8563_v8 = vld [vmem:[#allocation27_spill] sm:$0xff]  ;;  %v8565_v59 = vld [vmem:[#allocation29_spill] sm:$0xff] }
 0x2ab   : > { %2663 = vmatmul.f32.gmra.mxu2 %v2472_v12  ;;  %v7107_v18 = vpop.f32.mrf.mxu0  ;;  %v7109_v32 = vpop.f32.mrf.mxu1  ;;  %v2476_v12 = vsel %vm1065_vm1, %v2471_v51, %v2475_v1  ;;  %v2889_v10 = vld [vmem:[%s5412_s17 + $0xf0] sm:$0xff] }
 0x2ac   : > { %8557 = vst [vmem:[#allocation19_spill] sm:$0xff] %v7097_v50  ;;  %2770 = vmatmul.f32.gmra.mxu3 %v2474_v15  ;;  %v2478_v35 = vsel %vm1065_vm1, %v2473_v28, %v2477_v52 }
 0x2ad   : > { %8559 = vst [vmem:[#allocation20_spill] sm:$0xff] %v7107_v18 }
 0x2ae   : > { %8560 = vst [vmem:[#allocation21_spill] sm:$0xff] %v7109_v32  ;;  %v1656_v42 = vpop.f32.mrf.mxu2  ;;  %3000 = vmatmul.f32.gmra.mxu0 %v2887_v40  ;;  %3107 = vmatmul.f32.gmra.mxu1 %v2888_v56  ;;  %v5006_v40 = vld [vmem:[%s8467_s1 + $0x8d8] sm:$0xff] }
 0x2af   : > { %v1763_v50 = vpop.f32.mrf.mxu3  ;;  %4133 = vmatpush.msra.mxu1 %v5006_v40  ;;  %v8564_v56 = vld [vmem:[#allocation28_spill] sm:$0xff] }
 0x2b0   : > { %v1764_v15 = vadd.f32 %v1763_v50, %v1656_v42  ;;  %v1430_v50 = vadd.f32 %v8564_v56, %v8563_v8  ;;  %v2890_v42 = vld [vmem:[%s5412_s17 + $0xf8] sm:$0xff] }
 0x2b2   : > { %v7118_v22 = vadd.f32 %v1764_v15, %v1480_v3  ;;  %v2479_v3 = vrot.slane %v5158_v48, 2  ;;  %v5159_v15 = vld [vmem:[%s5412_s17 + $0xc8] sm:$0xff]  ;;  %v1481_v40 = vadd.f32 %v1430_v50, %v8565_v59  ;;  %v4957_v48 = vld [vmem:[%s8467_s1 + $0x750] sm:$0xff]  ;;  %v5161_v59 = vld [vmem:[%s5412_s17 + $0xd8] sm:$0xff] }
 0x2b3   : > { %2666 = vmatmul.f32.gmra.mxu2 %v2476_v12  ;;  %v7128_v51 = vpop.f32.mrf.mxu0  ;;  %v7130_v28 = vpop.f32.mrf.mxu1  ;;  %v2892_v50 = vld [vmem:[%s5412_s17 + $0x108] sm:$0xff] }
 0x2b4   : > { %8562 = vst [vmem:[#allocation22_spill] sm:$0xff] %v7118_v22  ;;  %2773 = vmatmul.f32.gmra.mxu3 %v2478_v35  ;;  %v2481_v22 = vrot.slane %v5159_v15, 2  ;;  %v2480_v35 = vsel %vm1065_vm1, %v2475_v1, %v2479_v3  ;;  %3560 = vmatpush.msra.mxu2 %v4957_v48  ;;  %v8569_v48 = vld [vmem:[#allocation30_spill] sm:$0xff] }
 0x2b6   : > { %v1659_v32 = vpop.f32.mrf.mxu2  ;;  %3003 = vmatmul.f32.gmra.mxu0 %v2889_v10  ;;  %3110 = vmatmul.f32.gmra.mxu1 %v2890_v42  ;;  %v2482_v8 = vsel %vm1065_vm1, %v2477_v52, %v2481_v22  ;;  %v4973_v10 = vld [vmem:[%s8467_s1 + $0x7d0] sm:$0xff]  ;;  %v2891_v52 = vld [vmem:[%s5412_s17 + $0x100] sm:$0xff] }
 0x2b7   : > { %v1766_v18 = vpop.f32.mrf.mxu3  ;;  %3667 = vmatpush.msra.mxu3 %v4973_v10  ;;  %v5160_v42 = vld [vmem:[%s5412_s17 + $0xd0] sm:$0xff] }
 0x2b8   : > { %v1767_v12 = vadd.f32 %v1766_v18, %v1659_v32  ;;  %v1433_v18 = vadd.f32 %v6571_v13, %v6569_v11  ;;  %v2483_v15 = vrot.slane %v5160_v42, 2  ;;  %v4989_v42 = vld [vmem:[%s8467_s1 + $0x850] sm:$0xff] }
 0x2b9   : > { %4027 = vmatpush.msra.mxu0 %v4989_v42 }
 0x2ba   : > { %v7139_v56 = vadd.f32 %v1767_v12, %v1481_v40  ;;  %v2485_v40 = vrot.slane %v5161_v59, 2  ;;  %v1482_v11 = vadd.f32 %v1433_v18, %v8569_v48  ;;  %v8572_v18 = vld [vmem:[#allocation32_spill] sm:$0xff]  ;;  %v4956_v48 = vld [vmem:[%s8467_s1 + $0x748] sm:$0xff] }
 0x2bb   : > { %2669 = vmatmul.f32.gmra.mxu2 %v2480_v35  ;;  %v7149_v32 = vpop.f32.mrf.mxu0  ;;  %v7151_v1 = vpop.f32.mrf.mxu1  ;;  %v2484_v35 = vsel %vm1065_vm1, %v2479_v3, %v2483_v15 }
 0x2bc   : > { %8566 = vst [vmem:[#allocation23_spill] sm:$0xff] %v7139_v56  ;;  %2776 = vmatmul.f32.gmra.mxu3 %v2482_v8  ;;  %v2486_v8 = vsel %vm1065_vm1, %v2481_v22, %v2485_v40  ;;  %3561 = vmatpush.msra.mxu2 %v4956_v48  ;;  %v8576_v48 = vld [vmem:[#allocation34_spill] sm:$0xff] }
 0x2bd   : > { %8567 = vst [vmem:[#allocation24_spill] sm:$0xff] %v7149_v32 }
 0x2be   : > { %8568 = vst [vmem:[#allocation25_spill] sm:$0xff] %v7151_v1  ;;  %v1662_v12 = vpop.f32.mrf.mxu2  ;;  %3006 = vmatmul.f32.gmra.mxu0 %v2891_v52  ;;  %3113 = vmatmul.f32.gmra.mxu1 %v2892_v50  ;;  %v5005_v52 = vld [vmem:[%s8467_s1 + $0x8d0] sm:$0xff] }
 0x2bf   : > { %v1769_v56 = vpop.f32.mrf.mxu3  ;;  %v2893_v50 = vld [vmem:[%s5412_s17 + $0x110] sm:$0xff]  ;;  %4134 = vmatpush.msra.mxu1 %v5005_v52  ;;  %v5163_v52 = vld [vmem:[%s5412_s17 + $0xe8] sm:$0xff] }
 0x2c0   : > { %v1770_v13 = vadd.f32 %v1769_v56, %v1662_v12  ;;  %v8571_v56 = vld [vmem:[#allocation31_spill] sm:$0xff] }
 0x2c1   : > { %v1436_v3 = vadd.f32 %v8572_v18, %v8571_v56  ;;  %v2894_v12 = vld [vmem:[%s5412_s17 + $0x118] sm:$0xff]  ;;  %v2489_v56 = vrot.slane %v5163_v52, 2  ;;  %v8575_v52 = vld [vmem:[#allocation33_spill] sm:$0xff] }
 0x2c2   : > { %v7160_v10 = vadd.f32 %v1770_v13, %v1482_v11  ;;  %v4972_v11 = vld [vmem:[%s8467_s1 + $0x7c8] sm:$0xff]  ;;  %v5162_v13 = vld [vmem:[%s5412_s17 + $0xe0] sm:$0xff] }
 0x2c3   : > { %2672 = vmatmul.f32.gmra.mxu2 %v2484_v35  ;;  %v7171_v22 = vpop.f32.mrf.mxu0  ;;  %v7173_v59 = vpop.f32.mrf.mxu1  ;;  %v2487_v42 = vrot.slane %v5162_v13, 2  ;;  %3668 = vmatpush.msra.mxu3 %v4972_v11  ;;  %v1483_v18 = vadd.f32 %v1436_v3, %v6601_v53  ;;  %v2895_v13 = vld [vmem:[%s5412_s17 + $0x120] sm:$0xff]  ;;  %v1439_v11 = vadd.f32 %v8576_v48, %v8575_v52  ;;  %v4988_v53 = vld [vmem:[%s8467_s1 + $0x848] sm:$0xff] }
 0x2c4   : > { %8570 = vst [vmem:[#allocation26_spill] sm:$0xff] %v7160_v10  ;;  %2779 = vmatmul.f32.gmra.mxu3 %v2486_v8  ;;  %v2490_v10 = vsel %vm1065_vm1, %v2485_v40, %v2489_v56  ;;  %v5164_v40 = vld [vmem:[%s5412_s17 + $0xf0] sm:$0xff]  ;;  %4028 = vmatpush.msra.mxu0 %v4988_v53  ;;  %v8580_v53 = vld [vmem:[#allocation36_spill] sm:$0xff] }
 0x2c5   : > { %8573 = vst [vmem:[#allocation27_spill] sm:$0xff] %v7171_v22  ;;  %v2488_v22 = vsel %vm1065_vm1, %v2483_v15, %v2487_v42  ;;  %v5004_v15 = vld [vmem:[%s8467_s1 + $0x8c8] sm:$0xff]  ;;  %v2491_v3 = vrot.slane %v5164_v40, 2  ;;  %v2897_v40 = vld [vmem:[%s5412_s17 + $0x130] sm:$0xff] }
 0x2c6   : > { %8574 = vst [vmem:[#allocation28_spill] sm:$0xff] %v7173_v59  ;;  %v1665_v35 = vpop.f32.mrf.mxu2  ;;  %3009 = vmatmul.f32.gmra.mxu0 %v2893_v50  ;;  %3116 = vmatmul.f32.gmra.mxu1 %v2894_v12  ;;  %v2896_v12 = vld [vmem:[%s5412_s17 + $0x128] sm:$0xff] }
 0x2c7   : > { %v1772_v8 = vpop.f32.mrf.mxu3  ;;  %4135 = vmatpush.msra.mxu1 %v5004_v15  ;;  %v2492_v52 = vsel %vm1065_vm1, %v2487_v42, %v2491_v3  ;;  %v4971_v42 = vld [vmem:[%s8467_s1 + $0x7c0] sm:$0xff] }
 0x2c8   : > { %v1773_v59 = vadd.f32 %v1772_v8, %v1665_v35  ;;  %v1484_v8 = vadd.f32 %v1439_v11, %v6618_v7  ;;  %v4955_v7 = vld [vmem:[%s8467_s1 + $0x740] sm:$0xff]  ;;  %3669 = vmatpush.msra.mxu3 %v4971_v42 }
 0x2c9   : > { %3562 = vmatpush.msra.mxu2 %v4955_v7  ;;  %v8584_v7 = vld [vmem:[#allocation38_spill] sm:$0xff] }
 0x2ca   : > { %v7187_v1 = vadd.f32 %v1773_v59, %v1483_v18  ;;  %v5165_v59 = vld [vmem:[%s5412_s17 + $0xf8] sm:$0xff] }
 0x2cb   : > { %2675 = vmatmul.f32.gmra.mxu2 %v2488_v22  ;;  %v7192_v32 = vpop.f32.mrf.mxu0  ;;  %v7194_v50 = vpop.f32.mrf.mxu1  ;;  %v2493_v35 = vrot.slane %v5165_v59, 2  ;;  %v8579_v59 = vld [vmem:[#allocation35_spill] sm:$0xff] }
 0x2cc   : > { %2782 = vmatmul.f32.gmra.mxu3 %v2490_v10  ;;  %8577 = vst [vmem:[#allocation29_spill] sm:$0xff] %v7192_v32  ;;  %v1442_v15 = vadd.f32 %v8580_v53, %v8579_v59 }
 0x2cd   : > { %8578 = vst [vmem:[#allocation30_spill] sm:$0xff] %v7194_v50  ;;  %v2494_v48 = vsel %vm1065_vm1, %v2489_v56, %v2493_v35  ;;  %v5166_v56 = vld [vmem:[%s5412_s17 + $0x100] sm:$0xff] }
 0x2ce   : > { %v1668_v10 = vpop.f32.mrf.mxu2  ;;  %3012 = vmatmul.f32.gmra.mxu0 %v2895_v13  ;;  %3119 = vmatmul.f32.gmra.mxu1 %v2896_v12  ;;  %v2898_v12 = vld [vmem:[%s5412_s17 + $0x138] sm:$0xff]  ;;  %v2495_v11 = vrot.slane %v5166_v56, 2  ;;  %v2899_v56 = vld [vmem:[%s5412_s17 + $0x140] sm:$0xff] }
 0x2cf   : > { %v1775_v22 = vpop.f32.mrf.mxu3 }
 0x2d0   : > { %v1776_v18 = vadd.f32 %v1775_v22, %v1668_v10  ;;  %v5167_v10 = vld [vmem:[%s5412_s17 + $0x108] sm:$0xff]  ;;  %v2496_v59 = vsel %vm1065_vm1, %v2491_v3, %v2495_v11  ;;  %v5003_v3 = vld [vmem:[%s8467_s1 + $0x8c0] sm:$0xff] }
 0x2d1   : > { %v2497_v22 = vrot.slane %v5167_v10, 2  ;;  %v8583_v10 = vld [vmem:[#allocation37_spill] sm:$0xff]  ;;  %4136 = vmatpush.msra.mxu1 %v5003_v3 }
 0x2d2   : > { %v7208_v50 = vadd.f32 %v1776_v18, %v1484_v8  ;;  %v1445_v42 = vadd.f32 %v8584_v7, %v8583_v10 }
 0x2d3   : > { %2678 = vmatmul.f32.gmra.mxu2 %v2492_v52  ;;  %v7213_v32 = vpop.f32.mrf.mxu0  ;;  %v7215_v13 = vpop.f32.mrf.mxu1  ;;  %v1485_v52 = vadd.f32 %v1442_v15, %v6635_v57  ;;  %v2498_v53 = vsel %vm1065_vm1, %v2493_v35, %v2497_v22  ;;  %v4987_v57 = vld [vmem:[%s8467_s1 + $0x840] sm:$0xff]  ;;  %v5168_v35 = vld [vmem:[%s5412_s17 + $0x110] sm:$0xff] }
 0x2d4   : > { %2785 = vmatmul.f32.gmra.mxu3 %v2494_v48  ;;  %8581 = vst [vmem:[#allocation31_spill] sm:$0xff] %v7213_v32  ;;  %v2499_v15 = vrot.slane %v5168_v35, 2  ;;  %4029 = vmatpush.msra.mxu0 %v4987_v57  ;;  %v2901_v35 = vld [vmem:[%s5412_s17 + $0x150] sm:$0xff]  ;;  %v8588_v57 = vld [vmem:[#allocation40_spill] sm:$0xff] }
 0x2d5   : > { %8582 = vst [vmem:[#allocation32_spill] sm:$0xff] %v7215_v13 }
 0x2d6   : > { %v1671_v8 = vpop.f32.mrf.mxu2  ;;  %3015 = vmatmul.f32.gmra.mxu0 %v2897_v40  ;;  %3122 = vmatmul.f32.gmra.mxu1 %v2898_v12  ;;  %v2900_v12 = vld [vmem:[%s5412_s17 + $0x148] sm:$0xff]  ;;  %v2500_v10 = vsel %vm1065_vm1, %v2495_v11, %v2499_v15  ;;  %v4970_v11 = vld [vmem:[%s8467_s1 + $0x7b8] sm:$0xff] }
 0x2d7   : > { %v1778_v18 = vpop.f32.mrf.mxu3  ;;  %3670 = vmatpush.msra.mxu3 %v4970_v11 }
 0x2d8   : > { %v1779_v48 = vadd.f32 %v1778_v18, %v1671_v8  ;;  %v5169_v8 = vld [vmem:[%s5412_s17 + $0x118] sm:$0xff] }
 0x2d9   : > { %v2501_v18 = vrot.slane %v5169_v8, 2  ;;  %v8587_v8 = vld [vmem:[#allocation39_spill] sm:$0xff] }
 0x2da   : > { %v7229_v13 = vadd.f32 %v1779_v48, %v1485_v52  ;;  %v1448_v3 = vadd.f32 %v8588_v57, %v8587_v8 }
 0x2db   : > { %2681 = vmatmul.f32.gmra.mxu2 %v2496_v59  ;;  %v7234_v32 = vpop.f32.mrf.mxu0  ;;  %v7236_v40 = vpop.f32.mrf.mxu1  ;;  %v1486_v59 = vadd.f32 %v1445_v42, %v6652_v6  ;;  %v2502_v7 = vsel %vm1065_vm1, %v2497_v22, %v2501_v18  ;;  %v4954_v6 = vld [vmem:[%s8467_s1 + $0x738] sm:$0xff]  ;;  %v5170_v22 = vld [vmem:[%s5412_s17 + $0x120] sm:$0xff] }
 0x2dc   : > { %2788 = vmatmul.f32.gmra.mxu3 %v2498_v53  ;;  %8585 = vst [vmem:[#allocation33_spill] sm:$0xff] %v7234_v32  ;;  %v2503_v42 = vrot.slane %v5170_v22, 2  ;;  %3563 = vmatpush.msra.mxu2 %v4954_v6  ;;  %v2903_v22 = vld [vmem:[%s5412_s17 + $0x160] sm:$0xff]  ;;  %v8592_v6 = vld [vmem:[#allocation42_spill] sm:$0xff] }
 0x2dd   : > { %8586 = vst [vmem:[#allocation34_spill] sm:$0xff] %v7236_v40 }
 0x2de   : > { %v1674_v52 = vpop.f32.mrf.mxu2  ;;  %3018 = vmatmul.f32.gmra.mxu0 %v2899_v56  ;;  %3125 = vmatmul.f32.gmra.mxu1 %v2900_v12  ;;  %v2902_v12 = vld [vmem:[%s5412_s17 + $0x158] sm:$0xff]  ;;  %v2504_v8 = vsel %vm1065_vm1, %v2499_v15, %v2503_v42 }
 0x2df   : > { %v1781_v48 = vpop.f32.mrf.mxu3  ;;  %v5002_v15 = vld [vmem:[%s8467_s1 + $0x8b8] sm:$0xff] }
 0x2e0   : > { %v1782_v53 = vadd.f32 %v1781_v48, %v1674_v52  ;;  %v5171_v52 = vld [vmem:[%s5412_s17 + $0x128] sm:$0xff]  ;;  %4137 = vmatpush.msra.mxu1 %v5002_v15 }
 0x2e1   : > { %v2505_v48 = vrot.slane %v5171_v52, 2  ;;  %v8591_v52 = vld [vmem:[#allocation41_spill] sm:$0xff] }
 0x2e2   : > { %v7250_v40 = vadd.f32 %v1782_v53, %v1486_v59  ;;  %v1451_v11 = vadd.f32 %v8592_v6, %v8591_v52 }
 0x2e3   : > { %2684 = vmatmul.f32.gmra.mxu2 %v2500_v10  ;;  %v7255_v32 = vpop.f32.mrf.mxu0  ;;  %v7257_v56 = vpop.f32.mrf.mxu1  ;;  %v1487_v10 = vadd.f32 %v1448_v3, %v6669_v23  ;;  %v2506_v57 = vsel %vm1065_vm1, %v2501_v18, %v2505_v48  ;;  %v4986_v23 = vld [vmem:[%s8467_s1 + $0x838] sm:$0xff]  ;;  %v5172_v18 = vld [vmem:[%s5412_s17 + $0x130] sm:$0xff] }
 0x2e4   : > { %2791 = vmatmul.f32.gmra.mxu3 %v2502_v7  ;;  %8589 = vst [vmem:[#allocation35_spill] sm:$0xff] %v7255_v32  ;;  %v2507_v3 = vrot.slane %v5172_v18, 2  ;;  %4030 = vmatpush.msra.mxu0 %v4986_v23  ;;  %v2905_v18 = vld [vmem:[%s5412_s17 + $0x170] sm:$0xff]  ;;  %v8596_v23 = vld [vmem:[#allocation44_spill] sm:$0xff] }
 0x2e5   : > { %8590 = vst [vmem:[#allocation36_spill] sm:$0xff] %v7257_v56 }
 0x2e6   : > { %v1677_v59 = vpop.f32.mrf.mxu2  ;;  %3021 = vmatmul.f32.gmra.mxu0 %v2901_v35  ;;  %3128 = vmatmul.f32.gmra.mxu1 %v2902_v12  ;;  %v2904_v12 = vld [vmem:[%s5412_s17 + $0x168] sm:$0xff]  ;;  %v2508_v52 = vsel %vm1065_vm1, %v2503_v42, %v2507_v3  ;;  %v4969_v42 = vld [vmem:[%s8467_s1 + $0x7b0] sm:$0xff] }
 0x2e7   : > { %v1784_v53 = vpop.f32.mrf.mxu3  ;;  %3671 = vmatpush.msra.mxu3 %v4969_v42 }
 0x2e8   : > { %v1785_v7 = vadd.f32 %v1784_v53, %v1677_v59  ;;  %v5173_v59 = vld [vmem:[%s5412_s17 + $0x138] sm:$0xff] }
 0x2e9   : > { %v2509_v53 = vrot.slane %v5173_v59, 2  ;;  %v8595_v59 = vld [vmem:[#allocation43_spill] sm:$0xff] }
 0x2ea   : > { %v7271_v56 = vadd.f32 %v1785_v7, %v1487_v10  ;;  %v1454_v15 = vadd.f32 %v8596_v23, %v8595_v59 }
 0x2eb   : > { %2687 = vmatmul.f32.gmra.mxu2 %v2504_v8  ;;  %v7276_v32 = vpop.f32.mrf.mxu0  ;;  %v7278_v35 = vpop.f32.mrf.mxu1  ;;  %v1488_v8 = vadd.f32 %v1451_v11, %v6686_v14  ;;  %v2510_v6 = vsel %vm1065_vm1, %v2505_v48, %v2509_v53  ;;  %v4953_v14 = vld [vmem:[%s8467_s1 + $0x730] sm:$0xff]  ;;  %v5174_v48 = vld [vmem:[%s5412_s17 + $0x140] sm:$0xff] }
 0x2ec   : > { %2794 = vmatmul.f32.gmra.mxu3 %v2506_v57  ;;  %8593 = vst [vmem:[#allocation37_spill] sm:$0xff] %v7276_v32  ;;  %v2511_v11 = vrot.slane %v5174_v48, 2  ;;  %3564 = vmatpush.msra.mxu2 %v4953_v14  ;;  %v2907_v48 = vld [vmem:[%s5412_s17 + $0x180] sm:$0xff]  ;;  %v8601_v14 = vld [vmem:[#allocation46_spill] sm:$0xff] }
 0x2ed   : > { %8594 = vst [vmem:[#allocation38_spill] sm:$0xff] %v7278_v35 }
 0x2ee   : > { %v1680_v10 = vpop.f32.mrf.mxu2  ;;  %3024 = vmatmul.f32.gmra.mxu0 %v2903_v22  ;;  %3131 = vmatmul.f32.gmra.mxu1 %v2904_v12  ;;  %v2906_v12 = vld [vmem:[%s5412_s17 + $0x178] sm:$0xff]  ;;  %v2512_v59 = vsel %vm1065_vm1, %v2507_v3, %v2511_v11  ;;  %v5001_v3 = vld [vmem:[%s8467_s1 + $0x8b0] sm:$0xff] }
 0x2ef   : > { %v1787_v7 = vpop.f32.mrf.mxu3  ;;  %4138 = vmatpush.msra.mxu1 %v5001_v3 }
 0x2f0   : > { %v1788_v57 = vadd.f32 %v1787_v7, %v1680_v10  ;;  %v5175_v10 = vld [vmem:[%s5412_s17 + $0x148] sm:$0xff] }
 0x2f1   : > { %v2513_v7 = vrot.slane %v5175_v10, 2  ;;  %v8600_v10 = vld [vmem:[#allocation45_spill] sm:$0xff] }
 0x2f2   : > { %v7292_v35 = vadd.f32 %v1788_v57, %v1488_v8  ;;  %v1457_v42 = vadd.f32 %v8601_v14, %v8600_v10 }
 0x2f3   : > { %2690 = vmatmul.f32.gmra.mxu2 %v2508_v52  ;;  %v7297_v32 = vpop.f32.mrf.mxu0  ;;  %v7299_v22 = vpop.f32.mrf.mxu1  ;;  %v1489_v52 = vadd.f32 %v1454_v15, %v6703_v33  ;;  %v2514_v23 = vsel %vm1065_vm1, %v2509_v53, %v2513_v7  ;;  %v4985_v33 = vld [vmem:[%s8467_s1 + $0x830] sm:$0xff] }
 0x2f4   : > { %2797 = vmatmul.f32.gmra.mxu3 %v2510_v6  ;;  %8597 = vst [vmem:[#allocation39_spill] sm:$0xff] %v7297_v32  ;;  %v5176_v53 = vld [vmem:[%s5412_s17 + $0x150] sm:$0xff]  ;;  %4031 = vmatpush.msra.mxu0 %v4985_v33  ;;  %v8606_v33 = vld [vmem:[#allocation49_spill] sm:$0xff] }
 0x2f5   : > { %8598 = vst [vmem:[#allocation40_spill] sm:$0xff] %v7299_v22  ;;  %v2515_v15 = vrot.slane %v5176_v53, 2  ;;  %v2909_v53 = vld [vmem:[%s5412_s17 + $0x190] sm:$0xff] }
 0x2f6   : > { %v1683_v8 = vpop.f32.mrf.mxu2  ;;  %3027 = vmatmul.f32.gmra.mxu0 %v2905_v18  ;;  %3134 = vmatmul.f32.gmra.mxu1 %v2906_v12  ;;  %v2908_v12 = vld [vmem:[%s5412_s17 + $0x188] sm:$0xff] }
 0x2f7   : > { %v1790_v57 = vpop.f32.mrf.mxu3  ;;  %v2516_v14 = vsel %vm1065_vm1, %v2511_v11, %v2515_v15  ;;  %v4968_v11 = vld [vmem:[%s8467_s1 + $0x7a8] sm:$0xff] }
 0x2f8   : > { %v1791_v6 = vadd.f32 %v1790_v57, %v1683_v8  ;;  %v5177_v8 = vld [vmem:[%s5412_s17 + $0x158] sm:$0xff]  ;;  %3672 = vmatpush.msra.mxu3 %v4968_v11 }
 0x2f9   : > { %v2517_v57 = vrot.slane %v5177_v8, 2  ;;  %v8605_v8 = vld [vmem:[#allocation48_spill] sm:$0xff] }
 0x2fa   : > { %v7313_v22 = vadd.f32 %v1791_v6, %v1489_v52  ;;  %v1460_v3 = vadd.f32 %v8606_v33, %v8605_v8 }
 0x2fb   : > { %2693 = vmatmul.f32.gmra.mxu2 %v2512_v59  ;;  %v7318_v32 = vpop.f32.mrf.mxu0  ;;  %v7320_v18 = vpop.f32.mrf.mxu1  ;;  %v8604_v59 = vld [vmem:[#allocation47_spill] sm:$0xff] }
 0x2fc   : > { %8599 = vst [vmem:[#allocation41_spill] sm:$0xff] %v7313_v22  ;;  %2800 = vmatmul.f32.gmra.mxu3 %v2514_v23  ;;  %v1490_v23 = vadd.f32 %v1457_v42, %v8604_v59  ;;  %v4952_v42 = vld [vmem:[%s8467_s1 + $0x728] sm:$0xff] }
 0x2fd   : > { %8602 = vst [vmem:[#allocation42_spill] sm:$0xff] %v7318_v32  ;;  %3565 = vmatpush.msra.mxu2 %v4952_v42  ;;  %v8610_v42 = vld [vmem:[#allocation50_spill] sm:$0xff] }
 0x2fe   : > { %8603 = vst [vmem:[#allocation43_spill] sm:$0xff] %v7320_v18  ;;  %v1686_v52 = vpop.f32.mrf.mxu2  ;;  %3030 = vmatmul.f32.gmra.mxu0 %v2907_v48  ;;  %3137 = vmatmul.f32.gmra.mxu1 %v2908_v12  ;;  %v2518_v18 = vsel %vm1065_vm1, %v2513_v7, %v2517_v57  ;;  %v2910_v12 = vld [vmem:[%s5412_s17 + $0x198] sm:$0xff]  ;;  %v5178_v7 = vld [vmem:[%s5412_s17 + $0x160] sm:$0xff] }
 0x2ff   : > { %v1793_v6 = vpop.f32.mrf.mxu3 }
 0x300   : > { %v1794_v10 = vadd.f32 %v1793_v6, %v1686_v52  ;;  %v2519_v52 = vrot.slane %v5178_v7, 2  ;;  %v5179_v6 = vld [vmem:[%s5412_s17 + $0x168] sm:$0xff]  ;;  %v2911_v7 = vld [vmem:[%s5412_s17 + $0x1a0] sm:$0xff] }
 0x301   : > { %v2521_v59 = vrot.slane %v5179_v6, 2  ;;  %v8609_v6 = vld [vmem:[#allocation5_spill] sm:$0xff] }
 0x302   : > { %v7334_v32 = vadd.f32 %v1794_v10, %v1490_v23  ;;  %v1491_v10 = vadd.f32 %v1460_v3, %v6737_v61  ;;  %v2520_v8 = vsel %vm1065_vm1, %v2515_v15, %v2519_v52  ;;  %v2293_v11 = vadd.f32 %v8610_v42, %v8609_v6  ;;  %v4984_v61 = vld [vmem:[%s8467_s1 + $0x828] sm:$0xff] }
 0x303   : > { %2696 = vmatmul.f32.gmra.mxu2 %v2516_v14  ;;  %v7339_v22 = vpop.f32.mrf.mxu0  ;;  %v7341_v48 = vpop.f32.mrf.mxu1  ;;  %v2522_v33 = vsel %vm1065_vm1, %v2517_v57, %v2521_v59  ;;  %v5000_v15 = vld [vmem:[%s8467_s1 + $0x8a8] sm:$0xff]  ;;  %v5180_v57 = vld [vmem:[%s5412_s17 + $0x170] sm:$0xff]  ;;  %4032 = vmatpush.msra.mxu0 %v4984_v61 }
 0x304   : > { %2803 = vmatmul.f32.gmra.mxu3 %v2518_v18  ;;  %8607 = vst [vmem:[#allocation44_spill] sm:$0xff] %v7339_v22  ;;  %v2523_v3 = vrot.slane %v5180_v57, 2  ;;  %4139 = vmatpush.msra.mxu1 %v5000_v15  ;;  %v2913_v57 = vld [vmem:[%s5412_s17 + $0x1b0] sm:$0xff] }
 0x305   : > { %8608 = vst [vmem:[#allocation45_spill] sm:$0xff] %v7341_v48  ;;  %v8612_v61 = vld [vmem:[#allocation6_spill] sm:$0xff] }
 0x306   : > { %v1689_v18 = vpop.f32.mrf.mxu2  ;;  %3033 = vmatmul.f32.gmra.mxu0 %v2909_v53  ;;  %3140 = vmatmul.f32.gmra.mxu1 %v2910_v12  ;;  %v2912_v12 = vld [vmem:[%s5412_s17 + $0x1a8] sm:$0xff]  ;;  %v2524_v6 = vsel %vm1065_vm1, %v2519_v52, %v2523_v3  ;;  %v2296_v15 = vadd.f32 %v8612_v61, %v6760_v47  ;;  %v4967_v52 = vld [vmem:[%s8467_s1 + $0x7a0] sm:$0xff] }
 0x307   : > { %v1796_v23 = vpop.f32.mrf.mxu3  ;;  %3673 = vmatpush.msra.mxu3 %v4967_v52 }
 0x308   : > { %v1797_v14 = vadd.f32 %v1796_v23, %v1689_v18  ;;  %v5181_v18 = vld [vmem:[%s5412_s17 + $0x178] sm:$0xff] }
 0x309   : > { %v2525_v23 = vrot.slane %v5181_v18, 2 }
 0x30a   : > { %v7355_v48 = vadd.f32 %v1797_v14, %v1491_v10 }
 0x30b   : > { %2699 = vmatmul.f32.gmra.mxu2 %v2520_v8  ;;  %v7360_v22 = vpop.f32.mrf.mxu0  ;;  %v7362_v53 = vpop.f32.mrf.mxu1  ;;  %v2382_v8 = vadd.f32 %v2293_v11, %v6756_v5  ;;  %v2526_v42 = vsel %vm1065_vm1, %v2521_v59, %v2525_v23  ;;  %v4951_v5 = vld [vmem:[%s8467_s1 + $0x720] sm:$0xff] }
 0x30c   : > { %2806 = vmatmul.f32.gmra.mxu3 %v2522_v33  ;;  %8611 = vst [vmem:[#allocation46_spill] sm:$0xff] %v7362_v53  ;;  %v5182_v59 = vld [vmem:[%s5412_s17 + $0x180] sm:$0xff]  ;;  %3566 = vmatpush.msra.mxu2 %v4951_v5  ;;  %v2299_v5 = vadd.f32 %v6781_v9, %v6779_v58 }
 0x30d   : > { %v2527_v11 = vrot.slane %v5182_v59, 2  ;;  %v2915_v59 = vld [vmem:[%s5412_s17 + $0x1c0] sm:$0xff] }
 0x30e   : > { %v2652_v10 = vpop.f32.mrf.mxu2  ;;  %3036 = vmatmul.f32.gmra.mxu0 %v2911_v7  ;;  %3143 = vmatmul.f32.gmra.mxu1 %v2912_v12  ;;  %v2914_v12 = vld [vmem:[%s5412_s17 + $0x1b8] sm:$0xff] }
 0x30f   : > { %v2759_v14 = vpop.f32.mrf.mxu3 }
 0x310   : > { %v2760_v33 = vadd.f32 %v2759_v14, %v2652_v10  ;;  %v5183_v10 = vld [vmem:[%s5412_s17 + $0x188] sm:$0xff] }
 0x311   : > { %v2529_v47 = vrot.slane %v5183_v10, 2  ;;  %v5185_v10 = vld [vmem:[%s5412_s17 + $0x198] sm:$0xff] }
 0x312   : > { %v7376_v53 = vadd.f32 %v2760_v33, %v2382_v8  ;;  %v2383_v33 = vadd.f32 %v2296_v15, %v6775_v29  ;;  %v4983_v29 = vld [vmem:[%s8467_s1 + $0x820] sm:$0xff] }
 0x313   : > { %2702 = vmatmul.f32.gmra.mxu2 %v2524_v6  ;;  %v7381_v18 = vpop.f32.mrf.mxu0  ;;  %v7383_v7 = vpop.f32.mrf.mxu1  ;;  %v2530_v61 = vsel %vm1065_vm1, %v2525_v23, %v2529_v47  ;;  %v5184_v23 = vld [vmem:[%s5412_s17 + $0x190] sm:$0xff]  ;;  %4033 = vmatpush.msra.mxu0 %v4983_v29  ;;  %v4950_v29 = vld [vmem:[%s8467_s1 + $0x718] sm:$0xff] }
 0x314   : > { %2809 = vmatmul.f32.gmra.mxu3 %v2526_v42  ;;  %8613 = vst [vmem:[#allocation47_spill] sm:$0xff] %v7383_v7  ;;  %v2528_v42 = vsel %vm1065_vm1, %v2523_v3, %v2527_v11  ;;  %v4999_v3 = vld [vmem:[%s8467_s1 + $0x8a0] sm:$0xff]  ;;  %v2531_v15 = vrot.slane %v5184_v23, 2  ;;  %3567 = vmatpush.msra.mxu2 %v4950_v29 }
 0x315   : > { %4140 = vmatpush.msra.mxu1 %v4999_v3  ;;  %v5186_v3 = vld [vmem:[%s5412_s17 + $0x1a0] sm:$0xff] }
 0x316   : > { %v2655_v14 = vpop.f32.mrf.mxu2  ;;  %3039 = vmatmul.f32.gmra.mxu0 %v2913_v57  ;;  %3146 = vmatmul.f32.gmra.mxu1 %v2914_v12  ;;  %v2916_v12 = vld [vmem:[%s5412_s17 + $0x1c8] sm:$0xff]  ;;  %v2535_v23 = vrot.slane %v5186_v3, 2 }
 0x317   : > { %v2762_v8 = vpop.f32.mrf.mxu3  ;;  %v2920_v3 = vld [vmem:[%s5412_s17 + $0x1e8] sm:$0xff] }
 0x318   : > { %v2763_v6 = vadd.f32 %v2762_v8, %v2655_v14  ;;  %v2533_v14 = vrot.slane %v5185_v10, 2  ;;  %v2384_v8 = vadd.f32 %v2299_v5, %v6794_v38  ;;  %v2302_v38 = vadd.f32 %v6806_v44, %v6804_v45  ;;  %v2917_v5 = vld [vmem:[%s5412_s17 + $0x1d0] sm:$0xff]  ;;  %v5187_v10 = vld [vmem:[%s5412_s17 + $0x1a8] sm:$0xff] }
 0x31a   : > { %v7397_v7 = vadd.f32 %v2763_v6, %v2383_v33  ;;  %v2532_v6 = vsel %vm1065_vm1, %v2527_v11, %v2531_v15 }
 0x31b   : > { %2705 = vmatmul.f32.gmra.mxu2 %v2528_v42  ;;  %v7402_v52 = vpop.f32.mrf.mxu0  ;;  %v7404_v57 = vpop.f32.mrf.mxu1  ;;  %v2534_v42 = vsel %vm1065_vm1, %v2529_v47, %v2533_v14 }
 0x31c   : > { %2812 = vmatmul.f32.gmra.mxu3 %v2530_v61 }
 0x31e   : > { %v2658_v58 = vpop.f32.mrf.mxu2  ;;  %3042 = vmatmul.f32.gmra.mxu0 %v2915_v59  ;;  %3149 = vmatmul.f32.gmra.mxu1 %v2916_v12  ;;  %v4966_v59 = vld [vmem:[%s8467_s1 + $0x798] sm:$0xff] }
 0x31f   : > { %v2765_v9 = vpop.f32.mrf.mxu3  ;;  %3674 = vmatpush.msra.mxu3 %v4966_v59  ;;  %v2918_v12 = vld [vmem:[%s5412_s17 + $0x1d8] sm:$0xff] }
 0x320   : > { %v2766_v33 = vadd.f32 %v2765_v9, %v2658_v58  ;;  %v2537_v58 = vrot.slane %v5187_v10, 2  ;;  %v4982_v59 = vld [vmem:[%s8467_s1 + $0x818] sm:$0xff]  ;;  %v5188_v10 = vld [vmem:[%s5412_s17 + $0x1b0] sm:$0xff] }
 0x321   : > { %4034 = vmatpush.msra.mxu0 %v4982_v59  ;;  %v8615_v59 = vld [vmem:[#allocation8_spill] sm:$0xff] }
 0x322   : > { %v7418_v61 = vadd.f32 %v2766_v33, %v2384_v8  ;;  %v8614_v33 = vld [vmem:[#allocation7_spill] sm:$0xff] }
 0x323   : > { %2708 = vmatmul.f32.gmra.mxu2 %v2532_v6  ;;  %v7428_v11 = vpop.f32.mrf.mxu0  ;;  %v7430_v47 = vpop.f32.mrf.mxu1  ;;  %v2385_v45 = vadd.f32 %v2302_v38, %v8614_v33  ;;  %v2536_v6 = vsel %vm1065_vm1, %v2531_v15, %v2535_v23  ;;  %v2305_v38 = vadd.f32 %v6825_v49, %v6823_v17 }
 0x324   : > { %2815 = vmatmul.f32.gmra.mxu3 %v2534_v42  ;;  %v2538_v42 = vsel %vm1065_vm1, %v2533_v14, %v2537_v58 }
 0x325   : > { %v2386_v17 = vadd.f32 %v2305_v38, %v8615_v59  ;;  %v2308_v38 = vadd.f32 %v6844_v0, %v6842_v36  ;;  %v5191_v59 = vld [vmem:[%s5412_s17 + $0x1c8] sm:$0xff] }
 0x326   : > { %v2661_v9 = vpop.f32.mrf.mxu2  ;;  %3045 = vmatmul.f32.gmra.mxu0 %v2917_v5  ;;  %3152 = vmatmul.f32.gmra.mxu1 %v2918_v12  ;;  %v4998_v5 = vld [vmem:[%s8467_s1 + $0x898] sm:$0xff]  ;;  %v2919_v12 = vld [vmem:[%s5412_s17 + $0x1e0] sm:$0xff] }
 0x327   : > { %v2768_v8 = vpop.f32.mrf.mxu3  ;;  %4141 = vmatpush.msra.mxu1 %v4998_v5 }
 0x328   : > { %v2769_v44 = vadd.f32 %v2768_v8, %v2661_v9  ;;  %v2539_v9 = vrot.slane %v5188_v10, 2  ;;  %v5189_v8 = vld [vmem:[%s5412_s17 + $0x1b8] sm:$0xff]  ;;  %v4949_v10 = vld [vmem:[%s8467_s1 + $0x710] sm:$0xff] }
 0x329   : > { %v2541_v33 = vrot.slane %v5189_v8, 2  ;;  %3568 = vmatpush.msra.mxu2 %v4949_v10  ;;  %v2922_v8 = vld [vmem:[%s5412_s17 + $0x1f8] sm:$0xff]  ;;  %v8618_v10 = vld [vmem:[#allocation9_spill] sm:$0xff] }
 0x32a   : > { %v7439_v29 = vadd.f32 %v2769_v44, %v2385_v45  ;;  %v2387_v36 = vadd.f32 %v2308_v38, %v8618_v10  ;;  %v8621_v38 = vld [vmem:[#allocation11_spill] sm:$0xff]  ;;  %v4948_v10 = vld [vmem:[%s8467_s1 + $0x708] sm:$0xff] }
 0x32b   : > { %2711 = vmatmul.f32.gmra.mxu2 %v2536_v6  ;;  %v7449_v15 = vpop.f32.mrf.mxu0  ;;  %v7451_v14 = vpop.f32.mrf.mxu1  ;;  %v2540_v6 = vsel %vm1065_vm1, %v2535_v23, %v2539_v9 }
 0x32c   : > { %2818 = vmatmul.f32.gmra.mxu3 %v2538_v42  ;;  %v2542_v42 = vsel %vm1065_vm1, %v2537_v58, %v2541_v33  ;;  %3569 = vmatpush.msra.mxu2 %v4948_v10  ;;  %v8624_v10 = vld [vmem:[#allocation12_spill] sm:$0xff] }
 0x32e   : > { %v2664_v45 = vpop.f32.mrf.mxu2  ;;  %3048 = vmatmul.f32.gmra.mxu0 %v2919_v12  ;;  %3155 = vmatmul.f32.gmra.mxu1 %v2920_v3  ;;  %v4965_v12 = vld [vmem:[%s8467_s1 + $0x790] sm:$0xff] }
 0x32f   : > { %v2771_v44 = vpop.f32.mrf.mxu3  ;;  %3675 = vmatpush.msra.mxu3 %v4965_v12  ;;  %v2921_v3 = vld [vmem:[%s5412_s17 + $0x1f0] sm:$0xff] }
 0x330   : > { %v2772_v49 = vadd.f32 %v2771_v44, %v2664_v45  ;;  %v5190_v45 = vld [vmem:[%s5412_s17 + $0x1c0] sm:$0xff] }
 0x331   : > { %v2543_v44 = vrot.slane %v5190_v45, 2  ;;  %v4981_v45 = vld [vmem:[%s8467_s1 + $0x810] sm:$0xff] }
 0x332   : > { %v7460_v5 = vadd.f32 %v2772_v49, %v2386_v17  ;;  %v2545_v17 = vrot.slane %v5191_v59, 2  ;;  %4035 = vmatpush.msra.mxu0 %v4981_v45 }
 0x333   : > { %2714 = vmatmul.f32.gmra.mxu2 %v2540_v6  ;;  %v7470_v23 = vpop.f32.mrf.mxu0  ;;  %v7472_v58 = vpop.f32.mrf.mxu1  ;;  %v2544_v6 = vsel %vm1065_vm1, %v2539_v9, %v2543_v44 }
 0x334   : > { %8616 = vst [vmem:[#allocation48_spill] sm:$0xff] %v7460_v5  ;;  %2821 = vmatmul.f32.gmra.mxu3 %v2542_v42  ;;  %v2546_v42 = vsel %vm1065_vm1, %v2541_v33, %v2545_v17 }
 0x335   : > { %8617 = vst [vmem:[#allocation49_spill] sm:$0xff] %v7472_v58 }
 0x336   : > { %v2667_v49 = vpop.f32.mrf.mxu2  ;;  %3051 = vmatmul.f32.gmra.mxu0 %v2921_v3  ;;  %3158 = vmatmul.f32.gmra.mxu1 %v2922_v8  ;;  %v4997_v3 = vld [vmem:[%s8467_s1 + $0x890] sm:$0xff]  ;;  %v2923_v8 = vld [vmem:[%s5412_s17 + $0x200] sm:$0xff] }
 0x337   : > { %v2774_v5 = vpop.f32.mrf.mxu3  ;;  %4142 = vmatpush.msra.mxu1 %v4997_v3  ;;  %v5193_v3 = vld [vmem:[%s5412_s17 + $0x1d8] sm:$0xff] }
 0x338   : > { %v2775_v0 = vadd.f32 %v2774_v5, %v2667_v49  ;;  %v8620_v5 = vld [vmem:[#allocation10_spill] sm:$0xff] }
 0x339   : > { %v2311_v9 = vadd.f32 %v8621_v38, %v8620_v5  ;;  %v2924_v49 = vld [vmem:[%s5412_s17 + $0x208] sm:$0xff]  ;;  %v2549_v5 = vrot.slane %v5193_v3, 2 }
 0x33a   : > { %v7481_v12 = vadd.f32 %v2775_v0, %v2387_v36  ;;  %v4964_v36 = vld [vmem:[%s8467_s1 + $0x788] sm:$0xff]  ;;  %v5192_v0 = vld [vmem:[%s5412_s17 + $0x1d0] sm:$0xff] }
 0x33b   : > { %2717 = vmatmul.f32.gmra.mxu2 %v2544_v6  ;;  %v7492_v33 = vpop.f32.mrf.mxu0  ;;  %v7494_v59 = vpop.f32.mrf.mxu1  ;;  %v2547_v45 = vrot.slane %v5192_v0, 2  ;;  %3676 = vmatpush.msra.mxu3 %v4964_v36  ;;  %v2388_v38 = vadd.f32 %v2311_v9, %v6876_v46  ;;  %v2925_v0 = vld [vmem:[%s5412_s17 + $0x210] sm:$0xff]  ;;  %v2314_v36 = vadd.f32 %v8624_v10, %v6880_v60  ;;  %v4980_v46 = vld [vmem:[%s8467_s1 + $0x808] sm:$0xff] }
 0x33c   : > { %8619 = vst [vmem:[#allocation5_spill] sm:$0xff] %v7481_v12  ;;  %2824 = vmatmul.f32.gmra.mxu3 %v2546_v42  ;;  %v2550_v12 = vsel %vm1065_vm1, %v2545_v17, %v2549_v5  ;;  %v5194_v17 = vld [vmem:[%s5412_s17 + $0x1e0] sm:$0xff]  ;;  %4036 = vmatpush.msra.mxu0 %v4980_v46 }
 0x33d   : > { %8622 = vst [vmem:[#allocation50_spill] sm:$0xff] %v7492_v33  ;;  %v2548_v33 = vsel %vm1065_vm1, %v2543_v44, %v2547_v45  ;;  %v4996_v44 = vld [vmem:[%s8467_s1 + $0x888] sm:$0xff]  ;;  %v2551_v9 = vrot.slane %v5194_v17, 2  ;;  %v2927_v17 = vld [vmem:[%s5412_s17 + $0x220] sm:$0xff] }
 0x33e   : > { %8623 = vst [vmem:[#allocation6_spill] sm:$0xff] %v7494_v59  ;;  %v2670_v6 = vpop.f32.mrf.mxu2  ;;  %3054 = vmatmul.f32.gmra.mxu0 %v2923_v8  ;;  %3161 = vmatmul.f32.gmra.mxu1 %v2924_v49  ;;  %v2926_v49 = vld [vmem:[%s5412_s17 + $0x218] sm:$0xff]  ;;  %v8626_v46 = vld [vmem:[#allocation13_spill] sm:$0xff] }
 0x33f   : > { %v2777_v42 = vpop.f32.mrf.mxu3  ;;  %4143 = vmatpush.msra.mxu1 %v4996_v44  ;;  %v2317_v44 = vadd.f32 %v8626_v46, %v6899_v43 }
 0x340   : > { %v2778_v59 = vadd.f32 %v2777_v42, %v2670_v6  ;;  %v2389_v6 = vadd.f32 %v2314_v36, %v6895_v19  ;;  %v4947_v19 = vld [vmem:[%s8467_s1 + $0x700] sm:$0xff] }
 0x341   : > { %3570 = vmatpush.msra.mxu2 %v4947_v19  ;;  %v8628_v19 = vld [vmem:[#allocation14_spill] sm:$0xff] }
 0x342   : > { %v7508_v58 = vadd.f32 %v2778_v59, %v2388_v38  ;;  %v5195_v59 = vld [vmem:[%s5412_s17 + $0x1e8] sm:$0xff]  ;;  %v2552_v38 = vsel %vm1065_vm1, %v2547_v45, %v2551_v9  ;;  %v4963_v45 = vld [vmem:[%s8467_s1 + $0x780] sm:$0xff] }
 0x343   : > { %2720 = vmatmul.f32.gmra.mxu2 %v2548_v33  ;;  %v7513_v3 = vpop.f32.mrf.mxu0  ;;  %v7515_v8 = vpop.f32.mrf.mxu1  ;;  %v2553_v60 = vrot.slane %v5195_v59, 2  ;;  %3677 = vmatpush.msra.mxu3 %v4963_v45  ;;  %v2320_v45 = vadd.f32 %v8628_v19, %v6918_v26 }
 0x344   : > { %2827 = vmatmul.f32.gmra.mxu3 %v2550_v12  ;;  %8625 = vst [vmem:[#allocation7_spill] sm:$0xff] %v7515_v8 }
 0x345   : > { %v2554_v10 = vsel %vm1065_vm1, %v2549_v5, %v2553_v60  ;;  %v5196_v5 = vld [vmem:[%s5412_s17 + $0x1f0] sm:$0xff] }
 0x346   : > { %v2673_v12 = vpop.f32.mrf.mxu2  ;;  %3057 = vmatmul.f32.gmra.mxu0 %v2925_v0  ;;  %3164 = vmatmul.f32.gmra.mxu1 %v2926_v49  ;;  %v2928_v49 = vld [vmem:[%s5412_s17 + $0x228] sm:$0xff]  ;;  %v2555_v36 = vrot.slane %v5196_v5, 2  ;;  %v2929_v5 = vld [vmem:[%s5412_s17 + $0x230] sm:$0xff] }
 0x347   : > { %v2780_v33 = vpop.f32.mrf.mxu3 }
 0x348   : > { %v2781_v42 = vadd.f32 %v2780_v33, %v2673_v12  ;;  %v5197_v12 = vld [vmem:[%s5412_s17 + $0x1f8] sm:$0xff] }
 0x349   : > { %v2557_v43 = vrot.slane %v5197_v12, 2 }
 0x34a   : > { %v7529_v8 = vadd.f32 %v2781_v42, %v2389_v6  ;;  %v2390_v42 = vadd.f32 %v2317_v44, %v6914_v16  ;;  %v4979_v16 = vld [vmem:[%s8467_s1 + $0x800] sm:$0xff] }
 0x34b   : > { %2723 = vmatmul.f32.gmra.mxu2 %v2552_v38  ;;  %v7534_v59 = vpop.f32.mrf.mxu0  ;;  %v7536_v0 = vpop.f32.mrf.mxu1  ;;  %v2558_v46 = vsel %vm1065_vm1, %v2553_v60, %v2557_v43  ;;  %v5198_v60 = vld [vmem:[%s5412_s17 + $0x200] sm:$0xff]  ;;  %4037 = vmatpush.msra.mxu0 %v4979_v16  ;;  %v2323_v16 = vadd.f32 %v6939_v30, %v6937_v20  ;;  %v8633_v20 = vld [vmem:[#allocation15_spill] sm:$0xff] }
 0x34c   : > { %2830 = vmatmul.f32.gmra.mxu3 %v2554_v10  ;;  %8627 = vst [vmem:[#allocation8_spill] sm:$0xff] %v7536_v0  ;;  %v2556_v10 = vsel %vm1065_vm1, %v2551_v9, %v2555_v36  ;;  %v4995_v9 = vld [vmem:[%s8467_s1 + $0x880] sm:$0xff]  ;;  %v2559_v44 = vrot.slane %v5198_v60, 2 }
 0x34d   : > { %4144 = vmatpush.msra.mxu1 %v4995_v9  ;;  %v2392_v30 = vadd.f32 %v2323_v16, %v8633_v20  ;;  %v2934_v16 = vld [vmem:[%s5412_s17 + $0x258] sm:$0xff] }
 0x34e   : > { %v2676_v33 = vpop.f32.mrf.mxu2  ;;  %3060 = vmatmul.f32.gmra.mxu0 %v2927_v17  ;;  %3167 = vmatmul.f32.gmra.mxu1 %v2928_v49  ;;  %v2930_v49 = vld [vmem:[%s5412_s17 + $0x238] sm:$0xff] }
 0x34f   : > { %v2783_v6 = vpop.f32.mrf.mxu3 }
 0x350   : > { %v2784_v38 = vadd.f32 %v2783_v6, %v2676_v33  ;;  %v5199_v33 = vld [vmem:[%s5412_s17 + $0x208] sm:$0xff] }
 0x351   : > { %v2561_v6 = vrot.slane %v5199_v33, 2 }
 0x352   : > { %v7550_v0 = vadd.f32 %v2784_v38, %v2390_v42  ;;  %v2391_v38 = vadd.f32 %v2320_v45, %v6933_v34  ;;  %v5201_v45 = vld [vmem:[%s5412_s17 + $0x218] sm:$0xff] }
 0x353   : > { %2726 = vmatmul.f32.gmra.mxu2 %v2556_v10  ;;  %v7555_v12 = vpop.f32.mrf.mxu0  ;;  %v7557_v17 = vpop.f32.mrf.mxu1  ;;  %v2562_v19 = vsel %vm1065_vm1, %v2557_v43, %v2561_v6 }
 0x354   : > { %2833 = vmatmul.f32.gmra.mxu3 %v2558_v46  ;;  %8629 = vst [vmem:[#allocation9_spill] sm:$0xff] %v7557_v17  ;;  %v2560_v46 = vsel %vm1065_vm1, %v2555_v36, %v2559_v44  ;;  %v5200_v17 = vld [vmem:[%s5412_s17 + $0x210] sm:$0xff]  ;;  %v2565_v36 = vrot.slane %v5201_v45, 2 }
 0x355   : > { %v2563_v34 = vrot.slane %v5200_v17, 2  ;;  %v8635_v17 = vld [vmem:[#allocation51_spill] sm:$0xff] }
 0x356   : > { %v2679_v26 = vpop.f32.mrf.mxu2  ;;  %3063 = vmatmul.f32.gmra.mxu0 %v2929_v5  ;;  %3170 = vmatmul.f32.gmra.mxu1 %v2930_v49  ;;  %v2931_v5 = vld [vmem:[%s5412_s17 + $0x240] sm:$0xff]  ;;  %v2932_v49 = vld [vmem:[%s5412_s17 + $0x248] sm:$0xff] }
 0x357   : > { %v2786_v42 = vpop.f32.mrf.mxu3 }
 0x358   : > { %v2787_v10 = vadd.f32 %v2786_v42, %v2679_v26 }
 0x35a   : > { %v7571_v60 = vadd.f32 %v2787_v10, %v2391_v38  ;;  %v2564_v38 = vsel %vm1065_vm1, %v2559_v44, %v2563_v34  ;;  %v2566_v10 = vsel %vm1065_vm1, %v2561_v6, %v2565_v36  ;;  %v5203_v44 = vld [vmem:[%s5412_s17 + $0x228] sm:$0xff] }
 0x35b   : > { %2729 = vmatmul.f32.gmra.mxu2 %v2560_v46  ;;  %v7575_v9 = vpop.f32.mrf.mxu0  ;;  %v7577_v33 = vpop.f32.mrf.mxu1 }
 0x35c   : > { %8630 = vst [vmem:[#allocation10_spill] sm:$0xff] %v7571_v60  ;;  %2836 = vmatmul.f32.gmra.mxu3 %v2562_v19  ;;  %v8636_v19 = vld [vmem:[#allocation52_spill] sm:$0xff] }
 0x35d   : > { %8631 = vst [vmem:[#allocation11_spill] sm:$0xff] %v7575_v9 }
 0x35e   : > { %8632 = vst [vmem:[#allocation12_spill] sm:$0xff] %v7577_v33  ;;  %v2682_v43 = vpop.f32.mrf.mxu2  ;;  %3066 = vmatmul.f32.gmra.mxu0 %v2931_v5  ;;  %3173 = vmatmul.f32.gmra.mxu1 %v2932_v49  ;;  %v2326_v33 = vadd.f32 %v8636_v19, %v8635_v17  ;;  %v2933_v5 = vld [vmem:[%s5412_s17 + $0x250] sm:$0xff]  ;;  %v5202_v49 = vld [vmem:[%s5412_s17 + $0x220] sm:$0xff] }
 0x35f   : > { %v2789_v26 = vpop.f32.mrf.mxu3 }
 0x360   : > { %v2790_v42 = vadd.f32 %v2789_v26, %v2682_v43  ;;  %v2567_v43 = vrot.slane %v5202_v49, 2  ;;  %v2569_v26 = vrot.slane %v5203_v44, 2  ;;  %v8641_v49 = vld [vmem:[#allocation16_spill] sm:$0xff] }
 0x362   : > { %v7586_v46 = vadd.f32 %v2790_v42, %v2392_v30  ;;  %v8639_v30 = vld [vmem:[#allocation53_spill] sm:$0xff]  ;;  %v2570_v17 = vsel %vm1065_vm1, %v2565_v36, %v2569_v26 }
 0x363   : > { %2732 = vmatmul.f32.gmra.mxu2 %v2564_v38  ;;  %v7590_v45 = vpop.f32.mrf.mxu0  ;;  %v7592_v9 = vpop.f32.mrf.mxu1  ;;  %v2393_v42 = vadd.f32 %v2326_v33, %v8639_v30  ;;  %v2935_v33 = vld [vmem:[%s5412_s17 + $0x260] sm:$0xff] }
 0x364   : > { %8634 = vst [vmem:[#allocation13_spill] sm:$0xff] %v7586_v46  ;;  %2839 = vmatmul.f32.gmra.mxu3 %v2566_v10  ;;  %v2568_v10 = vsel %vm1065_vm1, %v2563_v34, %v2567_v43  ;;  %v8642_v46 = vld [vmem:[#allocation17_spill] sm:$0xff] }
 0x365   : > { %8637 = vst [vmem:[#allocation14_spill] sm:$0xff] %v7590_v45  ;;  %v2415_v45 = vld [vmem:[%s5412_s17 + $0x238] sm:$0x3]  ;;  %v2329_v44 = vadd.f32 %v8642_v46, %v8641_v49  ;;  %v2936_v34 = vld [vmem:[%s5412_s17 + $0x268] sm:$0xff] }
 0x366   : > { %8638 = vst [vmem:[#allocation15_spill] sm:$0xff] %v7592_v9  ;;  %v2685_v6 = vpop.f32.mrf.mxu2  ;;  %3069 = vmatmul.f32.gmra.mxu0 %v2933_v5  ;;  %3176 = vmatmul.f32.gmra.mxu1 %v2934_v16  ;;  %v2414_v9 = vld [vmem:[%s5412_s17 + $0x230] sm:$0x3]  ;;  %v2573_v16 = vrot.slane %v2415_v45, 2  ;;  %v3217_v45 = vld [vmem:[%s5412_s17 + $0xa8] sm:$0xfe] }
 0x367   : > { %v2792_v20 = vpop.f32.mrf.mxu3  ;;  %v2571_v36 = vrot.slane %v2414_v9, 2  ;;  %v2394_v46 = vadd.f32 %v2329_v44, %v6990_v39  ;;  %v3218_v9 = vld [vmem:[%s5412_s17 + $0xb0] sm:$0xff]  ;;  %v3219_v49 = vld [vmem:[%s5412_s17 + $0xb8] sm:$0xff] }
 0x368   : > { %v2793_v38 = vadd.f32 %v2792_v20, %v2685_v6  ;;  %v2937_v44 = vld [vmem:[%s5412_s17 + $0x270] sm:$0xff] }
 0x36a   : > { %v7601_v19 = vadd.f32 %v2793_v38, %v2393_v42  ;;  %v2572_v42 = vsel %vm1065_vm1, %v2567_v43, %v2571_v36  ;;  %v2574_v38 = vsel %vm1065_vm1, %v2569_v26, %v2573_v16  ;;  %v2938_v43 = vld [vmem:[%s5412_s17 + $0x278] sm:$0xff]  ;;  %v3799_v36 = vld [vmem:[%s5412_s17 + $0xa0] sm:$0xfc]  ;;  %v3374_v16 = vrot.slane %v3218_v9, 1 }
 0x36b   : > { %2735 = vmatmul.f32.gmra.mxu2 %v2568_v10  ;;  %v7607_v60 = vpop.f32.mrf.mxu0  ;;  %v7609_v5 = vpop.f32.mrf.mxu1  ;;  %v3216_v10 = vld [vmem:[%s5412_s17 + $0xa0] sm:$0xfe] }
 0x36c   : > { %8640 = vst [vmem:[#allocation51_spill] sm:$0xff] %v7601_v19  ;;  %2842 = vmatmul.f32.gmra.mxu3 %v2570_v17  ;;  %v3373_v26 = vrot.slane %v3216_v10, 1  ;;  %v3221_v19 = vld [vmem:[%s5412_s17 + $0xc8] sm:$0xff] }
 0x36d   : > { %8643 = vst [vmem:[#allocation52_spill] sm:$0xff] %v7607_v60  ;;  %v3220_v60 = vld [vmem:[%s5412_s17 + $0xc0] sm:$0xff] }
 0x36e   : > { %8644 = vst [vmem:[#allocation53_spill] sm:$0xff] %v7609_v5  ;;  %v2688_v6 = vpop.f32.mrf.mxu2  ;;  %3072 = vmatmul.f32.gmra.mxu0 %v2935_v33  ;;  %3179 = vmatmul.f32.gmra.mxu1 %v2936_v34  ;;  %v2332_v33 = vadd.f32 %v6998_v55, %v6996_v31  ;;  %v3840_v55 = vrot.slane %v3799_v36, 2  ;;  %v3375_v5 = vsel %vm413_vm0, %v3373_v26, %v3374_v16 }
 0x36f   : > { %v2795_v20 = vpop.f32.mrf.mxu3 }
 0x370   : > { %v2796_v30 = vadd.f32 %v2795_v20, %v2688_v6  ;;  %v3376_v6 = vrot.slane %v3217_v45, 1  ;;  %v3377_v20 = vrot.slane %v3219_v49, 1 }
 0x372   : > { %v7617_v17 = vadd.f32 %v2796_v30, %v2394_v46  ;;  %v3800_v46 = vld [vmem:[%s5412_s17 + $0xa8] sm:$0xfc]  ;;  %v2395_v30 = vadd.f32 %v2332_v33, %v7013_v2  ;;  %v3378_v10 = vsel %vm413_vm0, %v3376_v6, %v3377_v20  ;;  %v2335_v2 = vadd.f32 %v7020_v25, %v7018_v27 }
 0x373   : > { %2738 = vmatmul.f32.gmra.mxu2 %v2572_v42  ;;  %v7624_v34 = vpop.f32.mrf.mxu0  ;;  %v7626_v39 = vpop.f32.mrf.mxu1  ;;  %v3848_v6 = vrot.slane %v3221_v19, 2 }
 0x374   : > { %8645 = vst [vmem:[#allocation16_spill] sm:$0xff] %v7617_v17  ;;  %2845 = vmatmul.f32.gmra.mxu3 %v2574_v38  ;;  %v3841_v38 = vrot.slane %v3218_v9, 2  ;;  %v2396_v27 = vadd.f32 %v2335_v2, %v7034_v54 }
 0x375   : > { %8646 = vst [vmem:[#allocation17_spill] sm:$0xff] %v7624_v34  ;;  %v3844_v34 = vrot.slane %v3219_v49, 2  ;;  %v3379_v49 = vrot.slane %v3220_v60, 1 }
 0x376   : > { %8647 = vst [vmem:[#allocation54_spill] sm:$0xff] %v7626_v39  ;;  %v2691_v17 = vpop.f32.mrf.mxu2  ;;  %3075 = vmatmul.f32.gmra.mxu0 %v2937_v44  ;;  %3182 = vmatmul.f32.gmra.mxu1 %v2938_v43  ;;  %v3843_v39 = vrot.slane %v3800_v46, 2  ;;  %v3381_v43 = vrot.slane %v3221_v19, 1 }
 0x377   : > { %v2798_v31 = vpop.f32.mrf.mxu3  ;;  %v3380_v46 = vsel %vm413_vm0, %v3374_v16, %v3379_v49 }
 0x378   : > { %v2799_v42 = vadd.f32 %v2798_v31, %v2691_v17  ;;  %v3842_v17 = vsel %vm1065_vm1, %v3840_v55, %v3841_v38  ;;  %v3845_v9 = vsel %vm1065_vm1, %v3843_v39, %v3844_v34  ;;  %v3222_v55 = vld [vmem:[%s5412_s17 + $0xd0] sm:$0xff]  ;;  %v2338_v39 = vadd.f32 %v7041_v24, %v7039_v4 }
 0x379   : > { %v3383_v19 = vrot.slane %v3222_v55, 1 }
 0x37a   : > { %v7635_v45 = vadd.f32 %v2799_v42, %v2395_v30  ;;  %v3382_v30 = vsel %vm413_vm0, %v3377_v20, %v3381_v43  ;;  %v3223_v42 = vld [vmem:[%s5412_s17 + $0xd8] sm:$0xff]  ;;  %v2397_v4 = vadd.f32 %v2338_v39, %v7055_v41 }
 0x37b   : > { %3571 = vmatmul.f32.vlgmr.msra.gmra.mxu2 %v3375_v5  ;;  %v7641_v33 = vpop.f32.mrf.mxu0  ;;  %v7643_v44 = vpop.f32.mrf.mxu1  ;;  %v3846_v5 = vrot.slane %v3220_v60, 2  ;;  %v3849_v60 = vsel %vm1065_vm1, %v3844_v34, %v3848_v6  ;;  %v3385_v16 = vrot.slane %v3223_v42, 1  ;;  %v2341_v34 = vadd.f32 %v7062_v37, %v7060_v62 }
 0x37c   : > { %3678 = vmatmul.f32.vlgmr.msra.gmra.mxu3 %v3378_v10 }
 0x37d   : > { %v3847_v54 = vsel %vm1065_vm1, %v3841_v38, %v3846_v5  ;;  %v3224_v38 = vld [vmem:[%s5412_s17 + $0xe0] sm:$0xff]  ;;  %v2398_v62 = vadd.f32 %v2341_v34, %v7076_v63 }
 0x37e   : > { %v2694_v36 = vpop.f32.mrf.mxu2  ;;  %4038 = vmatmul.f32.vlgmr.msra.gmra.mxu0 %v3842_v17  ;;  %4145 = vmatmul.f32.vlgmr.msra.gmra.mxu1 %v3845_v9  ;;  %v3850_v9 = vrot.slane %v3222_v55, 2 }
 0x37f   : > { %v2801_v26 = vpop.f32.mrf.mxu3 }
 0x380   : > { %v2802_v25 = vadd.f32 %v2801_v26, %v2694_v36  ;;  %v3852_v36 = vrot.slane %v3223_v42, 2  ;;  %v3384_v26 = vsel %vm413_vm0, %v3379_v49, %v3383_v19  ;;  %v3851_v41 = vsel %vm1065_vm1, %v3846_v5, %v3850_v9  ;;  %v3226_v5 = vld [vmem:[%s5412_s17 + $0xf0] sm:$0xff] }
 0x382   : > { %v7650_v31 = vadd.f32 %v2802_v25, %v2396_v27  ;;  %v3386_v27 = vsel %vm413_vm0, %v3381_v43, %v3385_v16  ;;  %v3853_v49 = vsel %vm1065_vm1, %v3848_v6, %v3852_v36  ;;  %v3387_v43 = vrot.slane %v3224_v38, 1  ;;  %v8649_v6 = vld [vmem:[#allocation18_spill] sm:$0xff] }
 0x383   : > { %3574 = vmatmul.f32.gmra.mxu2 %v3380_v46  ;;  %v7656_v10 = vpop.f32.mrf.mxu0  ;;  %v7658_v17 = vpop.f32.mrf.mxu1  ;;  %v3225_v46 = vld [vmem:[%s5412_s17 + $0xe8] sm:$0xff] }
 0x384   : > { %3681 = vmatmul.f32.gmra.mxu3 %v3382_v30  ;;  %v3389_v55 = vrot.slane %v3225_v46, 1 }
 0x386   : > { %v2697_v20 = vpop.f32.mrf.mxu2  ;;  %4041 = vmatmul.f32.gmra.mxu0 %v3847_v54  ;;  %4148 = vmatmul.f32.gmra.mxu1 %v3849_v60  ;;  %v3854_v60 = vrot.slane %v3224_v38, 2 }
 0x387   : > { %v2804_v2 = vpop.f32.mrf.mxu3 }
 0x388   : > { %v2805_v24 = vadd.f32 %v2804_v2, %v2697_v20  ;;  %v3856_v20 = vrot.slane %v3225_v46, 2  ;;  %v3388_v2 = vsel %vm413_vm0, %v3383_v19, %v3387_v43  ;;  %v3855_v63 = vsel %vm1065_vm1, %v3850_v9, %v3854_v60  ;;  %v3228_v9 = vld [vmem:[%s5412_s17 + $0x100] sm:$0xff] }
 0x38a   : > { %v7665_v25 = vadd.f32 %v2805_v24, %v2397_v4  ;;  %v3390_v4 = vsel %vm413_vm0, %v3385_v16, %v3389_v55  ;;  %v3857_v19 = vsel %vm1065_vm1, %v3852_v36, %v3856_v20  ;;  %v3391_v16 = vrot.slane %v3226_v5, 1  ;;  %v8653_v36 = vld [vmem:[#allocation20_spill] sm:$0xff] }
 0x38b   : > { %3577 = vmatmul.f32.gmra.mxu2 %v3384_v26  ;;  %v7671_v30 = vpop.f32.mrf.mxu0  ;;  %v7673_v54 = vpop.f32.mrf.mxu1  ;;  %v3227_v26 = vld [vmem:[%s5412_s17 + $0xf8] sm:$0xff] }
 0x38c   : > { %3684 = vmatmul.f32.gmra.mxu3 %v3386_v27  ;;  %v2344_v27 = vadd.f32 %v8649_v6, %v7081_v21  ;;  %v3393_v38 = vrot.slane %v3227_v26, 1 }
 0x38e   : > { %v2700_v42 = vpop.f32.mrf.mxu2  ;;  %4044 = vmatmul.f32.gmra.mxu0 %v3851_v41  ;;  %4151 = vmatmul.f32.gmra.mxu1 %v3853_v49 }
 0x38f   : > { %v2807_v39 = vpop.f32.mrf.mxu3 }
 0x390   : > { %v2808_v37 = vadd.f32 %v2807_v39, %v2700_v42  ;;  %v8652_v42 = vld [vmem:[#allocation19_spill] sm:$0xff] }
 0x391   : > { %v2399_v21 = vadd.f32 %v2344_v27, %v8652_v42 }
 0x392   : > { %v7680_v24 = vadd.f32 %v2808_v37, %v2398_v62  ;;  %v3858_v62 = vrot.slane %v3226_v5, 2  ;;  %v3860_v37 = vrot.slane %v3227_v26, 2 }
 0x393   : > { %3580 = vmatmul.f32.gmra.mxu2 %v3388_v2  ;;  %v7686_v41 = vpop.f32.mrf.mxu0  ;;  %v7688_v49 = vpop.f32.mrf.mxu1  ;;  %v3392_v2 = vsel %vm413_vm0, %v3387_v43, %v3391_v16 }
 0x394   : > { %8648 = vst [vmem:[#allocation55_spill] sm:$0xff] %v7680_v24  ;;  %3687 = vmatmul.f32.gmra.mxu3 %v3390_v4  ;;  %v3394_v4 = vsel %vm413_vm0, %v3389_v55, %v3393_v38  ;;  %v3859_v5 = vsel %vm1065_vm1, %v3854_v60, %v3858_v62  ;;  %v3861_v43 = vsel %vm1065_vm1, %v3856_v20, %v3860_v37  ;;  %v3395_v55 = vrot.slane %v3228_v9, 1  ;;  %v3230_v60 = vld [vmem:[%s5412_s17 + $0x110] sm:$0xff] }
 0x395   : > { %8650 = vst [vmem:[#allocation18_spill] sm:$0xff] %v7686_v41  ;;  %v8654_v41 = vld [vmem:[#allocation21_spill] sm:$0xff]  ;;  %v2350_v20 = vadd.f32 %v7130_v28, %v7128_v51 }
 0x396   : > { %8651 = vst [vmem:[#allocation56_spill] sm:$0xff] %v7688_v49  ;;  %v2703_v46 = vpop.f32.mrf.mxu2  ;;  %4047 = vmatmul.f32.gmra.mxu0 %v3855_v63  ;;  %4154 = vmatmul.f32.gmra.mxu1 %v3857_v19  ;;  %v3229_v49 = vld [vmem:[%s5412_s17 + $0x108] sm:$0xff]  ;;  %v2347_v24 = vadd.f32 %v8654_v41, %v8653_v36 }
 0x397   : > { %v2810_v34 = vpop.f32.mrf.mxu3  ;;  %v3397_v26 = vrot.slane %v3229_v49, 1 }
 0x398   : > { %v2811_v39 = vadd.f32 %v2810_v34, %v2703_v46  ;;  %v8656_v34 = vld [vmem:[#allocation22_spill] sm:$0xff] }
 0x399   : > { %v2400_v41 = vadd.f32 %v2347_v24, %v8656_v34  ;;  %v3866_v34 = vrot.slane %v3230_v60, 2 }
 0x39a   : > { %v7695_v6 = vadd.f32 %v2811_v39, %v2399_v21  ;;  %v3862_v21 = vrot.slane %v3228_v9, 2  ;;  %v3864_v39 = vrot.slane %v3229_v49, 2 }
 0x39b   : > { %3583 = vmatmul.f32.gmra.mxu2 %v3392_v2  ;;  %v7701_v63 = vpop.f32.mrf.mxu0  ;;  %v7703_v19 = vpop.f32.mrf.mxu1  ;;  %v3396_v2 = vsel %vm413_vm0, %v3391_v16, %v3395_v55  ;;  %v3399_v16 = vrot.slane %v3230_v60, 1 }
 0x39c   : > { %3690 = vmatmul.f32.gmra.mxu3 %v3394_v4  ;;  %8655 = vst [vmem:[#allocation19_spill] sm:$0xff] %v7703_v19  ;;  %v3398_v4 = vsel %vm413_vm0, %v3393_v38, %v3397_v26  ;;  %v3231_v19 = vld [vmem:[%s5412_s17 + $0x118] sm:$0xff]  ;;  %v3863_v24 = vsel %vm1065_vm1, %v3858_v62, %v3862_v21  ;;  %v3865_v49 = vsel %vm1065_vm1, %v3860_v37, %v3864_v39  ;;  %v3232_v62 = vld [vmem:[%s5412_s17 + $0x120] sm:$0xff] }
 0x39d   : > { %v3401_v38 = vrot.slane %v3231_v19, 1  ;;  %v8662_v37 = vld [vmem:[#allocation24_spill] sm:$0xff] }
 0x39e   : > { %v2706_v27 = vpop.f32.mrf.mxu2  ;;  %4050 = vmatmul.f32.gmra.mxu0 %v3859_v5  ;;  %4157 = vmatmul.f32.gmra.mxu1 %v3861_v43 }
 0x39f   : > { %v2813_v46 = vpop.f32.mrf.mxu3 }
 0x3a0   : > { %v2814_v42 = vadd.f32 %v2813_v46, %v2706_v27  ;;  %v8660_v46 = vld [vmem:[#allocation23_spill] sm:$0xff] }
 0x3a1   : > { %v2401_v51 = vadd.f32 %v2350_v20, %v8660_v46 }
 0x3a2   : > { %v7710_v36 = vadd.f32 %v2814_v42, %v2400_v41  ;;  %v3868_v41 = vrot.slane %v3231_v19, 2  ;;  %v3400_v42 = vsel %vm413_vm0, %v3395_v55, %v3399_v16  ;;  %v3867_v19 = vsel %vm1065_vm1, %v3862_v21, %v3866_v34  ;;  %v3234_v21 = vld [vmem:[%s5412_s17 + $0x130] sm:$0xff] }
 0x3a3   : > { %3586 = vmatmul.f32.gmra.mxu2 %v3396_v2  ;;  %v7716_v5 = vpop.f32.mrf.mxu0  ;;  %v7718_v43 = vpop.f32.mrf.mxu1  ;;  %v3402_v2 = vsel %vm413_vm0, %v3397_v26, %v3401_v38  ;;  %v3403_v26 = vrot.slane %v3232_v62, 1 }
 0x3a4   : > { %8657 = vst [vmem:[#allocation20_spill] sm:$0xff] %v7710_v36  ;;  %3693 = vmatmul.f32.gmra.mxu3 %v3398_v4  ;;  %v3869_v55 = vsel %vm1065_vm1, %v3864_v39, %v3868_v41  ;;  %v8667_v39 = vld [vmem:[#allocation27_spill] sm:$0xff] }
 0x3a5   : > { %8658 = vst [vmem:[#allocation21_spill] sm:$0xff] %v7716_v5  ;;  %v8663_v5 = vld [vmem:[#allocation25_spill] sm:$0xff] }
 0x3a6   : > { %8659 = vst [vmem:[#allocation22_spill] sm:$0xff] %v7718_v43  ;;  %v2709_v9 = vpop.f32.mrf.mxu2  ;;  %4053 = vmatmul.f32.gmra.mxu0 %v3863_v24  ;;  %4160 = vmatmul.f32.gmra.mxu1 %v3865_v49  ;;  %v3233_v43 = vld [vmem:[%s5412_s17 + $0x128] sm:$0xff]  ;;  %v2353_v36 = vadd.f32 %v8663_v5, %v8662_v37 }
 0x3a7   : > { %v2816_v27 = vpop.f32.mrf.mxu3  ;;  %v3405_v60 = vrot.slane %v3233_v43, 1 }
 0x3a8   : > { %v2817_v28 = vadd.f32 %v2816_v27, %v2709_v9  ;;  %v8666_v27 = vld [vmem:[#allocation26_spill] sm:$0xff] }
 0x3a9   : > { %v2402_v5 = vadd.f32 %v2353_v36, %v8666_v27  ;;  %v3874_v27 = vrot.slane %v3234_v21, 2 }
 0x3aa   : > { %v7725_v4 = vadd.f32 %v2817_v28, %v2401_v51  ;;  %v3870_v51 = vrot.slane %v3232_v62, 2  ;;  %v3872_v28 = vrot.slane %v3233_v43, 2 }
 0x3ab   : > { %3589 = vmatmul.f32.gmra.mxu2 %v3400_v42  ;;  %v7731_v24 = vpop.f32.mrf.mxu0  ;;  %v7733_v49 = vpop.f32.mrf.mxu1  ;;  %v3404_v42 = vsel %vm413_vm0, %v3399_v16, %v3403_v26  ;;  %v3407_v16 = vrot.slane %v3234_v21, 1 }
 0x3ac   : > { %8661 = vst [vmem:[#allocation23_spill] sm:$0xff] %v7725_v4  ;;  %3696 = vmatmul.f32.gmra.mxu3 %v3402_v2  ;;  %v3406_v2 = vsel %vm413_vm0, %v3401_v38, %v3405_v60  ;;  %v3871_v36 = vsel %vm1065_vm1, %v3866_v34, %v3870_v51  ;;  %v3873_v43 = vsel %vm1065_vm1, %v3868_v41, %v3872_v28  ;;  %v3236_v34 = vld [vmem:[%s5412_s17 + $0x140] sm:$0xff] }
 0x3ad   : > { %8664 = vst [vmem:[#allocation24_spill] sm:$0xff] %v7731_v24  ;;  %v8668_v24 = vld [vmem:[#allocation28_spill] sm:$0xff]  ;;  %v8671_v41 = vld [vmem:[#allocation29_spill] sm:$0xff] }
 0x3ae   : > { %8665 = vst [vmem:[#allocation25_spill] sm:$0xff] %v7733_v49  ;;  %v2712_v20 = vpop.f32.mrf.mxu2  ;;  %4056 = vmatmul.f32.gmra.mxu0 %v3867_v19  ;;  %4163 = vmatmul.f32.gmra.mxu1 %v3869_v55  ;;  %v3235_v49 = vld [vmem:[%s5412_s17 + $0x138] sm:$0xff]  ;;  %v2356_v4 = vadd.f32 %v8668_v24, %v8667_v39  ;;  %v3237_v39 = vld [vmem:[%s5412_s17 + $0x148] sm:$0xff] }
 0x3af   : > { %v2819_v9 = vpop.f32.mrf.mxu3  ;;  %v3409_v38 = vrot.slane %v3235_v49, 1 }
 0x3b0   : > { %v2820_v46 = vadd.f32 %v2819_v9, %v2712_v20  ;;  %v2403_v24 = vadd.f32 %v2356_v4, %v7187_v1  ;;  %v3875_v1 = vsel %vm1065_vm1, %v3870_v51, %v3874_v27  ;;  %v3238_v51 = vld [vmem:[%s5412_s17 + $0x150] sm:$0xff] }
 0x3b2   : > { %v7740_v37 = vadd.f32 %v2820_v46, %v2402_v5  ;;  %v3876_v5 = vrot.slane %v3235_v49, 2  ;;  %v3408_v46 = vsel %vm413_vm0, %v3403_v26, %v3407_v16  ;;  %v3411_v49 = vrot.slane %v3236_v34, 1 }
 0x3b3   : > { %3592 = vmatmul.f32.gmra.mxu2 %v3404_v42  ;;  %v7746_v19 = vpop.f32.mrf.mxu0  ;;  %v7748_v55 = vpop.f32.mrf.mxu1  ;;  %v3410_v42 = vsel %vm413_vm0, %v3405_v60, %v3409_v38  ;;  %v3413_v26 = vrot.slane %v3237_v39, 1 }
 0x3b4   : > { %3699 = vmatmul.f32.gmra.mxu3 %v3406_v2  ;;  %8669 = vst [vmem:[#allocation26_spill] sm:$0xff] %v7746_v19  ;;  %v3877_v4 = vsel %vm1065_vm1, %v3872_v28, %v3876_v5  ;;  %v8675_v28 = vld [vmem:[#allocation31_spill] sm:$0xff] }
 0x3b5   : > { %8670 = vst [vmem:[#allocation27_spill] sm:$0xff] %v7748_v55  ;;  %v8672_v55 = vld [vmem:[#allocation30_spill] sm:$0xff] }
 0x3b6   : > { %v2715_v62 = vpop.f32.mrf.mxu2  ;;  %4059 = vmatmul.f32.gmra.mxu0 %v3871_v36  ;;  %4166 = vmatmul.f32.gmra.mxu1 %v3873_v43  ;;  %v2359_v19 = vadd.f32 %v8672_v55, %v8671_v41  ;;  %v3239_v41 = vld [vmem:[%s5412_s17 + $0x158] sm:$0xff] }
 0x3b7   : > { %v2822_v20 = vpop.f32.mrf.mxu3 }
 0x3b8   : > { %v2823_v9 = vadd.f32 %v2822_v20, %v2715_v62  ;;  %v2404_v55 = vadd.f32 %v2359_v19, %v7208_v50  ;;  %v3878_v20 = vrot.slane %v3236_v34, 2 }
 0x3ba   : > { %v7755_v2 = vadd.f32 %v2823_v9, %v2403_v24  ;;  %v3880_v24 = vrot.slane %v3237_v39, 2  ;;  %v3412_v9 = vsel %vm413_vm0, %v3407_v16, %v3411_v49  ;;  %v3879_v50 = vsel %vm1065_vm1, %v3874_v27, %v3878_v20  ;;  %v3240_v27 = vld [vmem:[%s5412_s17 + $0x160] sm:$0xff] }
 0x3bb   : > { %3595 = vmatmul.f32.gmra.mxu2 %v3408_v46  ;;  %v7761_v36 = vpop.f32.mrf.mxu0  ;;  %v7763_v43 = vpop.f32.mrf.mxu1  ;;  %v3414_v46 = vsel %vm413_vm0, %v3409_v38, %v3413_v26  ;;  %v3415_v16 = vrot.slane %v3238_v51, 1  ;;  %v3417_v38 = vrot.slane %v3239_v41, 1 }
 0x3bc   : > { %3702 = vmatmul.f32.gmra.mxu3 %v3410_v42  ;;  %8673 = vst [vmem:[#allocation28_spill] sm:$0xff] %v7761_v36  ;;  %v3881_v19 = vsel %vm1065_vm1, %v3876_v5, %v3880_v24  ;;  %v8679_v5 = vld [vmem:[#allocation33_spill] sm:$0xff] }
 0x3bd   : > { %8674 = vst [vmem:[#allocation29_spill] sm:$0xff] %v7763_v43  ;;  %v8676_v43 = vld [vmem:[#allocation32_spill] sm:$0xff] }
 0x3be   : > { %v2718_v60 = vpop.f32.mrf.mxu2  ;;  %4062 = vmatmul.f32.gmra.mxu0 %v3875_v1  ;;  %4169 = vmatmul.f32.gmra.mxu1 %v3877_v4  ;;  %v2362_v36 = vadd.f32 %v8676_v43, %v8675_v28  ;;  %v3241_v28 = vld [vmem:[%s5412_s17 + $0x168] sm:$0xff] }
 0x3bf   : > { %v2825_v21 = vpop.f32.mrf.mxu3 }
 0x3c0   : > { %v2826_v62 = vadd.f32 %v2825_v21, %v2718_v60  ;;  %v2405_v43 = vadd.f32 %v2362_v36, %v7229_v13  ;;  %v3882_v21 = vrot.slane %v3238_v51, 2 }
 0x3c2   : > { %v7770_v42 = vadd.f32 %v2826_v62, %v2404_v55  ;;  %v3884_v55 = vrot.slane %v3239_v41, 2  ;;  %v3416_v62 = vsel %vm413_vm0, %v3411_v49, %v3415_v16  ;;  %v3883_v13 = vsel %vm1065_vm1, %v3878_v20, %v3882_v21  ;;  %v3242_v20 = vld [vmem:[%s5412_s17 + $0x170] sm:$0xff] }
 0x3c3   : > { %3598 = vmatmul.f32.gmra.mxu2 %v3412_v9  ;;  %v7776_v1 = vpop.f32.mrf.mxu0  ;;  %v7778_v4 = vpop.f32.mrf.mxu1  ;;  %v3418_v9 = vsel %vm413_vm0, %v3413_v26, %v3417_v38  ;;  %v3419_v49 = vrot.slane %v3240_v27, 1  ;;  %v3421_v26 = vrot.slane %v3241_v28, 1 }
 0x3c4   : > { %3705 = vmatmul.f32.gmra.mxu3 %v3414_v46  ;;  %8677 = vst [vmem:[#allocation30_spill] sm:$0xff] %v7776_v1  ;;  %v3885_v36 = vsel %vm1065_vm1, %v3880_v24, %v3884_v55  ;;  %v8683_v24 = vld [vmem:[#allocation35_spill] sm:$0xff] }
 0x3c5   : > { %8678 = vst [vmem:[#allocation31_spill] sm:$0xff] %v7778_v4  ;;  %v8680_v4 = vld [vmem:[#allocation34_spill] sm:$0xff] }
 0x3c6   : > { %v2721_v34 = vpop.f32.mrf.mxu2  ;;  %4065 = vmatmul.f32.gmra.mxu0 %v3879_v50  ;;  %4172 = vmatmul.f32.gmra.mxu1 %v3881_v19  ;;  %v2365_v1 = vadd.f32 %v8680_v4, %v8679_v5  ;;  %v3243_v5 = vld [vmem:[%s5412_s17 + $0x178] sm:$0xff] }
 0x3c7   : > { %v2828_v39 = vpop.f32.mrf.mxu3 }
 0x3c8   : > { %v2829_v60 = vadd.f32 %v2828_v39, %v2721_v34  ;;  %v2406_v4 = vadd.f32 %v2365_v1, %v7250_v40  ;;  %v3886_v39 = vrot.slane %v3240_v27, 2 }
 0x3ca   : > { %v7785_v46 = vadd.f32 %v2829_v60, %v2405_v43  ;;  %v3888_v43 = vrot.slane %v3241_v28, 2  ;;  %v3420_v60 = vsel %vm413_vm0, %v3415_v16, %v3419_v49  ;;  %v3887_v40 = vsel %vm1065_vm1, %v3882_v21, %v3886_v39  ;;  %v3244_v21 = vld [vmem:[%s5412_s17 + $0x180] sm:$0xff] }
 0x3cb   : > { %3601 = vmatmul.f32.gmra.mxu2 %v3416_v62  ;;  %v7791_v50 = vpop.f32.mrf.mxu0  ;;  %v7793_v19 = vpop.f32.mrf.mxu1  ;;  %v3422_v62 = vsel %vm413_vm0, %v3417_v38, %v3421_v26  ;;  %v3423_v16 = vrot.slane %v3242_v20, 1  ;;  %v3425_v38 = vrot.slane %v3243_v5, 1 }
 0x3cc   : > { %3708 = vmatmul.f32.gmra.mxu3 %v3418_v9  ;;  %8681 = vst [vmem:[#allocation32_spill] sm:$0xff] %v7791_v50  ;;  %v3889_v1 = vsel %vm1065_vm1, %v3884_v55, %v3888_v43  ;;  %v8687_v55 = vld [vmem:[#allocation37_spill] sm:$0xff] }
 0x3cd   : > { %8682 = vst [vmem:[#allocation33_spill] sm:$0xff] %v7793_v19  ;;  %v8684_v19 = vld [vmem:[#allocation36_spill] sm:$0xff] }
 0x3ce   : > { %v2724_v51 = vpop.f32.mrf.mxu2  ;;  %4068 = vmatmul.f32.gmra.mxu0 %v3883_v13  ;;  %4175 = vmatmul.f32.gmra.mxu1 %v3885_v36  ;;  %v2368_v50 = vadd.f32 %v8684_v19, %v8683_v24  ;;  %v3245_v24 = vld [vmem:[%s5412_s17 + $0x188] sm:$0xff] }
 0x3cf   : > { %v2831_v41 = vpop.f32.mrf.mxu3 }
 0x3d0   : > { %v2832_v34 = vadd.f32 %v2831_v41, %v2724_v51  ;;  %v2407_v19 = vadd.f32 %v2368_v50, %v7271_v56  ;;  %v3890_v41 = vrot.slane %v3242_v20, 2 }
 0x3d2   : > { %v7800_v9 = vadd.f32 %v2832_v34, %v2406_v4  ;;  %v3892_v4 = vrot.slane %v3243_v5, 2  ;;  %v3424_v34 = vsel %vm413_vm0, %v3419_v49, %v3423_v16  ;;  %v3891_v56 = vsel %vm1065_vm1, %v3886_v39, %v3890_v41  ;;  %v3246_v39 = vld [vmem:[%s5412_s17 + $0x190] sm:$0xff] }
 0x3d3   : > { %3604 = vmatmul.f32.gmra.mxu2 %v3420_v60  ;;  %v7806_v13 = vpop.f32.mrf.mxu0  ;;  %v7808_v36 = vpop.f32.mrf.mxu1  ;;  %v3426_v60 = vsel %vm413_vm0, %v3421_v26, %v3425_v38  ;;  %v3427_v49 = vrot.slane %v3244_v21, 1  ;;  %v3429_v26 = vrot.slane %v3245_v24, 1 }
 0x3d4   : > { %3711 = vmatmul.f32.gmra.mxu3 %v3422_v62  ;;  %8685 = vst [vmem:[#allocation34_spill] sm:$0xff] %v7806_v13  ;;  %v3893_v50 = vsel %vm1065_vm1, %v3888_v43, %v3892_v4  ;;  %v8692_v43 = vld [vmem:[#allocation39_spill] sm:$0xff] }
 0x3d5   : > { %8686 = vst [vmem:[#allocation35_spill] sm:$0xff] %v7808_v36  ;;  %v8688_v36 = vld [vmem:[#allocation38_spill] sm:$0xff] }
 0x3d6   : > { %v2727_v27 = vpop.f32.mrf.mxu2  ;;  %4071 = vmatmul.f32.gmra.mxu0 %v3887_v40  ;;  %4178 = vmatmul.f32.gmra.mxu1 %v3889_v1  ;;  %v2371_v13 = vadd.f32 %v8688_v36, %v8687_v55  ;;  %v3247_v55 = vld [vmem:[%s5412_s17 + $0x198] sm:$0xff] }
 0x3d7   : > { %v2834_v28 = vpop.f32.mrf.mxu3 }
 0x3d8   : > { %v2835_v51 = vadd.f32 %v2834_v28, %v2727_v27  ;;  %v2408_v36 = vadd.f32 %v2371_v13, %v7292_v35  ;;  %v3894_v28 = vrot.slane %v3244_v21, 2 }
 0x3da   : > { %v7815_v62 = vadd.f32 %v2835_v51, %v2407_v19  ;;  %v3896_v19 = vrot.slane %v3245_v24, 2  ;;  %v3428_v51 = vsel %vm413_vm0, %v3423_v16, %v3427_v49  ;;  %v3895_v35 = vsel %vm1065_vm1, %v3890_v41, %v3894_v28  ;;  %v3248_v41 = vld [vmem:[%s5412_s17 + $0x1a0] sm:$0xff] }
 0x3db   : > { %3607 = vmatmul.f32.gmra.mxu2 %v3424_v34  ;;  %v7821_v40 = vpop.f32.mrf.mxu0  ;;  %v7823_v1 = vpop.f32.mrf.mxu1  ;;  %v3430_v34 = vsel %vm413_vm0, %v3425_v38, %v3429_v26  ;;  %v3431_v16 = vrot.slane %v3246_v39, 1  ;;  %v3433_v38 = vrot.slane %v3247_v55, 1 }
 0x3dc   : > { %3714 = vmatmul.f32.gmra.mxu3 %v3426_v60  ;;  %8689 = vst [vmem:[#allocation36_spill] sm:$0xff] %v7821_v40  ;;  %v3897_v13 = vsel %vm1065_vm1, %v3892_v4, %v3896_v19  ;;  %v8697_v4 = vld [vmem:[#allocation42_spill] sm:$0xff] }
 0x3dd   : > { %8690 = vst [vmem:[#allocation37_spill] sm:$0xff] %v7823_v1  ;;  %v8693_v1 = vld [vmem:[#allocation40_spill] sm:$0xff] }
 0x3de   : > { %v2730_v20 = vpop.f32.mrf.mxu2  ;;  %4074 = vmatmul.f32.gmra.mxu0 %v3891_v56  ;;  %4181 = vmatmul.f32.gmra.mxu1 %v3893_v50  ;;  %v2374_v40 = vadd.f32 %v8693_v1, %v8692_v43 }
 0x3df   : > { %v2837_v5 = vpop.f32.mrf.mxu3 }
 0x3e0   : > { %v2838_v27 = vadd.f32 %v2837_v5, %v2730_v20  ;;  %v8696_v20 = vld [vmem:[#allocation41_spill] sm:$0xff] }
 0x3e1   : > { %v2409_v1 = vadd.f32 %v2374_v40, %v8696_v20  ;;  %v3902_v20 = vrot.slane %v3248_v41, 2 }
 0x3e2   : > { %v7830_v60 = vadd.f32 %v2838_v27, %v2408_v36  ;;  %v3898_v36 = vrot.slane %v3246_v39, 2  ;;  %v3900_v27 = vrot.slane %v3247_v55, 2 }
 0x3e3   : > { %3610 = vmatmul.f32.gmra.mxu2 %v3428_v51  ;;  %v7836_v56 = vpop.f32.mrf.mxu0  ;;  %v7838_v50 = vpop.f32.mrf.mxu1  ;;  %v3432_v51 = vsel %vm413_vm0, %v3427_v49, %v3431_v16 }
 0x3e4   : > { %8691 = vst [vmem:[#allocation38_spill] sm:$0xff] %v7830_v60  ;;  %3717 = vmatmul.f32.gmra.mxu3 %v3430_v34  ;;  %v3434_v34 = vsel %vm413_vm0, %v3429_v26, %v3433_v38  ;;  %v3899_v40 = vsel %vm1065_vm1, %v3894_v28, %v3898_v36  ;;  %v3901_v49 = vsel %vm1065_vm1, %v3896_v19, %v3900_v27  ;;  %v3435_v26 = vrot.slane %v3248_v41, 1  ;;  %v3250_v28 = vld [vmem:[%s5412_s17 + $0x1b0] sm:$0xff]  ;;  %v8702_v19 = vld [vmem:[#allocation44_spill] sm:$0xff] }
 0x3e5   : > { %8694 = vst [vmem:[#allocation39_spill] sm:$0xff] %v7836_v56  ;;  %v8698_v56 = vld [vmem:[#allocation43_spill] sm:$0xff] }
 0x3e6   : > { %8695 = vst [vmem:[#allocation40_spill] sm:$0xff] %v7838_v50  ;;  %v2733_v21 = vpop.f32.mrf.mxu2  ;;  %4077 = vmatmul.f32.gmra.mxu0 %v3895_v35  ;;  %4184 = vmatmul.f32.gmra.mxu1 %v3897_v13  ;;  %v3249_v50 = vld [vmem:[%s5412_s17 + $0x1a8] sm:$0xff]  ;;  %v2377_v60 = vadd.f32 %v8698_v56, %v8697_v4  ;;  %v3251_v4 = vld [vmem:[%s5412_s17 + $0x1b8] sm:$0xff] }
 0x3e7   : > { %v2840_v24 = vpop.f32.mrf.mxu3  ;;  %v3437_v39 = vrot.slane %v3249_v50, 1 }
 0x3e8   : > { %v2841_v5 = vadd.f32 %v2840_v24, %v2733_v21  ;;  %v2410_v56 = vadd.f32 %v2377_v60, %v7334_v32  ;;  %v3903_v32 = vsel %vm1065_vm1, %v3898_v36, %v3902_v20  ;;  %v7878_v36 = vld [vmem:[%s5412_s17 + $0x1c0] sm:$0xff] }
 0x3ea   : > { %v7845_v43 = vadd.f32 %v2841_v5, %v2409_v1  ;;  %v3904_v1 = vrot.slane %v3249_v50, 2  ;;  %v3436_v5 = vsel %vm413_vm0, %v3431_v16, %v3435_v26  ;;  %v3439_v50 = vrot.slane %v3250_v28, 1 }
 0x3eb   : > { %3613 = vmatmul.f32.gmra.mxu2 %v3432_v51  ;;  %v7851_v35 = vpop.f32.mrf.mxu0  ;;  %v7853_v13 = vpop.f32.mrf.mxu1  ;;  %v3438_v51 = vsel %vm413_vm0, %v3433_v38, %v3437_v39  ;;  %v3441_v16 = vrot.slane %v3251_v4, 1 }
 0x3ec   : > { %3720 = vmatmul.f32.gmra.mxu3 %v3434_v34  ;;  %8699 = vst [vmem:[#allocation41_spill] sm:$0xff] %v7851_v35  ;;  %v3905_v60 = vsel %vm1065_vm1, %v3900_v27, %v3904_v1  ;;  %v7881_v27 = vld [vmem:[%s5412_s17 + $0x1c8] sm:$0xff] }
 0x3ed   : > { %8700 = vst [vmem:[#allocation42_spill] sm:$0xff] %v7853_v13  ;;  %v8703_v13 = vld [vmem:[#allocation45_spill] sm:$0xff] }
 0x3ee   : > { %v2736_v55 = vpop.f32.mrf.mxu2  ;;  %4080 = vmatmul.f32.gmra.mxu0 %v3899_v40  ;;  %4187 = vmatmul.f32.gmra.mxu1 %v3901_v49  ;;  %v2380_v35 = vadd.f32 %v8703_v13, %v8702_v19  ;;  %v8707_v19 = vld [vmem:[#allocation46_spill] sm:$0xff] }
 0x3ef   : > { %v2843_v21 = vpop.f32.mrf.mxu3 }
 0x3f0   : > { %v2844_v24 = vadd.f32 %v2843_v21, %v2736_v55  ;;  %v2411_v13 = vadd.f32 %v2380_v35, %v7355_v48  ;;  %v3906_v21 = vrot.slane %v3250_v28, 2 }
 0x3f2   : > { %v7860_v34 = vadd.f32 %v2844_v24, %v2410_v56  ;;  %v3908_v56 = vrot.slane %v3251_v4, 2  ;;  %v3440_v24 = vsel %vm413_vm0, %v3435_v26, %v3439_v50  ;;  %v3907_v35 = vsel %vm1065_vm1, %v3902_v20, %v3906_v21 }
 0x3f3   : > { %3616 = vmatmul.f32.gmra.mxu2 %v3436_v5  ;;  %v7866_v40 = vpop.f32.mrf.mxu0  ;;  %v7868_v49 = vpop.f32.mrf.mxu1  ;;  %v3442_v5 = vsel %vm413_vm0, %v3437_v39, %v3441_v16  ;;  %v3443_v26 = vrot.slane %v7878_v36, 1  ;;  %v3445_v39 = vrot.slane %v7881_v27, 1  ;;  %v3912_v20 = vrot.slane %v7881_v27, 2 }
 0x3f4   : > { %8701 = vst [vmem:[#allocation43_spill] sm:$0xff] %v7860_v34  ;;  %3723 = vmatmul.f32.gmra.mxu3 %v3438_v51  ;;  %v3909_v28 = vsel %vm1065_vm1, %v3904_v1, %v3908_v56  ;;  %v7926_v34 = vld [vmem:[%s5412_s17 + $0x1e0] sm:$0xff] }
 0x3f5   : > { %8704 = vst [vmem:[#allocation44_spill] sm:$0xff] %v7866_v40  ;;  %v3444_v1 = vsel %vm413_vm0, %v3439_v50, %v3443_v26 }
 0x3f6   : > { %8705 = vst [vmem:[#allocation45_spill] sm:$0xff] %v7868_v49  ;;  %v2739_v38 = vpop.f32.mrf.mxu2  ;;  %4083 = vmatmul.f32.gmra.mxu0 %v3903_v32  ;;  %4190 = vmatmul.f32.gmra.mxu1 %v3905_v60  ;;  %v3097_v49 = vadd.f32 %v8707_v19, %v7360_v22  ;;  %v8708_v19 = vld [vmem:[#allocation47_spill] sm:$0xff] }
 0x3f7   : > { %v2846_v41 = vpop.f32.mrf.mxu3 }
 0x3f8   : > { %v2847_v55 = vadd.f32 %v2846_v41, %v2739_v38  ;;  %v3186_v4 = vadd.f32 %v3097_v49, %v7376_v53  ;;  %v7900_v53 = vld [vmem:[%s5412_s17 + $0x1d0] sm:$0xff]  ;;  %v7903_v49 = vld [vmem:[%s5412_s17 + $0x1d8] sm:$0xff] }
 0x3fa   : > { %v7875_v51 = vadd.f32 %v2847_v55, %v2411_v13  ;;  %v3910_v13 = vrot.slane %v7878_v36, 2  ;;  %v3446_v55 = vsel %vm413_vm0, %v3441_v16, %v3445_v39 }
 0x3fb   : > { %3619 = vmatmul.f32.gmra.mxu2 %v3440_v24  ;;  %v4039_v32 = vpop.f32.mrf.mxu0  ;;  %v4146_v48 = vpop.f32.mrf.mxu1 }
 0x3fc   : > { %8706 = vst [vmem:[#allocation57_spill] sm:$0xff] %v7875_v51  ;;  %3726 = vmatmul.f32.gmra.mxu3 %v3442_v5  ;;  %v4147_v41 = vadd.f32 %v4146_v48, %v4039_v32  ;;  %v7897_v5 = vld [vmem:[%s8468_s2] ss:$0 sm:$0xff]  ;;  %v3100_v32 = vadd.f32 %v8708_v19, %v7381_v18  ;;  %v3911_v16 = vsel %vm1065_vm1, %v3906_v21, %v3910_v13  ;;  %v3449_v18 = vrot.slane %v7903_v49, 1 }
 0x3fd   : > { %v3913_v48 = vsel %vm1065_vm1, %v3908_v56, %v3912_v20  ;;  %v3914_v56 = vrot.slane %v7900_v53, 2 }
 0x3fe   : > { %v3572_v60 = vpop.f32.mrf.mxu2  ;;  %4086 = vmatmul.f32.gmra.mxu0 %v3907_v35  ;;  %4193 = vmatmul.f32.gmra.mxu1 %v3909_v28  ;;  %v5011_v35 = vld [vmem:[%s8469_s3 + $0xf0] sm:$0xff]  ;;  %v4302_v28 = vld [vmem:[%s8469_s3] sm:$0xff] }
 0x3ff   : > { %v3679_v38 = vpop.f32.mrf.mxu3 }
 0x400   : > { %v3680_v22 = vadd.f32 %v3679_v38, %v3572_v60  ;;  %v3187_v38 = vadd.f32 %v3100_v32, %v7397_v7 }
 0x402   : > { %v3769_v24 = vadd.f32 %v3680_v22, %v3186_v4  ;;  %v3447_v4 = vrot.slane %v7900_v53, 1  ;;  %v3103_v53 = vadd.f32 %v7404_v57, %v7402_v52  ;;  %v3451_v52 = vrot.slane %v7926_v34, 1 }
 0x403   : > { %3622 = vmatmul.f32.gmra.mxu2 %v3444_v1  ;;  %v4042_v27 = vpop.f32.mrf.mxu0  ;;  %v4149_v50 = vpop.f32.mrf.mxu1 }
 0x404   : > { %v4236_v36 = vadd.f32 %v4147_v41, %v3769_v24  ;;  %3729 = vmatmul.f32.gmra.mxu3 %v3446_v55  ;;  %v3916_v41 = vrot.slane %v7903_v49, 2  ;;  %v4150_v55 = vadd.f32 %v4149_v50, %v4042_v27  ;;  %v3448_v51 = vsel %vm413_vm0, %v3443_v26, %v3447_v4 }
 0x406   : > { %v4270_v60 = vadd.f32 %v7897_v5, %v4236_v36  ;;  %v3575_v22 = vpop.f32.mrf.mxu2  ;;  %4089 = vmatmul.f32.gmra.mxu0 %v3911_v16  ;;  %4196 = vmatmul.f32.gmra.mxu1 %v3913_v48  ;;  %v3450_v36 = vsel %vm413_vm0, %v3445_v39, %v3449_v18  ;;  %v7929_v16 = vld [vmem:[%s5412_s17 + $0x1e8] sm:$0xff]  ;;  %v3915_v39 = vsel %vm1065_vm1, %v3910_v13, %v3914_v56  ;;  %v5012_v48 = vld [vmem:[%s8469_s3 + $0xf8] sm:$0xff] }
 0x407   : > { %v3682_v21 = vpop.f32.mrf.mxu3  ;;  %v3917_v50 = vsel %vm1065_vm1, %v3912_v20, %v3916_v41  ;;  %v3453_v57 = vrot.slane %v7929_v16, 1 }
 0x408   : > { %v3683_v1 = vadd.f32 %v3682_v21, %v3575_v22  ;;  %v4521_v24 = vmul.f32 %v5011_v35, %v4270_v60  ;;  %v4332_v19 = vmul.f32 %v4302_v28, %v4270_v60  ;;  %v4303_v35 = vld [vmem:[%s8469_s3 + $0x8] sm:$0xff]  ;;  %v3918_v28 = vrot.slane %v7926_v34, 2 }
 0x409   : > { %v3920_v60 = vrot.slane %v7929_v16, 2  ;;  %v3106_v34 = vadd.f32 %v7430_v47, %v7428_v11 }
 0x40a   : > { %v3770_v7 = vadd.f32 %v3683_v1, %v3187_v38  ;;  %v4551_v32 = vsel %vm4362_vm2, %v4521_v24, 0.0  ;;  %v4363_v40 = vsel %vm4362_vm2, %v4332_v19, 0.0  ;;  %v3454_v24 = vsel %vm413_vm0, %v3449_v18, %v3453_v57 }
 0x40b   : > { %4552 = vadd.xlane.f32.xlu1 %v4551_v32  ;;  %4364 = vadd.xlane.f32.xlu0 %v4363_v40  ;;  %v4045_v26 = vpop.f32.mrf.mxu0  ;;  %v4152_v27 = vpop.f32.mrf.mxu1  ;;  %v7955_v32 = vld [vmem:[%s5412_s17 + $0x1f8] sm:$0xff]  ;;  %v3919_v18 = vsel %vm1065_vm1, %v3914_v56, %v3918_v28 }
 0x40c   : > { %v4237_v49 = vadd.f32 %v4150_v55, %v3770_v7  ;;  %3625 = vmatmul.f32.gmra.mxu2 %v3448_v51  ;;  %3732 = vmatmul.f32.gmra.mxu3 %v3450_v36  ;;  %v3188_v51 = vadd.f32 %v3103_v53, %v7418_v61  ;;  %v4153_v22 = vadd.f32 %v4152_v27, %v4045_v26  ;;  %v7952_v7 = vld [vmem:[%s5412_s17 + $0x1f0] sm:$0xff]  ;;  %v5013_v27 = vld [vmem:[%s8469_s3 + $0x100] sm:$0xff]  ;;  %v3457_v47 = vrot.slane %v7955_v32, 1 }
 0x40d   : > { %v3452_v55 = vsel %vm413_vm0, %v3447_v4, %v3451_v52  ;;  %v4304_v26 = vld [vmem:[%s8469_s3 + $0x10] sm:$0xff]  ;;  %v3455_v11 = vrot.slane %v7952_v7, 1 }
 0x40e   : > { %v4271_v40 = vadd.f32 %v7897_v5, %v4237_v49  ;;  %v3578_v13 = vpop.f32.mrf.mxu2  ;;  %4092 = vmatmul.f32.gmra.mxu0 %v3915_v39  ;;  %4199 = vmatmul.f32.gmra.mxu1 %v3917_v50  ;;  %v3921_v49 = vsel %vm1065_vm1, %v3916_v41, %v3920_v60  ;;  %v3189_v50 = vadd.f32 %v3106_v34, %v7439_v29 }
 0x40f   : > { %v3685_v20 = vpop.f32.mrf.mxu3 }
 0x410   : > { %v3686_v38 = vadd.f32 %v3685_v20, %v3578_v13  ;;  %v4522_v21 = vmul.f32 %v5012_v48, %v4271_v40  ;;  %v4333_v1 = vmul.f32 %v4303_v35, %v4271_v40  ;;  %v3922_v48 = vrot.slane %v7952_v7, 2 }
 0x411   : > { %v3924_v35 = vrot.slane %v7955_v32, 2  ;;  %v4305_v32 = vld [vmem:[%s8469_s3 + $0x18] sm:$0xff] }
 0x412   : > { %v3771_v19 = vadd.f32 %v3686_v38, %v3188_v51  ;;  %v4554_v61 = vsel %vm4362_vm2, %v4522_v21, 0.0  ;;  %v4366_v36 = vsel %vm4362_vm2, %v4333_v1, 0.0  ;;  %v3456_v38 = vsel %vm413_vm0, %v3451_v52, %v3455_v11 }
 0x413   : > { %4555 = vadd.xlane.f32.xlu2 %v4554_v61  ;;  %4367 = vadd.xlane.f32.xlu0 %v4366_v36  ;;  %v4048_v4 = vpop.f32.mrf.mxu0  ;;  %v4155_v53 = vpop.f32.mrf.mxu1  ;;  %v3925_v7 = vsel %vm1065_vm1, %v3920_v60, %v3924_v35 }
 0x414   : > { %v4238_v16 = vadd.f32 %v4153_v22, %v3771_v19  ;;  %3628 = vmatmul.f32.gmra.mxu2 %v3452_v55  ;;  %3735 = vmatmul.f32.gmra.mxu3 %v3454_v24  ;;  %v4156_v51 = vadd.f32 %v4155_v53, %v4048_v4  ;;  %v3458_v22 = vsel %vm413_vm0, %v3453_v57, %v3457_v47  ;;  %v7978_v55 = vld [vmem:[%s5412_s17 + $0x200] sm:$0xff]  ;;  %v7981_v24 = vld [vmem:[%s5412_s17 + $0x208] sm:$0xff] }
 0x415   : > { %v3109_v19 = vadd.f32 %v7451_v14, %v7449_v15  ;;  %v3923_v57 = vsel %vm1065_vm1, %v3918_v28, %v3922_v48  ;;  %v3459_v34 = vrot.slane %v7978_v55, 1  ;;  %v8709_v14 = vld [vmem:[#allocation48_spill] sm:$0xff]  ;;  %v3926_v28 = vrot.slane %v7978_v55, 2 }
 0x416   : > { %v4272_v39 = vadd.f32 %v7897_v5, %v4238_v16  ;;  %v3581_v56 = vpop.f32.mrf.mxu2  ;;  %4095 = vmatmul.f32.gmra.mxu0 %v3919_v18  ;;  %4202 = vmatmul.f32.gmra.mxu1 %v3921_v49  ;;  %v3461_v16 = vrot.slane %v7981_v24, 1 }
 0x417   : > { %v3688_v41 = vpop.f32.mrf.mxu3  ;;  %v3190_v4 = vadd.f32 %v3109_v19, %v8709_v14 }
 0x418   : > { %v3689_v40 = vadd.f32 %v3688_v41, %v3581_v56  ;;  %v4334_v13 = vmul.f32 %v4304_v26, %v4272_v39  ;;  %v4523_v20 = vmul.f32 %v5013_v27, %v4272_v39  ;;  %v3928_v27 = vrot.slane %v7981_v24, 2 }
 0x419   : > { %v3460_v39 = vsel %vm413_vm0, %v3455_v11, %v3459_v34 }
 0x41a   : > { %v3772_v21 = vadd.f32 %v3689_v40, %v3189_v50  ;;  %v4369_v29 = vsel %vm4362_vm2, %v4334_v13, 0.0  ;;  %v4557_v1 = vsel %vm4362_vm2, %v4523_v20, 0.0  ;;  %v3462_v50 = vsel %vm413_vm0, %v3457_v47, %v3461_v16  ;;  %v8000_v40 = vld [vmem:[%s5412_s17 + $0x210] sm:$0xff]  ;;  %v8710_v13 = vld [vmem:[#allocation49_spill] sm:$0xff] }
 0x41b   : > { %4370 = vadd.xlane.f32.xlu1 %v4369_v29  ;;  %4558 = vadd.xlane.f32.xlu0 %v4557_v1  ;;  %v4051_v52 = vpop.f32.mrf.mxu0  ;;  %v4158_v36 = vpop.f32.mrf.mxu1  ;;  %v3112_v20 = vadd.f32 %v8710_v13, %v7470_v23  ;;  %v3929_v29 = vsel %vm1065_vm1, %v3924_v35, %v3928_v27  ;;  %v4306_v1 = vld [vmem:[%s8469_s3 + $0x20] sm:$0xff]  ;;  %v3463_v23 = vrot.slane %v8000_v40, 1 }
 0x41c   : > { %v4239_v61 = vadd.f32 %v4156_v51, %v3772_v21  ;;  %3631 = vmatmul.f32.gmra.mxu2 %v3456_v38  ;;  %3738 = vmatmul.f32.gmra.mxu3 %v3458_v22  ;;  %v4159_v49 = vadd.f32 %v4158_v36, %v4051_v52  ;;  %v8003_v51 = vld [vmem:[%s5412_s17 + $0x218] sm:$0xff]  ;;  %v5014_v38 = vld [vmem:[%s8469_s3 + $0x108] sm:$0xff]  ;;  %v3927_v21 = vsel %vm1065_vm1, %v3922_v48, %v3926_v28  ;;  %v3930_v48 = vrot.slane %v8000_v40, 2 }
 0x41d   : > { %v3465_v55 = vrot.slane %v8003_v51, 1  ;;  %v3932_v14 = vrot.slane %v8003_v51, 2 }
 0x41e   : > { %v4273_v15 = vadd.f32 %v7897_v5, %v4239_v61  ;;  %v3584_v53 = vpop.f32.mrf.mxu2  ;;  %4098 = vmatmul.f32.gmra.mxu0 %v3923_v57  ;;  %4205 = vmatmul.f32.gmra.mxu1 %v3925_v7  ;;  %v8711_v61 = vld [vmem:[#allocation5_spill] sm:$0xff]  ;;  %v3931_v51 = vsel %vm1065_vm1, %v3926_v28, %v3930_v48 }
 0x41f   : > { %v3691_v18 = vpop.f32.mrf.mxu3  ;;  %v3191_v52 = vadd.f32 %v3112_v20, %v8711_v61  ;;  %v3933_v13 = vsel %vm1065_vm1, %v3928_v27, %v3932_v14  ;;  %v5016_v20 = vld [vmem:[%s8469_s3 + $0x118] sm:$0xff] }
 0x420   : > { %v3692_v60 = vadd.f32 %v3691_v18, %v3584_v53  ;;  %v4335_v26 = vmul.f32 %v4305_v32, %v4273_v15  ;;  %v4524_v19 = vmul.f32 %v5014_v38, %v4273_v15  ;;  %v3466_v53 = vsel %vm413_vm0, %v3461_v16, %v3465_v55 }
 0x422   : > { %v3773_v56 = vadd.f32 %v3692_v60, %v3190_v4  ;;  %v4372_v41 = vsel %vm4362_vm2, %v4335_v26, 0.0  ;;  %v3464_v4 = vsel %vm413_vm0, %v3459_v34, %v3463_v23  ;;  %v4560_v60 = vsel %vm4362_vm2, %v4524_v19, 0.0  ;;  %v8029_v26 = vld [vmem:[%s5412_s17 + $0x228] sm:$0xff]  ;;  %v5015_v34 = vld [vmem:[%s8469_s3 + $0x110] sm:$0xff] }
 0x423   : > { %4373 = vadd.xlane.f32.xlu1 %v4372_v41  ;;  %v4054_v11 = vpop.f32.mrf.mxu0  ;;  %v4161_v47 = vpop.f32.mrf.mxu1 }
 0x424   : > { %v4240_v22 = vadd.f32 %v4159_v49, %v3773_v56  ;;  %3634 = vmatmul.f32.gmra.mxu2 %v3460_v39  ;;  %3741 = vmatmul.f32.gmra.mxu3 %v3462_v50  ;;  %v4162_v7 = vadd.f32 %v4161_v47, %v4054_v11  ;;  %v8026_v49 = vld [vmem:[%s5412_s17 + $0x220] sm:$0xff]  ;;  %v8712_v39 = vld [vmem:[#allocation50_spill] sm:$0xff] }
 0x425   : > { %v8713_v50 = vld [vmem:[#allocation6_spill] sm:$0xff]  ;;  %v3467_v38 = vrot.slane %v8026_v49, 1  ;;  %v3934_v28 = vrot.slane %v8026_v49, 2 }
 0x426   : > { %v4274_v24 = vadd.f32 %v7897_v5, %v4240_v22  ;;  %v3587_v36 = vpop.f32.mrf.mxu2  ;;  %4101 = vmatmul.f32.gmra.mxu0 %v3927_v21  ;;  %4208 = vmatmul.f32.gmra.mxu1 %v3929_v29  ;;  %v3115_v56 = vadd.f32 %v8713_v50, %v8712_v39  ;;  %v3469_v22 = vrot.slane %v8029_v26, 1 }
 0x427   : > { %v3694_v57 = vpop.f32.mrf.mxu3 }
 0x428   : > { %v3695_v35 = vadd.f32 %v3694_v57, %v3587_v36  ;;  %v4336_v32 = vmul.f32 %v4306_v1, %v4274_v24  ;;  %v4525_v11 = vmul.f32 %v5015_v34, %v4274_v24  ;;  %v3192_v21 = vadd.f32 %v3115_v56, %v7508_v58 }
 0x429   : > { %v3468_v36 = vsel %vm413_vm0, %v3463_v23, %v3467_v38  ;;  %v3470_v24 = vsel %vm413_vm0, %v3465_v55, %v3469_v22  ;;  %v4307_v23 = vld [vmem:[%s8469_s3 + $0x28] sm:$0xff] }
 0x42a   : > { %v3774_v15 = vadd.f32 %v3695_v35, %v3191_v52  ;;  %v4375_v18 = vsel %vm4362_vm2, %v4336_v32, 0.0  ;;  %v3936_v52 = vrot.slane %v8029_v26, 2  ;;  %v4563_v35 = vsel %vm4362_vm2, %v4525_v11, 0.0  ;;  %v8055_v32 = vld [vmem:[%s5412_s17 + $0x238] sm:$0xff]  ;;  %v5017_v26 = vld [vmem:[%s8469_s3 + $0x120] sm:$0xff] }
 0x42b   : > { %4376 = vadd.xlane.f32.xlu2 %v4375_v18  ;;  %4561 = vadd.xlane.f32.xlu1 %v4560_v60  ;;  %v4057_v16 = vpop.f32.mrf.mxu0  ;;  %v4164_v40 = vpop.f32.mrf.mxu1  ;;  %v3935_v60 = vsel %vm1065_vm1, %v3930_v48, %v3934_v28  ;;  %v3473_v50 = vrot.slane %v8055_v32, 1 }
 0x42c   : > { %v4241_v41 = vadd.f32 %v4162_v7, %v3774_v15  ;;  %3637 = vmatmul.f32.gmra.mxu2 %v3464_v4  ;;  %3744 = vmatmul.f32.gmra.mxu3 %v3466_v53  ;;  %v4165_v19 = vadd.f32 %v4164_v40, %v4057_v16  ;;  %v8052_v7 = vld [vmem:[%s5412_s17 + $0x230] sm:$0xff]  ;;  %v3937_v49 = vsel %vm1065_vm1, %v3932_v14, %v3936_v52  ;;  %v3940_v40 = vrot.slane %v8055_v32, 2 }
 0x42d   : > { %v8714_v4 = vld [vmem:[#allocation7_spill] sm:$0xff]  ;;  %v3471_v39 = vrot.slane %v8052_v7, 1  ;;  %v3938_v16 = vrot.slane %v8052_v7, 2  ;;  %v5018_v7 = vld [vmem:[%s8469_s3 + $0x128] sm:$0xff] }
 0x42e   : > { %v4275_v47 = vadd.f32 %v7897_v5, %v4241_v41  ;;  %v3590_v29 = vpop.f32.mrf.mxu2  ;;  %4104 = vmatmul.f32.gmra.mxu0 %v3931_v51  ;;  %4211 = vmatmul.f32.gmra.mxu1 %v3933_v13  ;;  %v3118_v53 = vadd.f32 %v8714_v4, %v7513_v3  ;;  %v4308_v3 = vld [vmem:[%s8469_s3 + $0x30] sm:$0xff] }
 0x42f   : > { %v3697_v1 = vpop.f32.mrf.mxu3 }
 0x430   : > { %v3698_v27 = vadd.f32 %v3697_v1, %v3590_v29  ;;  %v4526_v61 = vmul.f32 %v5016_v20, %v4275_v47  ;;  %v4337_v56 = vmul.f32 %v4307_v23, %v4275_v47  ;;  %v3193_v41 = vadd.f32 %v3118_v53, %v7529_v8 }
 0x431   : > { %v3472_v47 = vsel %vm413_vm0, %v3467_v38, %v3471_v39 }
 0x432   : > { %v3775_v57 = vadd.f32 %v3698_v27, %v3192_v21  ;;  %v4566_v58 = vsel %vm4362_vm2, %v4526_v61, 0.0  ;;  %v3474_v21 = vsel %vm413_vm0, %v3469_v22, %v3473_v50  ;;  %v4378_v8 = vsel %vm4362_vm2, %v4337_v56, 0.0  ;;  %v8715_v61 = vld [vmem:[#allocation8_spill] sm:$0xff] }
 0x433   : > { %4564 = vadd.xlane.f32.xlu2 %v4563_v35  ;;  %4567 = vadd.xlane.f32.xlu0 %v4566_v58  ;;  %v4060_v55 = vpop.f32.mrf.mxu0  ;;  %v4167_v18 = vpop.f32.mrf.mxu1  ;;  %v3939_v35 = vsel %vm1065_vm1, %v3934_v28, %v3938_v16  ;;  %v3941_v58 = vsel %vm1065_vm1, %v3936_v52, %v3940_v40 }
 0x434   : > { %v4242_v15 = vadd.f32 %v4165_v19, %v3775_v57  ;;  %3640 = vmatmul.f32.gmra.mxu2 %v3468_v36  ;;  %3747 = vmatmul.f32.gmra.mxu3 %v3470_v24  ;;  %v4168_v13 = vadd.f32 %v4167_v18, %v4060_v55  ;;  %v8082_v19 = vld [vmem:[%s5412_s17 + $0x240] sm:$0xff]  ;;  %v3121_v36 = vadd.f32 %v8715_v61, %v7534_v59  ;;  %v8087_v24 = vld [vmem:[%s5412_s17 + $0x248] sm:$0xff]  ;;  %v4309_v59 = vld [vmem:[%s8469_s3 + $0x38] sm:$0xff] }
 0x435   : > { %v3475_v32 = vrot.slane %v8082_v19, 1  ;;  %v3477_v53 = vrot.slane %v8087_v24, 1  ;;  %v3944_v55 = vrot.slane %v8087_v24, 2 }
 0x436   : > { %v4276_v34 = vadd.f32 %v7897_v5, %v4242_v15  ;;  %v3593_v48 = vpop.f32.mrf.mxu2  ;;  %4107 = vmatmul.f32.gmra.mxu0 %v3935_v60  ;;  %4214 = vmatmul.f32.gmra.mxu1 %v3937_v49  ;;  %v3194_v23 = vadd.f32 %v3121_v36, %v7550_v0  ;;  %v3942_v15 = vrot.slane %v8082_v19, 2 }
 0x437   : > { %v3700_v14 = vpop.f32.mrf.mxu3 }
 0x438   : > { %v3701_v51 = vadd.f32 %v3700_v14, %v3593_v48  ;;  %v4527_v20 = vmul.f32 %v5017_v26, %v4276_v34  ;;  %v4338_v11 = vmul.f32 %v4308_v3, %v4276_v34  ;;  %v3476_v3 = vsel %vm413_vm0, %v3471_v39, %v3475_v32  ;;  %v8108_v48 = vld [vmem:[%s5412_s17 + $0x250] sm:$0xff]  ;;  %v8716_v14 = vld [vmem:[#allocation9_spill] sm:$0xff] }
 0x439   : > { %v3946_v61 = vrot.slane %v8108_v48, 2 }
 0x43a   : > { %v3776_v29 = vadd.f32 %v3701_v51, %v3193_v41  ;;  %v4569_v1 = vsel %vm4362_vm2, %v4527_v20, 0.0  ;;  %v4381_v27 = vsel %vm4362_vm2, %v4338_v11, 0.0  ;;  %v3478_v41 = vsel %vm413_vm0, %v3473_v50, %v3477_v53  ;;  %v4310_v50 = vld [vmem:[%s8469_s3 + $0x40] sm:$0xff] }
 0x43b   : > { %4379 = vadd.xlane.f32.xlu2 %v4378_v8  ;;  %4570 = vadd.xlane.f32.xlu1 %v4569_v1  ;;  %v4063_v38 = vpop.f32.mrf.mxu0  ;;  %v4170_v22 = vpop.f32.mrf.mxu1  ;;  %v3124_v51 = vadd.f32 %v8716_v14, %v7555_v12  ;;  %v5019_v12 = vld [vmem:[%s8469_s3 + $0x130] sm:$0xff]  ;;  %v8720_v14 = vld [vmem:[#allocation13_spill] sm:$0xff] }
 0x43c   : > { %v4243_v57 = vadd.f32 %v4168_v13, %v3776_v29  ;;  %4382 = vadd.xlane.f32.xlu0 %v4381_v27  ;;  %3643 = vmatmul.f32.gmra.mxu2 %v3472_v47  ;;  %v4171_v60 = vadd.f32 %v4170_v22, %v4063_v38  ;;  %v8113_v13 = vld [vmem:[%s5412_s17 + $0x258] sm:$0xff]  ;;  %v3943_v47 = vsel %vm1065_vm1, %v3938_v16, %v3942_v15  ;;  %v3479_v29 = vrot.slane %v8108_v48, 1  ;;  %v8717_v27 = vld [vmem:[#allocation10_spill] sm:$0xff] }
 0x43d   : > { %3750 = vmatmul.f32.gmra.mxu3 %v3474_v21  ;;  %v3945_v21 = vsel %vm1065_vm1, %v3940_v40, %v3944_v55  ;;  %v3481_v1 = vrot.slane %v8113_v13, 1  ;;  %v3195_v19 = vadd.f32 %v3124_v51, %v8717_v27  ;;  %v3948_v36 = vrot.slane %v8113_v13, 2 }
 0x43e   : > { %v4277_v4 = vadd.f32 %v7897_v5, %v4243_v57  ;;  %v3596_v28 = vpop.f32.mrf.mxu2  ;;  %4110 = vmatmul.f32.gmra.mxu0 %v3939_v35  ;;  %4217 = vmatmul.f32.gmra.mxu1 %v3941_v58  ;;  %v3480_v35 = vsel %vm413_vm0, %v3475_v32, %v3479_v29 }
 0x43f   : > { %v3703_v52 = vpop.f32.mrf.mxu3 }
 0x440   : > { %v3704_v18 = vadd.f32 %v3703_v52, %v3596_v28  ;;  %v4528_v49 = vmul.f32 %v5018_v7, %v4277_v4  ;;  %v4339_v26 = vmul.f32 %v4309_v59, %v4277_v4  ;;  %v3482_v4 = vsel %vm413_vm0, %v3477_v53, %v3481_v1  ;;  %v8718_v28 = vld [vmem:[#allocation11_spill] sm:$0xff]  ;;  %v8719_v52 = vld [vmem:[#allocation12_spill] sm:$0xff] }
 0x441   : > { %v5020_v53 = vld [vmem:[%s8469_s3 + $0x138] sm:$0xff] }
 0x442   : > { %v3777_v56 = vadd.f32 %v3704_v18, %v3194_v23  ;;  %v4572_v34 = vsel %vm4362_vm2, %v4528_v49, 0.0  ;;  %v4384_v0 = vsel %vm4362_vm2, %v4339_v26, 0.0  ;;  %v8134_v23 = vld [vmem:[%s5412_s17 + $0x260] sm:$0xff]  ;;  %v3127_v18 = vadd.f32 %v8719_v52, %v8718_v28  ;;  %v8723_v52 = vld [vmem:[#allocation51_spill] sm:$0xff] }
 0x443   : > { %4573 = vadd.xlane.f32.xlu2 %v4572_v34  ;;  %4385 = vadd.xlane.f32.xlu1 %v4384_v0  ;;  %v4066_v11 = vpop.f32.mrf.mxu0  ;;  %v4173_v39 = vpop.f32.mrf.mxu1  ;;  %v4311_v34 = vld [vmem:[%s8469_s3 + $0x48] sm:$0xff]  ;;  %v3483_v0 = vrot.slane %v8134_v23, 1  ;;  %v3950_v13 = vrot.slane %v8134_v23, 2 }
 0x444   : > { %v4244_v20 = vadd.f32 %v4171_v60, %v3777_v56  ;;  %3646 = vmatmul.f32.gmra.mxu2 %v3476_v3  ;;  %v4174_v57 = vadd.f32 %v4173_v39, %v4066_v11  ;;  %v8139_v60 = vld [vmem:[%s5412_s17 + $0x268] sm:$0xff]  ;;  %v3947_v3 = vsel %vm1065_vm1, %v3942_v15, %v3946_v61  ;;  %v3949_v56 = vsel %vm1065_vm1, %v3944_v55, %v3948_v36 }
 0x445   : > { %3753 = vmatmul.f32.gmra.mxu3 %v3478_v41  ;;  %v3485_v48 = vrot.slane %v8139_v60, 1  ;;  %v3196_v51 = vadd.f32 %v3127_v18, %v8720_v14 }
 0x446   : > { %v4278_v8 = vadd.f32 %v7897_v5, %v4244_v20  ;;  %v3599_v16 = vpop.f32.mrf.mxu2  ;;  %4113 = vmatmul.f32.gmra.mxu0 %v3943_v47  ;;  %4220 = vmatmul.f32.gmra.mxu1 %v3945_v21  ;;  %v3952_v20 = vrot.slane %v8139_v60, 2 }
 0x447   : > { %v3706_v40 = vpop.f32.mrf.mxu3 }
 0x448   : > { %v3707_v24 = vadd.f32 %v3706_v40, %v3599_v16  ;;  %v4340_v38 = vmul.f32 %v4310_v50, %v4278_v8  ;;  %v4529_v22 = vmul.f32 %v5019_v12, %v4278_v8  ;;  %v3484_v50 = vsel %vm413_vm0, %v3479_v29, %v3483_v0  ;;  %v8160_v16 = vld [vmem:[%s5412_s17 + $0x270] sm:$0xff] }
 0x449   : > { %v8721_v40 = vld [vmem:[#allocation14_spill] sm:$0xff]  ;;  %v3954_v60 = vrot.slane %v8160_v16, 2 }
 0x44a   : > { %v3778_v58 = vadd.f32 %v3707_v24, %v3195_v19  ;;  %v4387_v7 = vsel %vm4362_vm2, %v4340_v38, 0.0  ;;  %v4575_v59 = vsel %vm4362_vm2, %v4529_v22, 0.0  ;;  %v3486_v19 = vsel %vm413_vm0, %v3481_v1, %v3485_v48  ;;  %v8722_v24 = vld [vmem:[#allocation15_spill] sm:$0xff]  ;;  %v5021_v1 = vld [vmem:[%s8469_s3 + $0x140] sm:$0xff] }
 0x44b   : > { %4388 = vadd.xlane.f32.xlu2 %v4387_v7  ;;  %4576 = vadd.xlane.f32.xlu0 %v4575_v59  ;;  %v4069_v26 = vpop.f32.mrf.mxu0  ;;  %v4176_v32 = vpop.f32.mrf.mxu1  ;;  %v8165_v38 = vld [vmem:[%s5412_s17 + $0x278] sm:$0xff]  ;;  %v3953_v7 = vsel %vm1065_vm1, %v3948_v36, %v3952_v20  ;;  %v4312_v59 = vld [vmem:[%s8469_s3 + $0x50] sm:$0xff] }
 0x44c   : > { %v4245_v49 = vadd.f32 %v4174_v57, %v3778_v58  ;;  %3649 = vmatmul.f32.gmra.mxu2 %v3480_v35  ;;  %v4177_v39 = vadd.f32 %v4176_v32, %v4069_v26  ;;  %v3130_v57 = vadd.f32 %v8722_v24, %v8721_v40  ;;  %v3951_v58 = vsel %vm1065_vm1, %v3946_v61, %v3950_v13 }
 0x44d   : > { %3756 = vmatmul.f32.gmra.mxu3 %v3482_v4  ;;  %v3487_v4 = vrot.slane %v8160_v16, 1  ;;  %v3489_v28 = vrot.slane %v8165_v38, 1  ;;  %v5022_v16 = vld [vmem:[%s8469_s3 + $0x148] sm:$0xff] }
 0x44e   : > { %v4279_v41 = vadd.f32 %v7897_v5, %v4245_v49  ;;  %v3602_v15 = vpop.f32.mrf.mxu2  ;;  %4116 = vmatmul.f32.gmra.mxu0 %v3947_v3  ;;  %4223 = vmatmul.f32.gmra.mxu1 %v3949_v56  ;;  %v3197_v18 = vadd.f32 %v3130_v57, %v8723_v52  ;;  %v3956_v49 = vrot.slane %v8165_v38, 2  ;;  %v8726_v38 = vld [vmem:[#allocation16_spill] sm:$0xff] }
 0x44f   : > { %v3709_v55 = vpop.f32.mrf.mxu3 }
 0x450   : > { %v3710_v11 = vadd.f32 %v3709_v55, %v3602_v15  ;;  %v4530_v47 = vmul.f32 %v5020_v53, %v4279_v41  ;;  %v4341_v21 = vmul.f32 %v4311_v34, %v4279_v41  ;;  %v3488_v53 = vsel %vm413_vm0, %v3483_v0, %v3487_v4  ;;  %v3276_v15 = vld [vmem:[%s5412_s17 + $0x280] sm:$0x1] }
 0x451   : > { %v8724_v55 = vld [vmem:[#allocation52_spill] sm:$0xff]  ;;  %v3491_v40 = vrot.slane %v3276_v15, 1 }
 0x452   : > { %v3779_v12 = vadd.f32 %v3710_v11, %v3196_v51  ;;  %v4578_v8 = vsel %vm4362_vm2, %v4530_v47, 0.0  ;;  %v4390_v27 = vsel %vm4362_vm2, %v4341_v21, 0.0  ;;  %v3490_v51 = vsel %vm413_vm0, %v3485_v48, %v3489_v28  ;;  %v8725_v11 = vld [vmem:[#allocation53_spill] sm:$0xff]  ;;  %v4313_v48 = vld [vmem:[%s8469_s3 + $0x58] sm:$0xff] }
 0x453   : > { %4579 = vadd.xlane.f32.xlu1 %v4578_v8  ;;  %4391 = vadd.xlane.f32.xlu0 %v4390_v27  ;;  %v4072_v35 = vpop.f32.mrf.mxu0  ;;  %v4179_v29 = vpop.f32.mrf.mxu1  ;;  %v3277_v47 = vld [vmem:[%s5412_s17 + $0x288] sm:$0x1]  ;;  %v3957_v8 = vsel %vm1065_vm1, %v3952_v20, %v3956_v49  ;;  %v3801_v27 = vld [vmem:[%s5412_s17 + $0x280] sm:$0x3] }
 0x454   : > { %v4246_v22 = vadd.f32 %v4177_v39, %v3779_v12  ;;  %3652 = vmatmul.f32.gmra.mxu2 %v3484_v50  ;;  %v4180_v32 = vadd.f32 %v4179_v29, %v4072_v35  ;;  %v3133_v39 = vadd.f32 %v8725_v11, %v8724_v55  ;;  %v3955_v12 = vsel %vm1065_vm1, %v3950_v13, %v3954_v60 }
 0x455   : > { %3759 = vmatmul.f32.gmra.mxu3 %v3486_v19  ;;  %v3802_v19 = vld [vmem:[%s5412_s17 + $0x288] sm:$0x3]  ;;  %v3493_v57 = vrot.slane %v3277_v47, 1  ;;  %v3958_v20 = vrot.slane %v3801_v27, 2  ;;  %s216_s17 = scalar_lea.vmem [#allocation2], %s215_s12 }
 0x456   : > { %v4280_v23 = vadd.f32 %v7897_v5, %v4246_v22  ;;  %v3605_v61 = vpop.f32.mrf.mxu2  ;;  %4119 = vmatmul.f32.gmra.mxu0 %v3951_v58  ;;  %4226 = vmatmul.f32.gmra.mxu1 %v3953_v7  ;;  %v3198_v22 = vadd.f32 %v3133_v39, %v8726_v38  ;;  %v3960_v29 = vrot.slane %v3802_v19, 2  ;;  %v5024_v19 = vld [vmem:[%s8469_s3 + $0x158] sm:$0xff]  ;;  %s4693_s25 = sshll.u32 %s216_s17, 4  ;;  %s4694_s25 = int_to_ptr.vmem [resolvable:$true] %s4693_s25 }
 0x457   : > { %v3712_v36 = vpop.f32.mrf.mxu3 }
 0x458   : > { %v3713_v26 = vadd.f32 %v3712_v36, %v3605_v61  ;;  %v4531_v3 = vmul.f32 %v5021_v1, %v4280_v23  ;;  %v4342_v56 = vmul.f32 %v4312_v59, %v4280_v23  ;;  %v3492_v23 = vsel %vm413_vm0, %v3487_v4, %v3491_v40 }
 0x459   : > { %v3494_v36 = vsel %vm413_vm0, %v3489_v28, %v3493_v57  ;;  %v3961_v4 = vsel %vm1065_vm1, %v3956_v49, %v3960_v29  ;;  %v4314_v28 = vld [vmem:[%s8469_s3 + $0x60] sm:$0xff]  ;;  %v3142_v29 = vadd.f32 %v7658_v17, %v7656_v10 }
 0x45a   : > { %v3780_v34 = vadd.f32 %v3713_v26, %v3197_v18  ;;  %v4581_v41 = vsel %vm4362_vm2, %v4531_v3, 0.0  ;;  %v4393_v14 = vsel %vm4362_vm2, %v4342_v56, 0.0  ;;  %v8727_v26 = vld [vmem:[#allocation17_spill] sm:$0xff] }
 0x45b   : > { %4582 = vadd.xlane.f32.xlu2 %v4581_v41  ;;  %4394 = vadd.xlane.f32.xlu1 %v4393_v14  ;;  %v4075_v50 = vpop.f32.mrf.mxu0  ;;  %v4182_v0 = vpop.f32.mrf.mxu1  ;;  %v3959_v41 = vsel %vm1065_vm1, %v3954_v60, %v3958_v20  ;;  %v5023_v14 = vld [vmem:[%s8469_s3 + $0x150] sm:$0xff] }
 0x45c   : > { %v4247_v21 = vadd.f32 %v4180_v32, %v3780_v34  ;;  %3655 = vmatmul.f32.gmra.mxu2 %v3488_v53  ;;  %v4183_v7 = vadd.f32 %v4182_v0, %v4075_v50  ;;  %v8728_v32 = vld [vmem:[#allocation54_spill] sm:$0xff] }
 0x45d   : > { %3762 = vmatmul.f32.gmra.mxu3 %v3490_v51  ;;  %v3136_v3 = vadd.f32 %v8728_v32, %v8727_v26 }
 0x45e   : > { %v4281_v24 = vadd.f32 %v7897_v5, %v4247_v21  ;;  %v3608_v13 = vpop.f32.mrf.mxu2  ;;  %4122 = vmatmul.f32.gmra.mxu0 %v3955_v12  ;;  %4229 = vmatmul.f32.gmra.mxu1 %v3957_v8  ;;  %v3139_v12 = vadd.f32 %v7643_v44, %v7641_v33 }
 0x45f   : > { %v3715_v35 = vpop.f32.mrf.mxu3  ;;  %v3199_v15 = vadd.f32 %v3136_v3, %v7635_v45 }
 0x460   : > { %v3716_v58 = vadd.f32 %v3715_v35, %v3608_v13  ;;  %v4343_v1 = vmul.f32 %v4313_v48, %v4281_v24  ;;  %v4532_v59 = vmul.f32 %v5022_v16, %v4281_v24  ;;  %v4315_v48 = vld [vmem:[%s8469_s3 + $0x68] sm:$0xff]  ;;  %v3200_v40 = vadd.f32 %v3139_v12, %v7650_v31  ;;  %v4316_v31 = vld [vmem:[%s8469_s3 + $0x70] sm:$0xff]  ;;  %v8731_v12 = vld [vmem:[#allocation56_spill] sm:$0xff] }
 0x462   : > { %v3781_v52 = vadd.f32 %v3716_v58, %v3198_v22  ;;  %v4396_v18 = vsel %vm4362_vm2, %v4343_v1, 0.0  ;;  %v4584_v61 = vsel %vm4362_vm2, %v4532_v59, 0.0  ;;  %v5025_v59 = vld [vmem:[%s8469_s3 + $0x160] sm:$0xff] }
 0x463   : > { %4397 = vadd.xlane.f32.xlu2 %v4396_v18  ;;  %4585 = vadd.xlane.f32.xlu0 %v4584_v61  ;;  %v4078_v53 = vpop.f32.mrf.mxu0  ;;  %v4185_v34 = vpop.f32.mrf.mxu1 }
 0x464   : > { %v4248_v56 = vadd.f32 %v4183_v7, %v3781_v52  ;;  %3658 = vmatmul.f32.gmra.mxu2 %v3492_v23  ;;  %v4186_v39 = vadd.f32 %v4185_v34, %v4078_v53  ;;  %v3201_v52 = vadd.f32 %v3142_v29, %v7665_v25  ;;  %v3145_v53 = vadd.f32 %v7673_v54, %v7671_v30  ;;  %v5026_v25 = vld [vmem:[%s8469_s3 + $0x168] sm:$0xff] }
 0x465   : > { %3765 = vmatmul.f32.gmra.mxu3 %v3494_v36 }
 0x466   : > { %v4282_v51 = vadd.f32 %v7897_v5, %v4248_v56  ;;  %v3611_v55 = vpop.f32.mrf.mxu2  ;;  %4125 = vmatmul.f32.gmra.mxu0 %v3959_v41  ;;  %4232 = vmatmul.f32.gmra.mxu1 %v3961_v4 }
 0x467   : > { %v3718_v11 = vpop.f32.mrf.mxu3 }
 0x468   : > { %v3719_v60 = vadd.f32 %v3718_v11, %v3611_v55  ;;  %v4533_v49 = vmul.f32 %v5023_v14, %v4282_v51  ;;  %v4344_v47 = vmul.f32 %v4314_v28, %v4282_v51  ;;  %v4317_v14 = vld [vmem:[%s8469_s3 + $0x78] sm:$0xff] }
 0x46a   : > { %v3782_v21 = vadd.f32 %v3719_v60, %v3199_v15  ;;  %v4587_v50 = vsel %vm4362_vm2, %v4533_v49, 0.0  ;;  %v4399_v0 = vsel %vm4362_vm2, %v4344_v47, 0.0  ;;  %v8729_v15 = vld [vmem:[#allocation55_spill] sm:$0xff] }
 0x46b   : > { %4588 = vadd.xlane.f32.xlu1 %v4587_v50  ;;  %4400 = vadd.xlane.f32.xlu0 %v4399_v0  ;;  %v4081_v45 = vpop.f32.mrf.mxu0  ;;  %v4188_v27 = vpop.f32.mrf.mxu1  ;;  %v3202_v55 = vadd.f32 %v3145_v53, %v8729_v15  ;;  %v8730_v0 = vld [vmem:[#allocation18_spill] sm:$0xff] }
 0x46c   : > { %v4249_v8 = vadd.f32 %v4186_v39, %v3782_v21  ;;  %v4189_v44 = vadd.f32 %v4188_v27, %v4081_v45 }
 0x46e   : > { %v4283_v16 = vadd.f32 %v7897_v5, %v4249_v8  ;;  %v3614_v24 = vpop.f32.mrf.mxu2  ;;  %v3148_v8 = vadd.f32 %v8731_v12, %v8730_v0  ;;  %v8736_v12 = vld [vmem:[#allocation23_spill] sm:$0xff] }
 0x46f   : > { %v3721_v57 = vpop.f32.mrf.mxu3 }
 0x470   : > { %v3722_v33 = vadd.f32 %v3721_v57, %v3614_v24  ;;  %v4534_v38 = vmul.f32 %v5024_v19, %v4283_v16  ;;  %v4345_v22 = vmul.f32 %v4315_v48, %v4283_v16  ;;  %v5027_v16 = vld [vmem:[%s8469_s3 + $0x170] sm:$0xff] }
 0x472   : > { %v3783_v13 = vadd.f32 %v3722_v33, %v3200_v40  ;;  %v4590_v35 = vsel %vm4362_vm2, %v4534_v38, 0.0  ;;  %v4402_v20 = vsel %vm4362_vm2, %v4345_v22, 0.0  ;;  %v4318_v40 = vld [vmem:[%s8469_s3 + $0x80] sm:$0xff] }
 0x473   : > { %4591 = vadd.xlane.f32.xlu2 %v4590_v35  ;;  %4403 = vadd.xlane.f32.xlu1 %v4402_v20  ;;  %v4084_v7 = vpop.f32.mrf.mxu0  ;;  %v4191_v1 = vpop.f32.mrf.mxu1 }
 0x474   : > { %v4250_v58 = vadd.f32 %v4189_v44, %v3783_v13  ;;  %v4192_v17 = vadd.f32 %v4191_v1, %v4084_v7  ;;  %v3203_v44 = vadd.f32 %v3148_v8, %v7695_v6 }
 0x476   : > { %v4284_v23 = vadd.f32 %v7897_v5, %v4250_v58  ;;  %v3617_v18 = vpop.f32.mrf.mxu2 }
 0x477   : > { %v3724_v61 = vpop.f32.mrf.mxu3 }
 0x478   : > { %v3725_v10 = vadd.f32 %v3724_v61, %v3617_v18  ;;  %v4346_v36 = vmul.f32 %v4316_v31, %v4284_v23  ;;  %v4535_v26 = vmul.f32 %v5025_v59, %v4284_v23  ;;  %v8732_v23 = vld [vmem:[#allocation19_spill] sm:$0xff]  ;;  %v4319_v61 = vld [vmem:[%s8469_s3 + $0x88] sm:$0xff] }
 0x47a   : > { %v3784_v32 = vadd.f32 %v3725_v10, %v3201_v52  ;;  %v4405_v3 = vsel %vm4362_vm2, %v4346_v36, 0.0  ;;  %v4593_v56 = vsel %vm4362_vm2, %v4535_v26, 0.0  ;;  %v3151_v52 = vadd.f32 %v8732_v23, %v7701_v63  ;;  %v5028_v10 = vld [vmem:[%s8469_s3 + $0x178] sm:$0xff]  ;;  %v8278_v26 = vld [vmem:[%s8468_s2] ss:$0 sm:$0xff] }
 0x47b   : > { %4406 = vadd.xlane.f32.xlu2 %v4405_v3  ;;  %4594 = vadd.xlane.f32.xlu0 %v4593_v56  ;;  %v4087_v41 = vpop.f32.mrf.mxu0  ;;  %v4194_v4 = vpop.f32.mrf.mxu1 }
 0x47c   : > { %v4251_v34 = vadd.f32 %v4192_v17, %v3784_v32  ;;  %v4195_v60 = vadd.f32 %v4194_v4, %v4087_v41  ;;  %v8733_v32 = vld [vmem:[#allocation20_spill] sm:$0xff] }
 0x47d   : > { %v3204_v3 = vadd.f32 %v3151_v52, %v8733_v32 }
 0x47e   : > { %v4365_v28 = vpop.xlane.xlu0 %4364  ;;  %v4285_v51 = vadd.f32 %v7897_v5, %v4251_v34  ;;  %v3620_v11 = vpop.f32.mrf.mxu2 }
 0x47f   : > { %v3727_v30 = vpop.f32.mrf.mxu3  ;;  %v4553_v48 = vpop.xlane.xlu1 %4552 }
 0x480   : > { %v3728_v54 = vadd.f32 %v3727_v30, %v3620_v11  ;;  %v4536_v39 = vmul.f32 %v5026_v25, %v4285_v51  ;;  %v4347_v49 = vmul.f32 %v4317_v14, %v4285_v51  ;;  %v8734_v11 = vld [vmem:[#allocation21_spill] sm:$0xff]  ;;  %v8735_v30 = vld [vmem:[#allocation22_spill] sm:$0xff] }
 0x482   : > { %v3785_v47 = vadd.f32 %v3728_v54, %v3202_v55  ;;  %v4596_v21 = vsel %vm4362_vm2, %v4536_v39, 0.0  ;;  %v4408_v50 = vsel %vm4362_vm2, %v4347_v49, 0.0  ;;  %v3154_v54 = vadd.f32 %v8735_v30, %v8734_v11 }
 0x483   : > { %4597 = vadd.xlane.f32.xlu1 %v4596_v21  ;;  %4409 = vadd.xlane.f32.xlu0 %v4408_v50  ;;  %v4090_v27 = vpop.f32.mrf.mxu0  ;;  %v4197_v19 = vpop.f32.mrf.mxu1  ;;  %v4320_v21 = vld [vmem:[%s8469_s3 + $0x90] sm:$0xff] }
 0x484   : > { %v4252_v45 = vadd.f32 %v4195_v60, %v3785_v47  ;;  %v4198_v29 = vadd.f32 %v4197_v19, %v4090_v27  ;;  %v5029_v47 = vld [vmem:[%s8469_s3 + $0x180] sm:$0xff]  ;;  %v3205_v8 = vadd.f32 %v3154_v54, %v8736_v12 }
 0x486   : > { %v4556_v24 = vpop.xlane.xlu2 %4555  ;;  %v4368_v57 = vpop.xlane.xlu0 %4367  ;;  %v4286_v33 = vadd.f32 %v7897_v5, %v4252_v45 }
 0x487   : > { %v4641_v38 = vadd.f32 %v4556_v24, %v4553_v48  ;;  %v4453_v22 = vadd.f32 %v4368_v57, %v4365_v28  ;;  %v3623_v13 = vpop.f32.mrf.mxu2  ;;  %v3730_v35 = vpop.f32.mrf.mxu3 }
 0x488   : > { %v3731_v20 = vadd.f32 %v3730_v35, %v3623_v13  ;;  %v4537_v58 = vmul.f32 %v5027_v16, %v4286_v33  ;;  %v4348_v7 = vmul.f32 %v4318_v40, %v4286_v33 }
 0x48a   : > { %v3786_v1 = vadd.f32 %v3731_v20, %v3203_v44  ;;  %v4599_v31 = vsel %vm4362_vm2, %v4537_v58, 0.0  ;;  %v4411_v59 = vsel %vm4362_vm2, %v4348_v7, 0.0  ;;  %v5030_v58 = vld [vmem:[%s8469_s3 + $0x188] sm:$0xff]  ;;  %v4321_v7 = vld [vmem:[%s8469_s3 + $0x98] sm:$0xff] }
 0x48b   : > { %4600 = vadd.xlane.f32.xlu2 %v4599_v31  ;;  %4412 = vadd.xlane.f32.xlu1 %v4411_v59  ;;  %v4093_v6 = vpop.f32.mrf.mxu0  ;;  %v4200_v18 = vpop.f32.mrf.mxu1 }
 0x48c   : > { %v4253_v5 = vadd.f32 %v4198_v29, %v3786_v1  ;;  %v4201_v25 = vadd.f32 %v4200_v18, %v4093_v6 }
 0x48e   : > { %v4371_v17 = vpop.xlane.xlu1 %4370  ;;  %v4559_v36 = vpop.xlane.xlu0 %4558  ;;  %v4287_v63 = vadd.f32 %v8278_v26, %v4253_v5 }
 0x48f   : > { %v4454_v56 = vadd.f32 %v4453_v22, %v4371_v17  ;;  %v4642_v53 = vadd.f32 %v4641_v38, %v4559_v36  ;;  %v3626_v34 = vpop.f32.mrf.mxu2  ;;  %v3733_v41 = vpop.f32.mrf.mxu3  ;;  %v8737_v38 = vld [vmem:[#allocation24_spill] sm:$0xff]  ;;  %v8738_v22 = vld [vmem:[#allocation25_spill] sm:$0xff] }
 0x490   : > { %v3734_v4 = vadd.f32 %v3733_v41, %v3626_v34  ;;  %v4349_v14 = vmul.f32 %v4319_v61, %v4287_v63  ;;  %v4538_v28 = vmul.f32 %v5028_v10, %v4287_v63  ;;  %v3157_v13 = vadd.f32 %v8738_v22, %v8737_v38  ;;  %v8740_v34 = vld [vmem:[#allocation27_spill] sm:$0xff] }
 0x492   : > { %v3787_v51 = vadd.f32 %v3734_v4, %v3204_v3  ;;  %v4414_v15 = vsel %vm4362_vm2, %v4349_v14, 0.0  ;;  %v4602_v55 = vsel %vm4362_vm2, %v4538_v28, 0.0  ;;  %v3206_v23 = vadd.f32 %v3157_v13, %v7740_v37  ;;  %v5031_v14 = vld [vmem:[%s8469_s3 + $0x190] sm:$0xff] }
 0x493   : > { %4415 = vadd.xlane.f32.xlu2 %v4414_v15  ;;  %4603 = vadd.xlane.f32.xlu0 %v4602_v55  ;;  %v4096_v39 = vpop.f32.mrf.mxu0  ;;  %v4203_v49 = vpop.f32.mrf.mxu1 }
 0x494   : > { %v4254_v60 = vadd.f32 %v4201_v25, %v3787_v51  ;;  %v4204_v16 = vadd.f32 %v4203_v49, %v4096_v39 }
 0x496   : > { %v4374_v50 = vpop.xlane.xlu1 %4373  ;;  %v4288_v0 = vadd.f32 %v8278_v26, %v4254_v60 }
 0x497   : > { %v4455_v45 = vadd.f32 %v4454_v56, %v4374_v50  ;;  %v3629_v27 = vpop.f32.mrf.mxu2  ;;  %v3736_v19 = vpop.f32.mrf.mxu3  ;;  %v8739_v56 = vld [vmem:[#allocation26_spill] sm:$0xff] }
 0x498   : > { %v3737_v48 = vadd.f32 %v3736_v19, %v3629_v27  ;;  %v4539_v40 = vmul.f32 %v5029_v47, %v4288_v0  ;;  %v4350_v24 = vmul.f32 %v4320_v21, %v4288_v0  ;;  %v3160_v41 = vadd.f32 %v8740_v34, %v8739_v56  ;;  %v8741_v19 = vld [vmem:[#allocation28_spill] sm:$0xff] }
 0x49a   : > { %v3788_v57 = vadd.f32 %v3737_v48, %v3205_v8  ;;  %v4605_v33 = vsel %vm4362_vm2, %v4539_v40, 0.0  ;;  %v4417_v44 = vsel %vm4362_vm2, %v4350_v24, 0.0  ;;  %v3207_v55 = vadd.f32 %v3160_v41, %v7755_v2  ;;  %v8742_v2 = vld [vmem:[#allocation29_spill] sm:$0xff] }
 0x49b   : > { %4606 = vadd.xlane.f32.xlu1 %v4605_v33  ;;  %4418 = vadd.xlane.f32.xlu0 %v4417_v44  ;;  %v4099_v20 = vpop.f32.mrf.mxu0  ;;  %v4206_v29 = vpop.f32.mrf.mxu1  ;;  %v3163_v48 = vadd.f32 %v8742_v2, %v8741_v19  ;;  %v4323_v40 = vld [vmem:[%s8469_s3 + $0xa8] sm:$0xff] }
 0x49c   : > { %v4255_v35 = vadd.f32 %v4204_v16, %v3788_v57  ;;  %v4207_v10 = vadd.f32 %v4206_v29, %v4099_v20  ;;  %v5032_v16 = vld [vmem:[%s8469_s3 + $0x198] sm:$0xff] }
 0x49e   : > { %v4377_v1 = vpop.xlane.xlu2 %4376  ;;  %v4562_v31 = vpop.xlane.xlu1 %4561  ;;  %v4289_v59 = vadd.f32 %v8278_v26, %v4255_v35 }
 0x49f   : > { %v4456_v52 = vadd.f32 %v4455_v45, %v4377_v1  ;;  %v4643_v5 = vadd.f32 %v4642_v53, %v4562_v31  ;;  %v3632_v6 = vpop.f32.mrf.mxu2  ;;  %v3739_v18 = vpop.f32.mrf.mxu3  ;;  %v4322_v53 = vld [vmem:[%s8469_s3 + $0xa0] sm:$0xff] }
 0x4a0   : > { %v3740_v61 = vadd.f32 %v3739_v18, %v3632_v6  ;;  %v4540_v17 = vmul.f32 %v5030_v58, %v4289_v59  ;;  %v4351_v36 = vmul.f32 %v4321_v7, %v4289_v59  ;;  %v3208_v58 = vadd.f32 %v3163_v48, %v7770_v42  ;;  %v8743_v6 = vld [vmem:[#allocation30_spill] sm:$0xff] }
 0x4a1   : > { %v4324_v42 = vld [vmem:[%s8469_s3 + $0xb0] sm:$0xff] }
 0x4a2   : > { %v3789_v63 = vadd.f32 %v3740_v61, %v3206_v23  ;;  %v4608_v32 = vsel %vm4362_vm2, %v4540_v17, 0.0  ;;  %v4420_v3 = vsel %vm4362_vm2, %v4351_v36, 0.0 }
 0x4a3   : > { %4609 = vadd.xlane.f32.xlu2 %v4608_v32  ;;  %4421 = vadd.xlane.f32.xlu1 %v4420_v3  ;;  %v4102_v37 = vpop.f32.mrf.mxu0  ;;  %v4209_v25 = vpop.f32.mrf.mxu1  ;;  %v5033_v32 = vld [vmem:[%s8469_s3 + $0x1a0] sm:$0xff] }
 0x4a4   : > { %v4256_v4 = vadd.f32 %v4207_v10, %v3789_v63  ;;  %v4210_v39 = vadd.f32 %v4209_v25, %v4102_v37 }
 0x4a6   : > { %v4565_v28 = vpop.xlane.xlu2 %4564  ;;  %v4568_v51 = vpop.xlane.xlu0 %4567  ;;  %v4290_v15 = vadd.f32 %v8278_v26, %v4256_v4 }
 0x4a7   : > { %v4644_v11 = vadd.f32 %v4643_v5, %v4565_v28  ;;  %v3635_v30 = vpop.f32.mrf.mxu2  ;;  %v3742_v54 = vpop.f32.mrf.mxu3 }
 0x4a8   : > { %v3743_v60 = vadd.f32 %v3742_v54, %v3635_v30  ;;  %v4352_v49 = vmul.f32 %v4322_v53, %v4290_v15  ;;  %v4541_v47 = vmul.f32 %v5031_v14, %v4290_v15  ;;  %v8746_v30 = vld [vmem:[#allocation33_spill] sm:$0xff] }
 0x4a9   : > { %v4645_v21 = vadd.f32 %v4644_v11, %v4568_v51  ;;  %v8745_v11 = vld [vmem:[#allocation32_spill] sm:$0xff] }
 0x4aa   : > { %v3790_v50 = vadd.f32 %v3743_v60, %v3207_v55  ;;  %v4423_v0 = vsel %vm4362_vm2, %v4352_v49, 0.0  ;;  %v4611_v12 = vsel %vm4362_vm2, %v4541_v47, 0.0  ;;  %v3169_v54 = vadd.f32 %v8746_v30, %v8745_v11 }
 0x4ab   : > { %4424 = vadd.xlane.f32.xlu2 %v4423_v0  ;;  %4612 = vadd.xlane.f32.xlu0 %v4611_v12  ;;  %v4105_v45 = vpop.f32.mrf.mxu0  ;;  %v4212_v27 = vpop.f32.mrf.mxu1 }
 0x4ac   : > { %v4257_v8 = vadd.f32 %v4210_v39, %v3790_v50  ;;  %v4213_v31 = vadd.f32 %v4212_v27, %v4105_v45  ;;  %v4325_v50 = vld [vmem:[%s8469_s3 + $0xb8] sm:$0xff]  ;;  %v3210_v27 = vadd.f32 %v3169_v54, %v7800_v9 }
 0x4ae   : > { %v4380_v24 = vpop.xlane.xlu2 %4379  ;;  %v4571_v57 = vpop.xlane.xlu1 %4570  ;;  %v4291_v33 = vadd.f32 %v8278_v26, %v4257_v8 }
 0x4af   : > { %v4457_v44 = vadd.f32 %v4456_v52, %v4380_v24  ;;  %v4646_v38 = vadd.f32 %v4645_v21, %v4571_v57  ;;  %v3638_v22 = vpop.f32.mrf.mxu2  ;;  %v4383_v13 = vpop.xlane.xlu0 %4382  ;;  %v8744_v52 = vld [vmem:[#allocation31_spill] sm:$0xff]  ;;  %v5034_v21 = vld [vmem:[%s8469_s3 + $0x1a8] sm:$0xff] }
 0x4b0   : > { %v3745_v35 = vpop.f32.mrf.mxu3  ;;  %v4542_v20 = vmul.f32 %v5032_v16, %v4291_v33  ;;  %v4353_v29 = vmul.f32 %v4323_v40, %v4291_v33  ;;  %v3166_v18 = vadd.f32 %v8744_v52, %v8743_v6 }
 0x4b1   : > { %v4458_v7 = vadd.f32 %v4457_v44, %v4383_v13  ;;  %v3746_v1 = vadd.f32 %v3745_v35, %v3638_v22  ;;  %v8747_v44 = vld [vmem:[#allocation34_spill] sm:$0xff] }
 0x4b2   : > { %v4614_v59 = vsel %vm4362_vm2, %v4542_v20, 0.0  ;;  %v4426_v23 = vsel %vm4362_vm2, %v4353_v29, 0.0  ;;  %v3209_v4 = vadd.f32 %v3166_v18, %v7785_v46 }
 0x4b3   : > { %v3791_v5 = vadd.f32 %v3746_v1, %v3208_v58  ;;  %4615 = vadd.xlane.f32.xlu1 %v4614_v59  ;;  %4427 = vadd.xlane.f32.xlu0 %v4426_v23  ;;  %v4108_v61 = vpop.f32.mrf.mxu0  ;;  %v4215_v10 = vpop.f32.mrf.mxu1  ;;  %v5035_v58 = vld [vmem:[%s8469_s3 + $0x1b0] sm:$0xff] }
 0x4b4   : > { %v4216_v53 = vadd.f32 %v4215_v10, %v4108_v61 }
 0x4b5   : > { %v4258_v17 = vadd.f32 %v4213_v31, %v3791_v5 }
 0x4b6   : > { %v4574_v36 = vpop.xlane.xlu2 %4573  ;;  %v4386_v63 = vpop.xlane.xlu1 %4385 }
 0x4b7   : > { %v4647_v3 = vadd.f32 %v4646_v38, %v4574_v36  ;;  %v4459_v56 = vadd.f32 %v4458_v7, %v4386_v63  ;;  %v3641_v34 = vpop.f32.mrf.mxu2  ;;  %v4292_v41 = vadd.f32 %v8278_v26, %v4258_v17  ;;  %v8748_v38 = vld [vmem:[#allocation35_spill] sm:$0xff]  ;;  %v4326_v7 = vld [vmem:[%s8469_s3 + $0xc0] sm:$0xff] }
 0x4b8   : > { %v3748_v37 = vpop.f32.mrf.mxu3  ;;  %v3172_v22 = vadd.f32 %v8748_v38, %v8747_v44 }
 0x4b9   : > { %v3749_v25 = vadd.f32 %v3748_v37, %v3641_v34  ;;  %v4354_v14 = vmul.f32 %v4324_v42, %v4292_v41  ;;  %v4543_v28 = vmul.f32 %v5033_v32, %v4292_v41  ;;  %v8749_v42 = vld [vmem:[#allocation36_spill] sm:$0xff]  ;;  %v8750_v32 = vld [vmem:[#allocation37_spill] sm:$0xff] }
 0x4ba   : > { %v3211_v5 = vadd.f32 %v3172_v22, %v7815_v62  ;;  %v4327_v62 = vld [vmem:[%s8469_s3 + $0xc8] sm:$0xff]  ;;  %v5036_v37 = vld [vmem:[%s8469_s3 + $0x1b8] sm:$0xff] }
 0x4bb   : > { %v3792_v51 = vadd.f32 %v3749_v25, %v3209_v4  ;;  %v4429_v15 = vsel %vm4362_vm2, %v4354_v14, 0.0  ;;  %v4617_v55 = vsel %vm4362_vm2, %v4543_v28, 0.0  ;;  %v4111_v60 = vpop.f32.mrf.mxu0  ;;  %v4218_v39 = vpop.f32.mrf.mxu1  ;;  %v8751_v28 = vld [vmem:[#allocation38_spill] sm:$0xff]  ;;  %v8754_v22 = vld [vmem:[#allocation41_spill] sm:$0xff] }
 0x4bc   : > { %4430 = vadd.xlane.f32.xlu2 %v4429_v15  ;;  %4618 = vadd.xlane.f32.xlu0 %v4617_v55  ;;  %v4219_v48 = vadd.f32 %v4218_v39, %v4111_v60 }
 0x4bd   : > { %v4259_v49 = vadd.f32 %v4216_v53, %v3792_v51 }
 0x4be   : > { %v4389_v47 = vpop.xlane.xlu2 %4388  ;;  %v4577_v46 = vpop.xlane.xlu0 %4576 }
 0x4bf   : > { %v4460_v0 = vadd.f32 %v4459_v56, %v4389_v47  ;;  %v4648_v12 = vadd.f32 %v4647_v3, %v4577_v46  ;;  %v3644_v8 = vpop.f32.mrf.mxu2  ;;  %v4293_v45 = vadd.f32 %v8278_v26, %v4259_v49  ;;  %v3175_v3 = vadd.f32 %v8750_v32, %v8749_v42  ;;  %v8752_v47 = vld [vmem:[#allocation39_spill] sm:$0xff]  ;;  %v8753_v46 = vld [vmem:[#allocation40_spill] sm:$0xff]  ;;  %v8758_v42 = vld [vmem:[#allocation45_spill] sm:$0xff] }
 0x4c0   : > { %v3751_v19 = vpop.f32.mrf.mxu3 }
 0x4c1   : > { %v3752_v2 = vadd.f32 %v3751_v19, %v3644_v8  ;;  %v4544_v16 = vmul.f32 %v5034_v21, %v4293_v45  ;;  %v4355_v40 = vmul.f32 %v4325_v50, %v4293_v45  ;;  %v3212_v51 = vadd.f32 %v3175_v3, %v8751_v28  ;;  %v5037_v8 = vld [vmem:[%s8469_s3 + $0x1c0] sm:$0xff]  ;;  %v4328_v45 = vld [vmem:[%s8469_s3 + $0xd0] sm:$0xff] }
 0x4c2   : > { %v3178_v21 = vadd.f32 %v8753_v46, %v8752_v47  ;;  %v4331_v47 = vld [vmem:[%s8469_s3 + $0xe8] sm:$0xff] }
 0x4c3   : > { %v3793_v24 = vadd.f32 %v3752_v2, %v3210_v27  ;;  %v4620_v57 = vsel %vm4362_vm2, %v4544_v16, 0.0  ;;  %v4432_v33 = vsel %vm4362_vm2, %v4355_v40, 0.0  ;;  %v4114_v13 = vpop.f32.mrf.mxu0  ;;  %v4221_v35 = vpop.f32.mrf.mxu1 }
 0x4c4   : > { %4621 = vadd.xlane.f32.xlu2 %v4620_v57  ;;  %4433 = vadd.xlane.f32.xlu1 %v4432_v33  ;;  %v4222_v18 = vadd.f32 %v4221_v35, %v4114_v13  ;;  %v3213_v2 = vadd.f32 %v3178_v21, %v7845_v43  ;;  %v8755_v13 = vld [vmem:[#allocation42_spill] sm:$0xff] }
 0x4c5   : > { %v4260_v20 = vadd.f32 %v4219_v48, %v3793_v24  ;;  %v3181_v35 = vadd.f32 %v8755_v13, %v8754_v22  ;;  %v5038_v43 = vld [vmem:[%s8469_s3 + $0x1c8] sm:$0xff] }
 0x4c6   : > { %v4580_v29 = vpop.xlane.xlu1 %4579  ;;  %v4392_v9 = vpop.xlane.xlu0 %4391 }
 0x4c7   : > { %v4649_v1 = vadd.f32 %v4648_v12, %v4580_v29  ;;  %v8364_v31 = vadd.f32 %v4460_v0, %v4392_v9  ;;  %v3647_v59 = vpop.f32.mrf.mxu2  ;;  %v4294_v23 = vadd.f32 %v8278_v26, %v4260_v20 }
 0x4c8   : > { %v3754_v6 = vpop.f32.mrf.mxu3 }
 0x4c9   : > { %v3755_v52 = vadd.f32 %v3754_v6, %v3647_v59  ;;  %v4545_v61 = vmul.f32 %v5035_v58, %v4294_v23  ;;  %v4356_v10 = vmul.f32 %v4326_v7, %v4294_v23  ;;  %v4329_v58 = vld [vmem:[%s8469_s3 + $0xd8] sm:$0xff] }
 0x4ca   : > { %v8756_v59 = vld [vmem:[#allocation43_spill] sm:$0xff] }
 0x4cb   : > { %v3794_v17 = vadd.f32 %v3755_v52, %v3211_v5  ;;  %v4623_v36 = vsel %vm4362_vm2, %v4545_v61, 0.0  ;;  %v4435_v63 = vsel %vm4362_vm2, %v4356_v10, 0.0  ;;  %v4117_v56 = vpop.f32.mrf.mxu0  ;;  %v4224_v34 = vpop.f32.mrf.mxu1  ;;  %v3214_v23 = vadd.f32 %v3181_v35, %v8756_v59 }
 0x4cc   : > { %4624 = vadd.xlane.f32.xlu1 %v4623_v36  ;;  %4436 = vadd.xlane.f32.xlu0 %v4435_v63  ;;  %v4225_v11 = vadd.f32 %v4224_v34, %v4117_v56  ;;  %v8757_v63 = vld [vmem:[#allocation44_spill] sm:$0xff] }
 0x4cd   : > { %v4261_v41 = vadd.f32 %v4222_v18, %v3794_v17  ;;  %v3184_v32 = vadd.f32 %v8758_v42, %v8757_v63 }
 0x4ce   : > { %v4583_v4 = vpop.xlane.xlu2 %4582 }
 0x4cf   : > { %v8378_v25 = vadd.f32 %v4649_v1, %v4583_v4  ;;  %v3650_v53 = vpop.f32.mrf.mxu2  ;;  %v4295_v14 = vadd.f32 %v8278_v26, %v4261_v41  ;;  %v4330_v41 = vld [vmem:[%s8469_s3 + $0xe0] sm:$0xff]  ;;  %v5039_v4 = vld [vmem:[%s8469_s3 + $0x1d0] sm:$0xff] }
 0x4d0   : > { %v3757_v15 = vpop.f32.mrf.mxu3 }
 0x4d1   : > { %v3758_v55 = vadd.f32 %v3757_v15, %v3650_v53  ;;  %v4357_v30 = vmul.f32 %v4327_v62, %v4295_v14  ;;  %v4546_v54 = vmul.f32 %v5036_v37, %v4295_v14  ;;  %v8759_v53 = vld [vmem:[#allocation57_spill] sm:$0xff] }
 0x4d2   : > { %v3215_v14 = vadd.f32 %v3184_v32, %v8759_v53 }
 0x4d3   : > { %v3795_v60 = vadd.f32 %v3758_v55, %v3212_v51  ;;  %v4438_v39 = vsel %vm4362_vm2, %v4357_v30, 0.0  ;;  %v4626_v49 = vsel %vm4362_vm2, %v4546_v54, 0.0  ;;  %v4120_v50 = vpop.f32.mrf.mxu0  ;;  %v4227_v0 = vpop.f32.mrf.mxu1 }
 0x4d4   : > { %4439 = vadd.xlane.f32.xlu2 %v4438_v39  ;;  %4627 = vadd.xlane.f32.xlu0 %v4626_v49  ;;  %v4228_v40 = vadd.f32 %v4227_v0, %v4120_v50  ;;  %v5040_v49 = vld [vmem:[%s8469_s3 + $0x1d8] sm:$0xff] }
 0x4d5   : > { %v4262_v12 = vadd.f32 %v4225_v11, %v3795_v60 }
 0x4d7   : > { %v3653_v27 = vpop.f32.mrf.mxu2  ;;  %v4296_v19 = vadd.f32 %v8278_v26, %v4262_v12 }
 0x4d8   : > { %v3760_v48 = vpop.f32.mrf.mxu3 }
 0x4d9   : > { %v3761_v16 = vadd.f32 %v3760_v48, %v3653_v27  ;;  %v4547_v24 = vmul.f32 %v5037_v8, %v4296_v19  ;;  %v4358_v57 = vmul.f32 %v4328_v45, %v4296_v19  ;;  %v4586_v8 = vpop.xlane.xlu0 %4585  ;;  %v4395_v45 = vpop.xlane.xlu1 %4394 }
 0x4da   : > { %v4398_v27 = vpop.xlane.xlu2 %4397 }
 0x4db   : > { %v3796_v33 = vadd.f32 %v3761_v16, %v3213_v2  ;;  %v4629_v44 = vsel %vm4362_vm2, %v4547_v24, 0.0  ;;  %v4441_v38 = vsel %vm4362_vm2, %v4358_v57, 0.0  ;;  %v4123_v20 = vpop.f32.mrf.mxu0  ;;  %v4230_v29 = vpop.f32.mrf.mxu1 }
 0x4dc   : > { %4630 = vadd.xlane.f32.xlu2 %v4629_v44  ;;  %4442 = vadd.xlane.f32.xlu1 %v4441_v38  ;;  %v4231_v52 = vadd.f32 %v4230_v29, %v4123_v20 }
 0x4dd   : > { %v4263_v9 = vadd.f32 %v4228_v40, %v3796_v33 }
 0x4df   : > { %v3656_v7 = vpop.f32.mrf.mxu2  ;;  %v4297_v1 = vadd.f32 %v8278_v26, %v4263_v9 }
 0x4e0   : > { %v3763_v5 = vpop.f32.mrf.mxu3 }
 0x4e1   : > { %v3764_v6 = vadd.f32 %v3763_v5, %v3656_v7  ;;  %v4548_v18 = vmul.f32 %v5038_v43, %v4297_v1  ;;  %v4359_v61 = vmul.f32 %v4329_v58, %v4297_v1  ;;  %v4401_v19 = vpop.xlane.xlu0 %4400  ;;  %v4589_v2 = vpop.xlane.xlu1 %4588 }
 0x4e3   : > { %v3797_v10 = vadd.f32 %v3764_v6, %v3214_v23  ;;  %v4632_v17 = vsel %vm4362_vm2, %v4548_v18, 0.0  ;;  %v4444_v36 = vsel %vm4362_vm2, %v4359_v61, 0.0  ;;  %v4126_v56 = vpop.f32.mrf.mxu0  ;;  %v4233_v34 = vpop.f32.mrf.mxu1  ;;  %v4462_v23 = vadd.f32 %v8364_v31, %v4395_v45 }
 0x4e4   : > { %4633 = vadd.xlane.f32.xlu1 %v4632_v17  ;;  %4445 = vadd.xlane.f32.xlu0 %v4444_v36  ;;  %v4234_v15 = vadd.f32 %v4233_v34, %v4126_v56 }
 0x4e5   : > { %v4264_v3 = vadd.f32 %v4231_v52, %v3797_v10  ;;  %v4463_v6 = vadd.f32 %v4462_v23, %v4398_v27  ;;  %v4651_v52 = vadd.f32 %v8378_v25, %v4586_v8 }
 0x4e6   : > { %v4592_v48 = vpop.xlane.xlu2 %4591 }
 0x4e7   : > { %v3659_v62 = vpop.f32.mrf.mxu2  ;;  %v4298_v37 = vadd.f32 %v8278_v26, %v4264_v3  ;;  %v4652_v61 = vadd.f32 %v4651_v52, %v4589_v2  ;;  %v4464_v10 = vadd.f32 %v4463_v6, %v4401_v19  ;;  %v4678_v52 = vld [vmem:[%s8470_s4] sm:$0x1] }
 0x4e8   : > { %v3766_v28 = vpop.f32.mrf.mxu3 }
 0x4e9   : > { %v3767_v51 = vadd.f32 %v3766_v28, %v3659_v62  ;;  %v4360_v55 = vmul.f32 %v4330_v41, %v4298_v37  ;;  %v4549_v11 = vmul.f32 %v5039_v4, %v4298_v37  ;;  %v4404_v40 = vpop.xlane.xlu1 %4403  ;;  %v4653_v36 = vadd.f32 %v4652_v61, %v4592_v48 }
 0x4ea   : > { %v4465_v63 = vadd.f32 %v4464_v10, %v4404_v40 }
 0x4eb   : > { %v3798_v30 = vadd.f32 %v3767_v51, %v3215_v14  ;;  %v4447_v54 = vsel %vm4362_vm2, %v4360_v55, 0.0  ;;  %v4635_v60 = vsel %vm4362_vm2, %v4549_v11, 0.0 }
 0x4ec   : > { %4448 = vadd.xlane.f32.xlu2 %v4447_v54  ;;  %4636 = vadd.xlane.f32.xlu0 %v4635_v60 }
 0x4ed   : > { %v4265_v39 = vadd.f32 %v4234_v15, %v3798_v30 }
 0x4ee   : > { %v4595_v16 = vpop.xlane.xlu0 %4594  ;;  %v4407_v24 = vpop.xlane.xlu2 %4406 }
 0x4ef   : > { %v4299_v46 = vadd.f32 %v8278_v26, %v4265_v39  ;;  %v4466_v42 = vadd.f32 %v4465_v63, %v4407_v24  ;;  %v4654_v32 = vadd.f32 %v4653_v36, %v4595_v16 }
 0x4f1   : > { %v4550_v21 = vmul.f32 %v5040_v49, %v4299_v46  ;;  %v4361_v50 = vmul.f32 %v4331_v47, %v4299_v46 }
 0x4f3   : > { %v4638_v0 = vsel %vm4362_vm2, %v4550_v21, 0.0  ;;  %v4450_v12 = vsel %vm4362_vm2, %v4361_v50, 0.0 }
 0x4f4   : > { %4639 = vadd.xlane.f32.xlu2 %v4638_v0  ;;  %4451 = vadd.xlane.f32.xlu1 %v4450_v12 }
 0x4f6   : > { %v4410_v57 = vpop.xlane.xlu0 %4409  ;;  %v4598_v33 = vpop.xlane.xlu1 %4597 }
 0x4f7   : > { %v4655_v3 = vadd.f32 %v4654_v32, %v4598_v33  ;;  %v4467_v56 = vadd.f32 %v4466_v42, %v4410_v57 }
 0x4fe   : > { %v4601_v26 = vpop.xlane.xlu2 %4600  ;;  %v4413_v38 = vpop.xlane.xlu1 %4412 }
 0x4ff   : > { %v4656_v4 = vadd.f32 %v4655_v3, %v4601_v26  ;;  %v4468_v62 = vadd.f32 %v4467_v56, %v4413_v38 }
 0x506   : > { %v4604_v44 = vpop.xlane.xlu0 %4603  ;;  %v4416_v22 = vpop.xlane.xlu2 %4415 }
 0x507   : > { %v4469_v37 = vadd.f32 %v4468_v62, %v4416_v22  ;;  %v4657_v31 = vadd.f32 %v4656_v4, %v4604_v44 }
 0x50e   : > { %v4419_v13 = vpop.xlane.xlu0 %4418  ;;  %v4607_v35 = vpop.xlane.xlu1 %4606 }
 0x50f   : > { %v4658_v14 = vadd.f32 %v4657_v31, %v4607_v35  ;;  %v4470_v28 = vadd.f32 %v4469_v37, %v4419_v13  ;;  %v4300_v35 = vlaneseq }
 0x516   : > { %v4610_v20 = vpop.xlane.xlu2 %4609  ;;  %v4422_v9 = vpop.xlane.xlu1 %4421 }
 0x517   : > { %v4659_v25 = vadd.f32 %v4658_v14, %v4610_v20  ;;  %v4471_v51 = vadd.f32 %v4470_v28, %v4422_v9 }
 0x51e   : > { %v4613_v29 = vpop.xlane.xlu0 %4612  ;;  %v4425_v43 = vpop.xlane.xlu2 %4424 }
 0x51f   : > { %v4472_v55 = vadd.f32 %v4471_v51, %v4425_v43  ;;  %v4660_v11 = vadd.f32 %v4659_v25, %v4613_v29 }
 0x526   : > { %v4428_v58 = vpop.xlane.xlu0 %4427  ;;  %v4616_v7 = vpop.xlane.xlu1 %4615 }
 0x527   : > { %v4661_v54 = vadd.f32 %v4660_v11, %v4616_v7  ;;  %v4473_v60 = vadd.f32 %v4472_v55, %v4428_v58  ;;  %v4301_v58 = vand.u32 127, %v4300_v35 }
 0x529   : > { %vm4488_vm3 = vcmp.eq.s32.totalorder %v4301_v58, 0  ;;  %vm4676_vm4 = vcmp.eq.s32.totalorder %v4301_v58, 1 }
 0x52f   : > { %v4431_v1 = vpop.xlane.xlu2 %4430  ;;  %v4619_v59 = vpop.xlane.xlu0 %4618 }
 0x530   : > { %v4474_v49 = vadd.f32 %v4473_v60, %v4431_v1  ;;  %v4662_v47 = vadd.f32 %v4661_v54, %v4619_v59 }
 0x537   : > { %v4434_v5 = vpop.xlane.xlu1 %4433  ;;  %v4622_v18 = vpop.xlane.xlu2 %4621 }
 0x538   : > { %v4663_v46 = vadd.f32 %v4662_v47, %v4622_v18  ;;  %v4475_v21 = vadd.f32 %v4474_v49, %v4434_v5 }
 0x53f   : > { %v4437_v17 = vpop.xlane.xlu0 %4436  ;;  %v4625_v34 = vpop.xlane.xlu1 %4624 }
 0x540   : > { %v4664_v50 = vadd.f32 %v4663_v46, %v4625_v34  ;;  %v4476_v0 = vadd.f32 %v4475_v21, %v4437_v17 }
 0x547   : > { %v4440_v41 = vpop.xlane.xlu2 %4439  ;;  %v4628_v53 = vpop.xlane.xlu0 %4627 }
 0x548   : > { %v4477_v45 = vadd.f32 %v4476_v0, %v4440_v41  ;;  %v4665_v27 = vadd.f32 %v4664_v50, %v4628_v53 }
 0x54f   : > { %v4443_v15 = vpop.xlane.xlu1 %4442  ;;  %v4631_v30 = vpop.xlane.xlu2 %4630 }
 0x550   : > { %v4666_v19 = vadd.f32 %v4665_v27, %v4631_v30  ;;  %v4478_v2 = vadd.f32 %v4477_v45, %v4443_v15 }
 0x557   : > { %v4446_v39 = vpop.xlane.xlu0 %4445  ;;  %v4634_v12 = vpop.xlane.xlu1 %4633 }
 0x558   : > { %v4667_v16 = vadd.f32 %v4666_v19, %v4634_v12  ;;  %v4479_v40 = vadd.f32 %v4478_v2, %v4446_v39 }
 0x55f   : > { %v4449_v8 = vpop.xlane.xlu2 %4448  ;;  %v4637_v48 = vpop.xlane.xlu0 %4636 }
 0x560   : > { %v4480_v24 = vadd.f32 %v4479_v40, %v4449_v8  ;;  %v4668_v57 = vadd.f32 %v4667_v16, %v4637_v48 }
 0x567   : > { %v4640_v33 = vpop.xlane.xlu2 %4639  ;;  %v4452_v26 = vpop.xlane.xlu1 %4451 }
 0x568   : > { %v4669_v44 = vadd.f32 %v4668_v57, %v4640_v33  ;;  %v4481_v38 = vadd.f32 %v4480_v24, %v4452_v26 }
 0x56a   : > { %v4670_v22 = vrot.slane %v4669_v44, 4  ;;  %v4482_v13 = vrot.slane %v4481_v38, 4 }
 0x56c   : > { %v4671_v20 = vadd.f32 %v4670_v22, %v4669_v44  ;;  %v4483_v29 = vadd.f32 %v4482_v13, %v4481_v38 }
 0x56e   : > { %v4672_v9 = vrot.slane %v4671_v20, 2  ;;  %v4484_v43 = vrot.slane %v4483_v29, 2 }
 0x570   : > { %v4673_v7 = vadd.f32 %v4672_v9, %v4671_v20  ;;  %v4485_v1 = vadd.f32 %v4484_v43, %v4483_v29 }
 0x572   : > { %v4674_v59 = vrot.slane %v4673_v7, 1  ;;  %v4486_v23 = vrot.slane %v4485_v1, 1 }
 0x574   : > { %v4675_v5 = vadd.f32 %v4674_v59, %v4673_v7  ;;  %v4487_v6 = vadd.f32 %v4486_v23, %v4485_v1 }
 0x576   : > { %v4489_v18 = vsel %vm4488_vm3, %v4487_v6, 0.0 }
 0x577   : > { %v4677_v61 = vsel %vm4676_vm4, %v4675_v5, %v4489_v18 }
 0x578   : > { %v4679_v10 = vadd.f32 %v4678_v52, %v4677_v61 }
 0x57a   : > { %4681 = vst.msk [vmem:[%s216_s17] sm:$0x1] %vm4680_vm5, %v4679_v10 }
 0x57b   : > { %5232 = shalt.err (!%p5229_p3)
}
 0x57c   : > { %5076 = dma.vmem_to_hbm [thread:$0]  (%p5337_p5), %s4694_s25, 16, %s4696_s26, %s4683_s22  }
 0x57d PF: > { %p5082_p4 = scmp.ge.s32.totalorder %s5267_s21, 2  ;;  %s4707_s12 = sand.u32 1, %s5255_s18  }
 0x57e   : > { %s4708_s14 = scalar_lea.sflag [#allocation3], %s4707_s12 }
 0x57f   : > { %p5079_p7 = pnand %p5082_p4, %p5341_p6 }
 0x581   : > { %p5080_p8 = pneg %p5079_p7 }
 0x583   : > { %5250 = dma.done.wait (%p5080_p8), %s4708_s14, 16  }
 0x584   : > { %5252 = vsyncadd (%p5080_p8), %s4708_s14, 4294967280  ;;  %p15_p9 = scmp.ge.s32.totalorder %s5324_s24, 4   ;;  %s8760_s18 = smov %s5259_s19 }
 0x585   : > { %s8761_s19 = smov %s5263_s20  ;;  %s8762_s20 = smov %s5335_s27 }
 0x586   : > { %s8763_s21 = smov %s5324_s24  ;;  %17 = sbr.rel (!%p15_p9) target bundleno = 3 (0x3), region = 84 }
 0x58b   :  { %4713 = vsyncpa [#allocation3], 1 }
 0x58c   :  { %4715 = vsyncpa [#allocation3 + $0x1], 1 }

</bundles_post_ra>
